<compile_context>
chip_gen: v6e
topology: v6e:2x2x1
jax: 0.10.0
libtpu: 0.0.40
codegen_flags: <defaults>
</compile_context>

<pallas_src>
import jax
import jax.numpy as jnp
from jax.experimental import pallas as pl
from jax.experimental.pallas import tpu as pltpu


# ---------------------------------------------------------------------------
# Concrete `fcn` used to instantiate GeneralLayer (differentiable,
# elementwise).  Any other jnp-expressible elementwise fcn can be swapped in.
# ---------------------------------------------------------------------------
def _gelu_tanh(x):
    # tanh-approximation GELU, computed in f32.
    x = x.astype(jnp.float32)
    c = jnp.float32(0.7978845608028654)  # sqrt(2/pi)
    return 0.5 * x * (1.0 + jnp.tanh(c * (x + 0.044715 * (x * x * x))))


# ---------------------------------------------------------------------------
# Tiling configuration.
# ---------------------------------------------------------------------------
_LANE_WIDTH = 512              # lane-dense last dim (multiple of 128)
_MAX_TILE_ROWS = 512           # 512 x 512 x f32 = 1 MiB per buffer
_SMALL_FAST_PATH_ELEMS = 64 * 1024


def _sublane_packing(dtype) -> int:
    # f32 -> 8, bf16/f16 -> 16, int8/fp8 -> 32 rows per packed sublane group.
    itemsize = jnp.dtype(dtype).itemsize
    return max(8, 32 // max(itemsize, 1))


def _round_up(n: int, m: int) -> int:
    return ((n + m - 1) // m) * m


def _make_kernel(fcn):
    """Pallas kernel: elementwise fcn on one VMEM tile (VPU + EUP)."""

    def kernel(x_ref, o_ref):
        x = x_ref[...].astype(jnp.float32)   # one explicit upcast (v5e-safe)
        o_ref[...] = fcn(x).astype(o_ref.dtype)

    return kernel


class GeneralLayerPallas:
    """JAX/Pallas equivalent of the PyTorch GeneralLayer module."""

    def __init__(self, n_inputs: int, fcn=_gelu_tanh):
        self.n_inputs = n_inputs
        self.fcn = fcn
        self._kernel = _make_kernel(fcn)

    def __call__(self, x: jax.Array) -> jax.Array:
        if x.shape[-1] != self.n_inputs:
            raise IndexError(
                f"Expecting {self.n_inputs} inputs, got {x.shape[-1]}"
            )
        # Tiny-input fast path: launch + DMA overhead would dominate, and XLA
        # can fuse the elementwise fcn into neighboring ops.
        if x.size <= _SMALL_FAST_PATH_ELEMS:
            return self.fcn(x).astype(x.dtype)
        return self._pallas_forward(x)

    # -----------------------------------------------------------------------
    def _pallas_forward(self, x: jax.Array) -> jax.Array:
        orig_shape = x.shape
        dtype = x.dtype
        n = x.size

        lane = _LANE_WIDTH
        sub = _sublane_packing(dtype)

        rows = pl.cdiv(n, lane)
        # ~1 MiB, sublane-aligned tiles; shrink for small row counts.
        tile_r = min(_MAX_TILE_ROWS, _round_up(rows, sub))
        rows_padded = _round_up(rows, tile_r)
        padded_n = rows_padded * lane

        # Lane-dense reshape (+ pad the tail so no tile ever reads OOB).
        flat = x.reshape(-1)
        if padded_n != n:
            flat = jnp.pad(flat, (0, padded_n - n))
        x2d = flat.reshape(rows_padded, lane)

        grid = (rows_padded // tile_r,)
        out2d = pl.pallas_call(
            self._kernel,
            out_shape=jax.ShapeDtypeStruct((rows_padded, lane), dtype),
            grid=grid,
            in_specs=[pl.BlockSpec((tile_r, lane), lambda i: (i, 0))],
            out_specs=pl.BlockSpec((tile_r, lane), lambda i: (i, 0)),
            compiler_params=pltpu.CompilerParams(
                dimension_semantics=("parallel",),  # shard tiles on v7x dual TC
            ),
        )(x2d)

        out_flat = out2d.reshape(-1)
        if padded_n != n:
            out_flat = out_flat[:n]
        return out_flat.reshape(orig_shape)


if __name__ == "__main__":
    key = jax.random.PRNGKey(0)
    k1, k2 = jax.random.split(key)

    # (1) Small shape consistent with the module's forward: (batch, seq, n_inputs).
    #     Hits the plain-JAX fast path (512 elements).
    n_small = 32
    x_small = jax.random.normal(k1, (2, 8, n_small), dtype=jnp.float32)
    layer_small = GeneralLayerPallas(n_inputs=n_small)
    out_small = jax.block_until_ready(layer_small(x_small))
    ref_small = _gelu_tanh(x_small).astype(x_small.dtype)
    assert out_small.shape == x_small.shape
    assert jnp.allclose(out_small, ref_small, atol=1e-5, rtol=1e-5)

    # (2) Moderately sized input to exercise the tiled / pipelined Pallas path
    #     (4*256*512 = 524288 elems -> rows=1024, tile_r=512, grid=(2,)).
    n_big = 512
    x_big = jax.random.normal(k2, (4, 256, n_big), dtype=jnp.float32)
    layer_big = GeneralLayerPallas(n_inputs=n_big)
    out_big = jax.block_until_ready(layer_big(x_big))
    ref_big = _gelu_tanh(x_big).astype(x_big.dtype)
    assert out_big.shape == x_big.shape
    assert jnp.allclose(out_big, ref_big, atol=1e-5, rtol=1e-5)

    # TODO(synk): the PyTorch module accepts an arbitrary Python callable as
    # `fcn`; only jnp-expressible elementwise fcns are supported in-kernel.
    print("KERNEL_OK")
</pallas_src>

<mosaic_0001>
module attributes {stable_mosaic.version = 11 : i64} {
  func.func @kernel(%arg0: i32, %arg1: memref<512x512xf32, #tpu.memory_space<vmem>>, %arg2: memref<512x512xf32, #tpu.memory_space<vmem>>) attributes {dimension_semantics = [#tpu.dimension_semantics<parallel>], iteration_bounds = array<i64: 2>, scalar_prefetch = 0 : i64, scratch_operands = 0 : i64, tpu.core_type = #tpu.core_type<tc>, window_params = [{transform_indices = @transform_0, window_bounds = array<i64: 512, 512>}, {transform_indices = @transform_1, window_bounds = array<i64: 512, 512>}]} {
    %c0 = arith.constant 0 : index
    %c0_0 = arith.constant 0 : index
    %0 = vector.load %arg1[%c0, %c0_0] : memref<512x512xf32, #tpu.memory_space<vmem>>, vector<512x512xf32>
    %cst = arith.constant 5.000000e-01 : f32
    %1 = vector.broadcast %cst : f32 to vector<512x512xf32>
    %2 = arith.mulf %1, %0 : vector<512x512xf32>
    %3 = arith.mulf %0, %0 : vector<512x512xf32>
    %4 = arith.mulf %3, %0 : vector<512x512xf32>
    %cst_1 = arith.constant 4.471500e-02 : f32
    %5 = vector.broadcast %cst_1 : f32 to vector<512x512xf32>
    %6 = arith.mulf %5, %4 : vector<512x512xf32>
    %7 = arith.addf %0, %6 : vector<512x512xf32>
    %cst_2 = arith.constant 0.797884583 : f32
    %8 = vector.broadcast %cst_2 : f32 to vector<512x512xf32>
    %9 = arith.mulf %8, %7 : vector<512x512xf32>
    %10 = math.tanh %9 : vector<512x512xf32>
    %cst_3 = arith.constant 1.000000e+00 : f32
    %11 = vector.broadcast %cst_3 : f32 to vector<512x512xf32>
    %12 = arith.addf %11, %10 : vector<512x512xf32>
    %13 = arith.mulf %2, %12 : vector<512x512xf32>
    %c0_4 = arith.constant 0 : index
    %c0_5 = arith.constant 0 : index
    %14 = vector.load %arg2[%c0_4, %c0_5] : memref<512x512xf32, #tpu.memory_space<vmem>>, vector<512x512xf32>
    tpu.vector_store %arg2[%c0_4, %c0_5], %13 {strides = array<i32>} : memref<512x512xf32, #tpu.memory_space<vmem>>, vector<512x512xf32>,
    return
  }
  func.func @transform_0(%arg0: i32) -> (i32, i32) {
    %c0_i32 = arith.constant 0 : i32
    %c0_i32_0 = arith.constant 0 : i32
    return %arg0, %c0_i32 : i32, i32
  }
  func.func @transform_1(%arg0: i32) -> (i32, i32) {
    %c0_i32 = arith.constant 0 : i32
    %c0_i32_0 = arith.constant 0 : i32
    return %arg0, %c0_i32 : i32, i32
  }
}

</mosaic_0001>

<bundles_post_ra>
// kernel: tpu_custom_call.1
= control target key start
LH: loop header
LB: loop body
LE: loop exit
PB: predicated region body
PF: predicated region fallthrough
CT: control target
= control target key end

     0   :  { %6 = vsyncpa [#allocation3], 0  ;;  %s6200_s0 = inlined_call_operand.hbm [shape: f32[1024,512], index: 0, kind: input, shape index: {}]   ;;  %s6201_s1 = inlined_call_operand.hbm [shape: f32[1024,512], index: 1, kind: output, shape index: {}]  }
   0x1   :  { %8 = vsyncpa [#allocation3 + $0x1], 0 }
   0x2   :  { %9 = vsyncpa [#allocation4], 0 }
   0x3   :  { %11 = vsyncpa [#allocation4 + $0x1], 0  ;;  %s3734_s6 = smov 0   ;;  %s3736_s7 = smov 0  }
   0x4   :  { %s3738_s8 = smov 0   ;;  %s3740_s9 = smov 0  }
   0x5 LB: > { %s3755_s10 = sadd.s32 4294967295, %s3716_s9   ;;  %s3042_s11 = sadd.s32 4294967294, %s3716_s9   ;;  %s3716_s9 = sphi %s3740_s9, %s6216_s9   ;;  %s3712_s8 = sphi %s3738_s8, %s6215_s8   ;;  %s3708_s7 = sphi %s3736_s7, %s6214_s7   ;;  %s3704_s6 = sphi %s3734_s6, %s6213_s6  }
   0x6   : > { %s3759_s12 = sadd.s32 1, %s3716_s9   ;;  %s24_s13 = sadd.s32 1, %s3712_s8 }
   0x7   : > { %s21_s14 = ssub.s32 %s3716_s9, %s3759_s12  ;;  %p31_p0 = scmp.ne.s32.totalorder %s3712_s8, %s3708_s7 }
   0x8   : > { %p22_p1 = scmp.eq.s32.totalorder %s21_s14, 0  ;;  %p32_p2 = scmp.eq.s32.totalorder %s3716_s9, 0 }
   0x9   : > { %p37_p3 = scmp.ne.s32.totalorder %s3708_s7, %s3704_s6  ;;  %p38_p4 = scmp.eq.s32.totalorder %s3755_s10, 0 }
   0xa   : > { %s3771_s15 = scalar_select %p22_p1, %s3712_s8, %s24_s13  }
   0xb   : > { %p3773_p5 = por %p32_p2, %p31_p0  ;;  %p3777_p6 = por %p38_p4, %p37_p3 }
   0xc   : > { %p61_p7 = scmp.eq.s32.totalorder %s3755_s10, 1  ;;  %p67_p8 = scmp.eq.s32.totalorder %s3042_s11, 1 }
   0xd   : > { %s6205_s17 = scalar_select %p3777_p6, 1, 0 }
   0xe   : > { %p3074_p10 = scmp.lt.s32.totalorder %s3716_s9, 2  ;;  %p3784_p11 = por %p61_p7, %p31_p0 }
   0xf   : > { %p3788_p12 = por %p67_p8, %p37_p3  ;;  %s87_s20 = sand.u32 1, %s3712_s8  }
  0x10   : > { %s6206_s18 = scalar_select %p3784_p11, 1, 0 }
  0x11   : > { %s6207_s19 = scalar_select %p3788_p12, 1, 0 }
  0x12   : > { %s3059_s21 = sshll.u32 %s3716_s9, 15  ;;  %s3045_s22 = sshll.u32 %s87_s20, 11 }
  0x13   : > { %s3797_s25 = scalar_lea.hbm %s6200_s0, %s3059_s21  ;;  %s91_s26 = scalar_lea.vmem [#allocation2], %s3045_s22 }
  0x14   : > { %s99_s27 = sshll.u32 %s91_s26, 4  ;;  %p3801_p13 = pnand %p3074_p10, %p3773_p5  ;;  %s3805_s27 = int_to_ptr.vmem [resolvable:$true] %s99_s27 }
  0x15   : > { %s3807_s29 = scalar_lea.sflag [#allocation3], %s87_s20  ;;  %s3624_s30 = scalar_lea.hbm %s3797_s25, 32768 }
  0x16   : > { %p3625_p0 = scmp.ne.s32.totalorder %s3797_s25, %s3624_s30  ;;  %p3626_p1 = pneg %p3801_p13 }
  0x17   : > { %s3629_s4 = scalar_lea.hbm %s6200_s0, 65536  ;;  %p3630_p4 = scmp.lt.s32.totalorder %s3797_s25, %s6200_s0 }
  0x18   : > { %p3627_p2 = pnand %p3626_p1, %p3625_p0  ;;  %p3631_p5 = scmp.lt.s32.totalorder %s3629_s4, %s3624_s30 }
  0x1a   : > { %p3628_p3 = pneg %p3627_p2  ;;  %p3632_p7 = por %p3631_p5, %p3630_p4 }
  0x1c   : > { %p3633_p8 = pnand %p3632_p7, %p3628_p3 }
  0x1e   : > { %3636 = shalt.err (!%p3633_p8)
}
  0x1f   : > { %s3637_s13 = scalar_lea.vmem %s3805_s27, 32768  ;;  %s3718_s14 = smov [#allocation2]  }
  0x20   : > { %p3638_p10 = scmp.ne.s32.totalorder %s3805_s27, %s3637_s13  ;;  %s3642_s16 = sshll.u32 %s3718_s14, 4  ;;  %s3643_s16 = int_to_ptr.vmem [resolvable:$false] %s3642_s16 }
  0x21   : > { %s3644_s20 = scalar_lea.vmem %s3643_s16, 65536  ;;  %p3645_p2 = scmp.lt.s32.totalorder %s3805_s27, %s3643_s16 }
  0x22   : > { %p3640_p9 = pnand %p3638_p10, %p3626_p1  ;;  %p3646_p12 = scmp.lt.s32.totalorder %s3644_s20, %s3637_s13 }
  0x24   : > { %p3641_p0 = pneg %p3640_p9  ;;  %p3647_p11 = por %p3646_p12, %p3645_p2 }
  0x26   : > { %p3648_p6 = pnand %p3647_p11, %p3641_p0 }
  0x28   : > { %3651 = shalt.err (!%p3648_p6)
}
  0x29   : > { %s3719_s21 = smov 512   ;;  %s3720_s22 = smov 32  }
  0x2a   : > { %3069 = dma.hbm_to_vmem [thread:$0]  (!%p3801_p13), %s3797_s25, 32768, %s3805_s27, %s3807_s29, %s3719_s21, %s3719_s21, %s3720_s22  }
  0x2b   : > { %p3049_p9 = scmp.ge.s32.totalorder %s3716_s9, 1  ;;  %p107_p1 = scmp.lt.s32.totalorder %s3716_s9, 3 }
  0x2d   : > { %p108_p3 = pnand %p3049_p9, %p107_p1 }
  0x2e   : > { %s3831_s23 = sand.u32 (!%p108_p3), 1, %s3708_s7   ;;  %p6209_p6 = scmp.ne.s32.totalorder (!%p108_p3), %s6205_s17, 0 }
  0x2f   : > { %111 = sbr.rel (%p108_p3) target bundleno = 659 (0x293), region = 24  ;;  %s3050_s24 = sshll.u32 (!%p108_p3), %s3831_s23, 11 }
  0x30   : > { %s114_s26 = scalar_lea.sflag (!%p108_p3), [#allocation3], %s3831_s23  ;;  %s3837_s30 = scalar_lea.vmem (!%p108_p3), [#allocation2], %s3050_s24 }
  0x34   : > { %3695 = dma.done.wait (%p6209_p6), %s114_s26, 32768  }
  0x35   : > { %3697 = vsyncadd (%p6209_p6), %s114_s26, 4294934528  ;;  %v138_v0 = vld [vmem:[%s3837_s30] sm:$0xff]  ;;  %v139_v1 = vld [vmem:[%s3837_s30 + $0x8] sm:$0xff]  ;;  %s3960_s17 = scalar_lea.vmem [#allocation5], %s3050_s24  ;;  %s3061_s25 = sshll.u32 %s3755_s10, 15 }
  0x36   : > { %v140_v2 = vld [vmem:[%s3837_s30 + $0x10] sm:$0xff]  ;;  %v650_v3 = vmul.f32 %v138_v0, %v138_v0  ;;  %v651_v4 = vmul.f32 %v139_v1, %v139_v1  ;;  %v141_v5 = vld [vmem:[%s3837_s30 + $0x18] sm:$0xff]  ;;  %v3848_v6 = vld [vmem:[%s3837_s30 + $0x20] sm:$0xff]  ;;  %v3878_v42 = vmul.f32 0.5, %v138_v0  ;;  %v3887_v49 = vmul.f32 0.5, %v139_v1  ;;  %s2969_s27 = sshll.u32 %s3960_s17, 4  ;;  %s6153_s2 = scalar_lea.hbm %s6201_s1, %s3061_s25  ;;  %s6155_s27 = int_to_ptr.vmem [resolvable:$true] %s2969_s27 }
  0x37   : > { %v3851_v7 = vld [vmem:[%s3837_s30 + $0x28] sm:$0xff]  ;;  %v652_v8 = vmul.f32 %v140_v2, %v140_v2  ;;  %v653_v9 = vmul.f32 %v141_v5, %v141_v5  ;;  %v654_v12 = vmul.f32 %v3848_v6, %v3848_v6  ;;  %v3856_v13 = vld [vmem:[%s3837_s30 + $0x30] sm:$0xff]  ;;  %v3865_v24 = vld [vmem:[%s3837_s30 + $0x38] sm:$0xff]  ;;  %v3894_v53 = vmul.f32 0.5, %v140_v2  ;;  %s2955_s10 = scalar_lea.sflag [#allocation4], %s3831_s23  ;;  %s3652_s3 = scalar_lea.vmem %s6155_s27, 32768 }
  0x38   : > { %v906_v10 = vmul.f32 %v650_v3, %v138_v0  ;;  %v907_v11 = vmul.f32 %v651_v4, %v139_v1  ;;  %v655_v16 = vmul.f32 %v3851_v7, %v3851_v7  ;;  %v656_v23 = vmul.f32 %v3856_v13, %v3856_v13  ;;  %v3872_v36 = vld [vmem:[%s3837_s30 + $0x40] sm:$0xff]  ;;  %v3875_v37 = vld [vmem:[%s3837_s30 + $0x48] sm:$0xff]  ;;  %v3885_v48 = vld [vmem:[%s3837_s30 + $0x50] sm:$0xff]  ;;  %p3653_p11 = scmp.ne.s32.totalorder %s6155_s27, %s3652_s3  ;;  %p6210_p12 = scmp.ne.s32.totalorder %s6206_s18, 0 }
  0x39   : > { %v908_v14 = vmul.f32 %v652_v8, %v140_v2  ;;  %v909_v15 = vmul.f32 %v653_v9, %v141_v5  ;;  %v910_v19 = vmul.f32 %v654_v12, %v3848_v6  ;;  %v657_v35 = vmul.f32 %v3865_v24, %v3865_v24  ;;  %v3892_v52 = vld [vmem:[%s3837_s30 + $0x58] sm:$0xff]  ;;  %v3902_v59 = vld [vmem:[%s3837_s30 + $0x60] sm:$0xff]  ;;  %v3920_v9 = vld [vmem:[%s3837_s30 + $0x70] sm:$0xff]  ;;  %s3721_s4 = smov [#allocation5]  }
  0x3a   : > { %v1162_v17 = vmul.f32 0.044715, %v906_v10  ;;  %v1163_v18 = vmul.f32 0.044715, %v907_v11  ;;  %v911_v22 = vmul.f32 %v655_v16, %v3851_v7  ;;  %v912_v31 = vmul.f32 %v656_v23, %v3856_v13  ;;  %p3654_p13 = pnand %p3653_p11, %p6210_p12  ;;  %s3656_s5 = sshll.u32 %s3721_s4, 4  ;;  %s3657_s5 = int_to_ptr.vmem [resolvable:$false] %s3656_s5 }
  0x3b   : > { %v1164_v20 = vmul.f32 0.044715, %v908_v14  ;;  %v1165_v21 = vmul.f32 0.044715, %v909_v15  ;;  %v1166_v27 = vmul.f32 0.044715, %v910_v19  ;;  %v913_v44 = vmul.f32 %v657_v35, %v3865_v24  ;;  %p3659_p5 = scmp.lt.s32.totalorder %s6155_s27, %s3657_s5 }
  0x3c   : > { %v1418_v25 = vadd.f32 %v1162_v17, %v138_v0  ;;  %v1419_v26 = vadd.f32 %v1163_v18, %v139_v1  ;;  %v1167_v30 = vmul.f32 0.044715, %v911_v22  ;;  %v1168_v41 = vmul.f32 0.044715, %v912_v31  ;;  %p3655_p4 = pneg %p3654_p13  ;;  %s3658_s11 = scalar_lea.vmem %s3657_s5, 65536 }
  0x3d   : > { %v1420_v28 = vadd.f32 %v1164_v20, %v140_v2  ;;  %v1421_v29 = vadd.f32 %v1165_v21, %v141_v5  ;;  %v1422_v34 = vadd.f32 %v1166_v27, %v3848_v6  ;;  %v658_v47 = vmul.f32 %v3872_v36, %v3872_v36  ;;  %v3910_v2 = vld [vmem:[%s3837_s30 + $0x68] sm:$0xff]  ;;  %v3936_v20 = vld [vmem:[%s3837_s30 + $0x78] sm:$0xff]  ;;  %p3660_p7 = scmp.lt.s32.totalorder %s3658_s11, %s3652_s3 }
  0x3e   : > { %v1674_v32 = vmul.f32 0.7978846, %v1418_v25  ;;  %v1675_v33 = vmul.f32 0.7978846, %v1419_v26  ;;  %v1423_v40 = vadd.f32 %v1167_v30, %v3851_v7  ;;  %v1424_v46 = vadd.f32 %v1168_v41, %v3856_v13 }
  0x3f   : > { %v1676_v38 = vmul.f32 0.7978846, %v1420_v28  ;;  %v1677_v39 = vmul.f32 0.7978846, %v1421_v29  ;;  %v1678_v43 = vmul.f32 0.7978846, %v1422_v34  ;;  %v659_v51 = vmul.f32 %v3875_v37, %v3875_v37  ;;  %p3661_p8 = por %p3660_p7, %p3659_p5 }
  0x40   : > { %3112 = vtanh.f32 %v1674_v32  ;;  %v1679_v45 = vmul.f32 0.7978846, %v1423_v40  ;;  %v1169_v50 = vmul.f32 0.044715, %v913_v44  ;;  %v1680_v54 = vmul.f32 0.7978846, %v1424_v46 }
  0x41   : > { %3114 = vtanh.f32 %v1675_v33  ;;  %v914_v55 = vmul.f32 %v658_v47, %v3872_v36  ;;  %v915_v57 = vmul.f32 %v659_v51, %v3875_v37  ;;  %v660_v58 = vmul.f32 %v3885_v48, %v3885_v48  ;;  %p3662_p10 = pnand %p3661_p8, %p3655_p4 }
  0x42   : > { %3116 = vtanh.f32 %v1676_v38  ;;  %v1425_v56 = vadd.f32 %v1169_v50, %v3865_v24  ;;  %v3904_v60 = vmul.f32 0.5, %v141_v5  ;;  %v661_v62 = vmul.f32 %v3892_v52, %v3892_v52 }
  0x43   : > { %3118 = vtanh.f32 %v1677_v39  ;;  %v1170_v61 = vmul.f32 0.044715, %v914_v55  ;;  %v1171_v0 = vmul.f32 0.044715, %v915_v57  ;;  %v916_v1 = vmul.f32 %v660_v58, %v3885_v48 }
  0x44   : > { %3120 = vtanh.f32 %v1678_v43  ;;  %v1681_v63 = vmul.f32 0.7978846, %v1425_v56  ;;  %v3913_v3 = vmul.f32 0.5, %v3848_v6  ;;  %v917_v5 = vmul.f32 %v661_v62, %v3892_v52 }
  0x45   : > { %3122 = vtanh.f32 %v1679_v45  ;;  %v1426_v4 = vadd.f32 %v1170_v61, %v3872_v36  ;;  %v662_v8 = vmul.f32 %v3902_v59, %v3902_v59  ;;  %v3923_v10 = vmul.f32 0.5, %v3851_v7  ;;  %v3965_v61 = vld [vmem:[%s3837_s30 + $0x88] sm:$0xff] }
  0x46   : > { %3124 = vtanh.f32 %v1680_v54  ;;  %v1427_v11 = vadd.f32 %v1171_v0, %v3875_v37  ;;  %v1172_v12 = vmul.f32 0.044715, %v916_v1  ;;  %v1173_v6 = vmul.f32 0.044715, %v917_v5  ;;  %v3975_v5 = vld [vmem:[%s3837_s30 + $0x90] sm:$0xff] }
  0x47   : > { %3126 = vtanh.f32 %v1681_v63  ;;  %v1682_v14 = vmul.f32 0.7978846, %v1426_v4  ;;  %v918_v15 = vmul.f32 %v662_v8, %v3902_v59  ;;  %v663_v16 = vmul.f32 %v3910_v2, %v3910_v2 }
  0x48   : > { %v3930_v17 = vmul.f32 0.5, %v3856_v13  ;;  %v1683_v18 = vmul.f32 0.7978846, %v1427_v11  ;;  %v1428_v19 = vadd.f32 %v1172_v12, %v3885_v48  ;;  %v664_v7 = vmul.f32 %v3920_v9, %v3920_v9 }
  0x49   : > { %3128 = vtanh.f32 %v1682_v14  ;;  %v1429_v21 = vadd.f32 %v1173_v6, %v3892_v52  ;;  %v1174_v22 = vmul.f32 0.044715, %v918_v15  ;;  %v919_v23 = vmul.f32 %v663_v16, %v3910_v2  ;;  %v3984_v14 = vld [vmem:[%s3837_s30 + $0x98] sm:$0xff] }
  0x4a   : > { %v3941_v25 = vmul.f32 0.5, %v3865_v24  ;;  %3130 = vtanh.f32 %v1683_v18  ;;  %v1684_v13 = vmul.f32 0.7978846, %v1428_v19  ;;  %v920_v26 = vmul.f32 %v664_v7, %v3920_v9 }
  0x4b   : > { %v1685_v28 = vmul.f32 0.7978846, %v1429_v21  ;;  %v1430_v29 = vadd.f32 %v1174_v22, %v3902_v59  ;;  %v1175_v30 = vmul.f32 0.044715, %v919_v23  ;;  %v665_v31 = vmul.f32 %v3936_v20, %v3936_v20  ;;  %v3995_v21 = vld [vmem:[%s3837_s30 + $0xa0] sm:$0xff] }
  0x4c   : > { %v3948_v34 = vmul.f32 0.5, %v3872_v36  ;;  %3132 = vtanh.f32 %v1684_v13  ;;  %v1176_v24 = vmul.f32 0.044715, %v920_v26  ;;  %v3955_v36 = vld [vmem:[%s3837_s30 + $0x80] sm:$0xff]  ;;  %v403_v11 = vmul.f32 0.5, %v3875_v37 }
  0x4d   : > { %v3113_v27 = vpop.eup %3112  ;;  %3134 = vtanh.f32 %v1685_v28  ;;  %v1686_v39 = vmul.f32 0.7978846, %v1430_v29  ;;  %v1431_v40 = vadd.f32 %v1175_v30, %v3910_v2  ;;  %v921_v46 = vmul.f32 %v665_v31, %v3936_v20 }
  0x4e   : > { %v3115_v32 = vpop.eup %3114  ;;  %v2186_v33 = vadd.f32 1.0, %v3113_v27  ;;  %v1432_v45 = vadd.f32 %v1176_v24, %v3920_v9  ;;  %v666_v0 = vmul.f32 %v3955_v36, %v3955_v36  ;;  %v404_v16 = vmul.f32 0.5, %v3885_v48 }
  0x4f   : > { %v3117_v35 = vpop.eup %3116  ;;  %v2187_v38 = vadd.f32 1.0, %v3115_v32  ;;  %3136 = vtanh.f32 %v1686_v39  ;;  %v1687_v54 = vmul.f32 0.7978846, %v1431_v40  ;;  %v1177_v58 = vmul.f32 0.044715, %v921_v46 }
  0x50   : > { %v3119_v41 = vpop.eup %3118  ;;  %v2442_v43 = vmul.f32 %v2186_v33, %v3878_v42  ;;  %v2188_v44 = vadd.f32 1.0, %v3117_v35  ;;  %v1688_v57 = vmul.f32 0.7978846, %v1432_v45  ;;  %v922_v12 = vmul.f32 %v666_v0, %v3955_v36 }
  0x51   : > { %v3121_v47 = vpop.eup %3120  ;;  %v2443_v50 = vmul.f32 %v2187_v38, %v3887_v49  ;;  %v2189_v51 = vadd.f32 1.0, %v3119_v41  ;;  %3138 = vtanh.f32 %v1687_v54  ;;  %v1433_v4 = vadd.f32 %v1177_v58, %v3936_v20  ;;  %v4012_v38 = vld [vmem:[%s3837_s30 + $0xa8] sm:$0xff] }
  0x52   : > { %v3123_v55 = vpop.eup %3122  ;;  %2698 = vst [vmem:[%s3960_s17] sm:$0xff] %v2442_v43  ;;  %v2444_v42 = vmul.f32 %v2188_v44, %v3894_v53  ;;  %v2190_v56 = vadd.f32 1.0, %v3121_v47  ;;  %3140 = vtanh.f32 %v1688_v57  ;;  %v1178_v37 = vmul.f32 0.044715, %v922_v12 }
  0x53   : > { %v3125_v49 = vpop.eup %3124  ;;  %2699 = vst [vmem:[%s3960_s17 + $0x8] sm:$0xff] %v2443_v50  ;;  %v2445_v62 = vmul.f32 %v2189_v51, %v3904_v60  ;;  %v2191_v63 = vadd.f32 1.0, %v3123_v55  ;;  %v1689_v18 = vmul.f32 0.7978846, %v1433_v4  ;;  %v668_v7 = vmul.f32 %v3975_v5, %v3975_v5  ;;  %v4022_v55 = vld [vmem:[%s3837_s30 + $0xb0] sm:$0xff] }
  0x54   : > { %2700 = vst [vmem:[%s3960_s17 + $0x10] sm:$0xff] %v2444_v42  ;;  %v2446_v53 = vmul.f32 %v2190_v56, %v3913_v3  ;;  %v2192_v1 = vadd.f32 1.0, %v3125_v49  ;;  %v3127_v8 = vpop.eup %3126  ;;  %v667_v3 = vmul.f32 %v3965_v61, %v3965_v61  ;;  %v406_v23 = vmul.f32 0.5, %v3902_v59 }
  0x55   : > { %2701 = vst [vmem:[%s3960_s17 + $0x18] sm:$0xff] %v2445_v62  ;;  %v2447_v60 = vmul.f32 %v2191_v63, %v3923_v10  ;;  %v2193_v15 = vadd.f32 1.0, %v3127_v8  ;;  %v405_v10 = vmul.f32 0.5, %v3892_v52  ;;  %3142 = vtanh.f32 %v1689_v18 }
  0x56   : > { %2702 = vst [vmem:[%s3960_s17 + $0x20] sm:$0xff] %v2446_v53  ;;  %v2448_v6 = vmul.f32 %v2192_v1, %v3930_v17  ;;  %v923_v19 = vmul.f32 %v667_v3, %v3965_v61  ;;  %v3129_v22 = vpop.eup %3128  ;;  %v669_v48 = vmul.f32 %v3984_v14, %v3984_v14  ;;  %v1434_v26 = vadd.f32 %v1178_v37, %v3955_v36  ;;  %v4029_v53 = vld [vmem:[%s3837_s30 + $0xb8] sm:$0xff]  ;;  %v4035_v3 = vld [vmem:[%s3837_s30 + $0xc0] sm:$0xff] }
  0x57   : > { %2703 = vst [vmem:[%s3960_s17 + $0x28] sm:$0xff] %v2447_v60  ;;  %v2449_v17 = vmul.f32 %v2193_v15, %v3941_v25  ;;  %v3131_v52 = vpop.eup %3130  ;;  %v2194_v13 = vadd.f32 1.0, %v3129_v22  ;;  %v924_v28 = vmul.f32 %v668_v7, %v3975_v5  ;;  %v407_v30 = vmul.f32 0.5, %v3910_v2  ;;  %v4048_v22 = vld [vmem:[%s3837_s30 + $0xd0] sm:$0xff] }
  0x58   : > { %2704 = vst [vmem:[%s3960_s17 + $0x30] sm:$0xff] %v2448_v6  ;;  %v1179_v27 = vmul.f32 0.044715, %v923_v19  ;;  %v2195_v29 = vadd.f32 1.0, %v3131_v52  ;;  %v925_v25 = vmul.f32 %v669_v48, %v3984_v14  ;;  %v670_v59 = vmul.f32 %v3995_v21, %v3995_v21 }
  0x59   : > { %2705 = vst [vmem:[%s3960_s17 + $0x38] sm:$0xff] %v2449_v17  ;;  %v3133_v31 = vpop.eup %3132  ;;  %v2450_v32 = vmul.f32 %v2194_v13, %v3948_v34  ;;  %v1690_v33 = vmul.f32 0.7978846, %v1434_v26  ;;  %v1180_v35 = vmul.f32 0.044715, %v924_v28  ;;  %v671_v54 = vmul.f32 %v4012_v38, %v4012_v38 }
  0x5a   : > { %v1435_v24 = vadd.f32 %v1179_v27, %v3965_v61  ;;  %v3135_v39 = vpop.eup %3134  ;;  %v2451_v40 = vmul.f32 %v2195_v29, %v403_v11  ;;  %v2196_v41 = vadd.f32 1.0, %v3133_v31  ;;  %v1181_v2 = vmul.f32 0.044715, %v925_v25  ;;  %v4064_v25 = vld [vmem:[%s3837_s30 + $0xd8] sm:$0xff] }
  0x5b   : > { %v926_v43 = vmul.f32 %v670_v59, %v3995_v21  ;;  %2706 = vst [vmem:[%s3960_s17 + $0x40] sm:$0xff] %v2450_v32  ;;  %v2197_v44 = vadd.f32 1.0, %v3135_v39  ;;  %3144 = vtanh.f32 %v1690_v33  ;;  %v1436_v34 = vadd.f32 %v1180_v35, %v3975_v5  ;;  %v4067_v59 = vld [vmem:[%s3837_s30 + $0xe0] sm:$0xff] }
  0x5c   : > { %v1691_v45 = vmul.f32 0.7978846, %v1435_v24  ;;  %v3137_v46 = vpop.eup %3136  ;;  %2707 = vst [vmem:[%s3960_s17 + $0x48] sm:$0xff] %v2451_v40  ;;  %v2452_v47 = vmul.f32 %v2196_v41, %v404_v16  ;;  %v1437_v50 = vadd.f32 %v1181_v2, %v3984_v14  ;;  %v408_v49 = vmul.f32 0.5, %v3920_v9 }
  0x5d   : > { %v1182_v51 = vmul.f32 0.044715, %v926_v43  ;;  %v2453_v42 = vmul.f32 %v2197_v44, %v405_v10  ;;  %v2198_v56 = vadd.f32 1.0, %v3137_v46  ;;  %v1692_v57 = vmul.f32 0.7978846, %v1436_v34  ;;  %v4043_v10 = vld [vmem:[%s3837_s30 + $0xc8] sm:$0xff] }
  0x5e   : > { %3146 = vtanh.f32 %v1691_v45  ;;  %v3139_v58 = vpop.eup %3138  ;;  %2708 = vst [vmem:[%s3960_s17 + $0x50] sm:$0xff] %v2452_v47  ;;  %v1693_v62 = vmul.f32 0.7978846, %v1437_v50  ;;  %v927_v0 = vmul.f32 %v671_v54, %v4012_v38  ;;  %v672_v60 = vmul.f32 %v4022_v55, %v4022_v55 }
  0x5f   : > { %v1438_v63 = vadd.f32 %v1182_v51, %v3995_v21  ;;  %v3141_v1 = vpop.eup %3140  ;;  %2709 = vst [vmem:[%s3960_s17 + $0x58] sm:$0xff] %v2453_v42  ;;  %v2454_v4 = vmul.f32 %v2198_v56, %v406_v23  ;;  %v2199_v8 = vadd.f32 1.0, %v3139_v58  ;;  %3148 = vtanh.f32 %v1692_v57  ;;  %v4084_v57 = vld [vmem:[%s3837_s30 + $0xe8] sm:$0xff] }
  0x60   : > { %v2200_v11 = vadd.f32 1.0, %v3141_v1  ;;  %3150 = vtanh.f32 %v1693_v62  ;;  %v1183_v12 = vmul.f32 0.044715, %v927_v0  ;;  %v409_v15 = vmul.f32 0.5, %v3936_v20 }
  0x61   : > { %v1694_v9 = vmul.f32 0.7978846, %v1438_v63  ;;  %2710 = vst [vmem:[%s3960_s17 + $0x60] sm:$0xff] %v2454_v4  ;;  %v2455_v6 = vmul.f32 %v2199_v8, %v407_v30  ;;  %v928_v16 = vmul.f32 %v672_v60, %v4022_v55  ;;  %v673_v18 = vmul.f32 %v4029_v53, %v4029_v53 }
  0x62   : > { %v2456_v37 = vmul.f32 %v2200_v11, %v408_v49  ;;  %v410_v19 = vmul.f32 0.5, %v3955_v36  ;;  %v1439_v7 = vadd.f32 %v1183_v12, %v4012_v38  ;;  %v3143_v17 = vpop.eup %3142  ;;  %v411_v20 = vmul.f32 0.5, %v3965_v61 }
  0x63   : > { %3152 = vtanh.f32 %v1694_v9  ;;  %2711 = vst [vmem:[%s3960_s17 + $0x68] sm:$0xff] %v2455_v6  ;;  %v1184_v23 = vmul.f32 0.044715, %v928_v16  ;;  %v929_v48 = vmul.f32 %v673_v18, %v4029_v53  ;;  %v674_v52 = vmul.f32 %v4035_v3, %v4035_v3  ;;  %v4091_v6 = vld [vmem:[%s3837_s30 + $0xf0] sm:$0xff] }
  0x64   : > { %2712 = vst [vmem:[%s3960_s17 + $0x70] sm:$0xff] %v2456_v37  ;;  %v2201_v13 = vadd.f32 1.0, %v3143_v17  ;;  %v412_v36 = vmul.f32 0.5, %v3975_v5  ;;  %v1695_v26 = vmul.f32 0.7978846, %v1439_v7  ;;  %v675_v27 = vmul.f32 %v4043_v10, %v4043_v10 }
  0x65   : > { %v1440_v28 = vadd.f32 %v1184_v23, %v4022_v55  ;;  %v1185_v29 = vmul.f32 0.044715, %v929_v48  ;;  %v930_v61 = vmul.f32 %v674_v52, %v4035_v3  ;;  %v676_v30 = vmul.f32 %v4048_v22, %v4048_v22  ;;  %v4102_v23 = vld [vmem:[%s3837_s30 + $0x100] sm:$0xff] }
  0x66   : > { %v2457_v31 = vmul.f32 %v2201_v13, %v409_v15  ;;  %v413_v5 = vmul.f32 0.5, %v3984_v14  ;;  %3154 = vtanh.f32 %v1695_v26  ;;  %v931_v32 = vmul.f32 %v675_v27, %v4043_v10 }
  0x67   : > { %v1696_v33 = vmul.f32 0.7978846, %v1440_v28  ;;  %v1441_v24 = vadd.f32 %v1185_v29, %v4029_v53  ;;  %v1186_v35 = vmul.f32 0.044715, %v930_v61  ;;  %v932_v39 = vmul.f32 %v676_v30, %v4048_v22 }
  0x68   : > { %v3145_v40 = vpop.eup %3144  ;;  %2713 = vst [vmem:[%s3960_s17 + $0x78] sm:$0xff] %v2457_v31  ;;  %v414_v41 = vmul.f32 0.5, %v3995_v21  ;;  %v1187_v2 = vmul.f32 0.044715, %v931_v32  ;;  %v677_v43 = vmul.f32 %v4064_v25, %v4064_v25  ;;  %v678_v14 = vmul.f32 %v4067_v59, %v4067_v59  ;;  %v4120_v31 = vld [vmem:[%s3837_s30 + $0x110] sm:$0xff] }
  0x69   : > { %v2202_v44 = vadd.f32 1.0, %v3145_v40  ;;  %3156 = vtanh.f32 %v1696_v33  ;;  %v1697_v45 = vmul.f32 0.7978846, %v1441_v24  ;;  %v1442_v34 = vadd.f32 %v1186_v35, %v4035_v3 }
  0x6a   : > { %v1443_v47 = vadd.f32 %v1187_v2, %v4043_v10  ;;  %v1188_v50 = vmul.f32 0.044715, %v932_v39  ;;  %v933_v21 = vmul.f32 %v677_v43, %v4064_v25  ;;  %v934_v51 = vmul.f32 %v678_v14, %v4067_v59 }
  0x6b   : > { %v3147_v46 = vpop.eup %3146  ;;  %v2458_v54 = vmul.f32 %v2202_v44, %v410_v19  ;;  %3158 = vtanh.f32 %v1697_v45  ;;  %v1698_v56 = vmul.f32 0.7978846, %v1442_v34  ;;  %v415_v60 = vmul.f32 0.5, %v4012_v38  ;;  %v4099_v19 = vld [vmem:[%s3837_s30 + $0xf8] sm:$0xff] }
  0x6c   : > { %v2203_v42 = vadd.f32 1.0, %v3147_v46  ;;  %v3149_v58 = vpop.eup %3148  ;;  %v1699_v49 = vmul.f32 0.7978846, %v1443_v47  ;;  %v1444_v62 = vadd.f32 %v1188_v50, %v4048_v22  ;;  %v1189_v63 = vmul.f32 0.044715, %v933_v21 }
  0x6d   : > { %v1190_v0 = vmul.f32 0.044715, %v934_v51  ;;  %v3151_v1 = vpop.eup %3150  ;;  %2714 = vst [vmem:[%s3960_s17 + $0x80] sm:$0xff] %v2458_v54  ;;  %v2204_v8 = vadd.f32 1.0, %v3149_v58  ;;  %3160 = vtanh.f32 %v1698_v56  ;;  %v416_v18 = vmul.f32 0.5, %v4022_v55  ;;  %v4139_v54 = vld [vmem:[%s3837_s30 + $0x118] sm:$0xff] }
  0x6e   : > { %v2459_v4 = vmul.f32 %v2203_v42, %v411_v20  ;;  %v2205_v11 = vadd.f32 1.0, %v3151_v1  ;;  %3162 = vtanh.f32 %v1699_v49  ;;  %v1700_v9 = vmul.f32 0.7978846, %v1444_v62 }
  0x6f   : > { %v1445_v12 = vadd.f32 %v1189_v63, %v4064_v25  ;;  %v2460_v16 = vmul.f32 %v2204_v8, %v412_v36  ;;  %v1446_v37 = vadd.f32 %v1190_v0, %v4067_v59  ;;  %v679_v38 = vmul.f32 %v4084_v57, %v4084_v57  ;;  %v4110_v36 = vld [vmem:[%s3837_s30 + $0x108] sm:$0xff] }
  0x70   : > { %v3153_v15 = vpop.eup %3152  ;;  %2715 = vst [vmem:[%s3960_s17 + $0x88] sm:$0xff] %v2459_v4  ;;  %v2461_v7 = vmul.f32 %v2205_v11, %v413_v5  ;;  %3164 = vtanh.f32 %v1700_v9  ;;  %v417_v48 = vmul.f32 0.5, %v4029_v53  ;;  %v680_v13 = vmul.f32 %v4091_v6, %v4091_v6  ;;  %v4147_v11 = vld [vmem:[%s3837_s30 + $0x120] sm:$0xff] }
  0x71   : > { %v2206_v17 = vadd.f32 1.0, %v3153_v15  ;;  %v1701_v20 = vmul.f32 0.7978846, %v1445_v12  ;;  %2716 = vst [vmem:[%s3960_s17 + $0x90] sm:$0xff] %v2460_v16  ;;  %v1702_v52 = vmul.f32 0.7978846, %v1446_v37  ;;  %v935_v55 = vmul.f32 %v679_v38, %v4084_v57 }
  0x72   : > { %2717 = vst [vmem:[%s3960_s17 + $0x98] sm:$0xff] %v2461_v7  ;;  %v418_v27 = vmul.f32 0.5, %v4035_v3  ;;  %v681_v28 = vmul.f32 %v4099_v19, %v4099_v19  ;;  %v936_v61 = vmul.f32 %v680_v13, %v4091_v6  ;;  %v682_v30 = vmul.f32 %v4102_v23, %v4102_v23 }
  0x73   : > { %v2462_v26 = vmul.f32 %v2206_v17, %v414_v41  ;;  %3166 = vtanh.f32 %v1701_v20  ;;  %v3155_v29 = vpop.eup %3154  ;;  %v1191_v53 = vmul.f32 0.044715, %v935_v55  ;;  %v419_v32 = vmul.f32 0.5, %v4043_v10  ;;  %v4154_v17 = vld [vmem:[%s3837_s30 + $0x128] sm:$0xff] }
  0x74   : > { %3168 = vtanh.f32 %v1702_v52  ;;  %v2207_v5 = vadd.f32 1.0, %v3155_v29  ;;  %v937_v3 = vmul.f32 %v681_v28, %v4099_v19  ;;  %v683_v33 = vmul.f32 %v4110_v36, %v4110_v36 }
  0x75   : > { %2718 = vst [vmem:[%s3960_s17 + $0xa0] sm:$0xff] %v2462_v26  ;;  %v420_v24 = vmul.f32 0.5, %v4048_v22  ;;  %v1447_v35 = vadd.f32 %v1191_v53, %v4084_v57  ;;  %v1192_v39 = vmul.f32 0.044715, %v936_v61  ;;  %v938_v40 = vmul.f32 %v682_v30, %v4102_v23 }
  0x76   : > { %v3157_v41 = vpop.eup %3156  ;;  %v2463_v2 = vmul.f32 %v2207_v5, %v415_v60  ;;  %v1193_v43 = vmul.f32 0.044715, %v937_v3  ;;  %v939_v14 = vmul.f32 %v683_v33, %v4110_v36  ;;  %v684_v10 = vmul.f32 %v4120_v31, %v4120_v31  ;;  %v4168_v5 = vld [vmem:[%s3837_s30 + $0x138] sm:$0xff] }
  0x77   : > { %v2208_v44 = vadd.f32 1.0, %v3157_v41  ;;  %v1703_v45 = vmul.f32 0.7978846, %v1447_v35  ;;  %v1448_v34 = vadd.f32 %v1192_v39, %v4091_v6  ;;  %v1194_v46 = vmul.f32 0.044715, %v938_v40  ;;  %v4177_v40 = vld [vmem:[%s3837_s30 + $0x140] sm:$0xff] }
  0x78   : > { %v3159_v22 = vpop.eup %3158  ;;  %2719 = vst [vmem:[%s3960_s17 + $0xa8] sm:$0xff] %v2463_v2  ;;  %v421_v47 = vmul.f32 0.5, %v4064_v25  ;;  %v1449_v50 = vadd.f32 %v1193_v43, %v4099_v19  ;;  %v1195_v21 = vmul.f32 0.044715, %v939_v14  ;;  %v940_v51 = vmul.f32 %v684_v10, %v4120_v31  ;;  %v4183_v14 = vld [vmem:[%s3837_s30 + $0x148] sm:$0xff] }
  0x79   : > { %v2464_v42 = vmul.f32 %v2208_v44, %v416_v18  ;;  %v2209_v56 = vadd.f32 1.0, %v3159_v22  ;;  %3170 = vtanh.f32 %v1703_v45  ;;  %v1704_v58 = vmul.f32 0.7978846, %v1448_v34 }
  0x7a   : > { %v3161_v49 = vpop.eup %3160  ;;  %v1705_v62 = vmul.f32 0.7978846, %v1449_v50  ;;  %v1450_v63 = vadd.f32 %v1194_v46, %v4102_v23  ;;  %v1451_v0 = vadd.f32 %v1195_v21, %v4110_v36  ;;  %v1196_v25 = vmul.f32 0.044715, %v940_v51 }
  0x7b   : > { %v3163_v1 = vpop.eup %3162  ;;  %2720 = vst [vmem:[%s3960_s17 + $0xb0] sm:$0xff] %v2464_v42  ;;  %v2465_v4 = vmul.f32 %v2209_v56, %v417_v48  ;;  %v2210_v8 = vadd.f32 1.0, %v3161_v49  ;;  %3172 = vtanh.f32 %v1704_v58  ;;  %v685_v60 = vmul.f32 %v4139_v54, %v4139_v54 }
  0x7c   : > { %v2211_v9 = vadd.f32 1.0, %v3163_v1  ;;  %3174 = vtanh.f32 %v1705_v62  ;;  %v1706_v12 = vmul.f32 0.7978846, %v1450_v63  ;;  %v1707_v15 = vmul.f32 0.7978846, %v1451_v0 }
  0x7d   : > { %v3165_v16 = vpop.eup %3164  ;;  %2721 = vst [vmem:[%s3960_s17 + $0xb8] sm:$0xff] %v2465_v4  ;;  %v2466_v18 = vmul.f32 %v2210_v8, %v418_v27  ;;  %v422_v37 = vmul.f32 0.5, %v4067_v59  ;;  %v1452_v38 = vadd.f32 %v1196_v25, %v4120_v31  ;;  %v941_v7 = vmul.f32 %v685_v60, %v4139_v54  ;;  %v4161_v27 = vld [vmem:[%s3837_s30 + $0x130] sm:$0xff] }
  0x7e   : > { %v2467_v20 = vmul.f32 %v2211_v9, %v419_v32  ;;  %v2212_v48 = vadd.f32 1.0, %v3165_v16  ;;  %3176 = vtanh.f32 %v1706_v12  ;;  %v686_v52 = vmul.f32 %v4147_v11, %v4147_v11  ;;  %v4202_v25 = vld [vmem:[%s3837_s30 + $0x150] sm:$0xff] }
  0x7f   : > { %2722 = vst [vmem:[%s3960_s17 + $0xc0] sm:$0xff] %v2466_v18  ;;  %v423_v13 = vmul.f32 0.5, %v4084_v57  ;;  %3178 = vtanh.f32 %v1707_v15  ;;  %v1708_v59 = vmul.f32 0.7978846, %v1452_v38  ;;  %v1197_v26 = vmul.f32 0.044715, %v941_v7 }
  0x80   : > { %v3167_v55 = vpop.eup %3166  ;;  %2723 = vst [vmem:[%s3960_s17 + $0xc8] sm:$0xff] %v2467_v20  ;;  %v2468_v29 = vmul.f32 %v2212_v48, %v420_v24  ;;  %v942_v61 = vmul.f32 %v686_v52, %v4147_v11  ;;  %v687_v30 = vmul.f32 %v4154_v17, %v4154_v17  ;;  %v424_v32 = vmul.f32 0.5, %v4091_v6  ;;  %v4210_v20 = vld [vmem:[%s3837_s30 + $0x158] sm:$0xff] }
  0x81   : > { %v3169_v28 = vpop.eup %3168  ;;  %v2213_v53 = vadd.f32 1.0, %v3167_v55  ;;  %3180 = vtanh.f32 %v1708_v59  ;;  %v1453_v3 = vadd.f32 %v1197_v26, %v4139_v54  ;;  %v688_v39 = vmul.f32 %v4161_v27, %v4161_v27 }
  0x82   : > { %v2214_v57 = vadd.f32 1.0, %v3169_v28  ;;  %2724 = vst [vmem:[%s3960_s17 + $0xd0] sm:$0xff] %v2468_v29  ;;  %v1198_v24 = vmul.f32 0.044715, %v942_v61  ;;  %v943_v35 = vmul.f32 %v687_v30, %v4154_v17  ;;  %v425_v2 = vmul.f32 0.5, %v4099_v19  ;;  %v4216_v29 = vld [vmem:[%s3837_s30 + $0x160] sm:$0xff] }
  0x83   : > { %v2469_v33 = vmul.f32 %v2213_v53, %v421_v47  ;;  %v1709_v43 = vmul.f32 0.7978846, %v1453_v3  ;;  %v689_v6 = vmul.f32 %v4168_v5, %v4168_v5  ;;  %v426_v10 = vmul.f32 0.5, %v4102_v23  ;;  %v4223_v3 = vld [vmem:[%s3837_s30 + $0x168] sm:$0xff] }
  0x84   : > { %v2470_v41 = vmul.f32 %v2214_v57, %v422_v37  ;;  %v1454_v44 = vadd.f32 %v1198_v24, %v4147_v11  ;;  %v1199_v45 = vmul.f32 0.044715, %v943_v35  ;;  %v944_v34 = vmul.f32 %v688_v39, %v4161_v27  ;;  %v4226_v39 = vld [vmem:[%s3837_s30 + $0x170] sm:$0xff] }
  0x85   : > { %2725 = vst [vmem:[%s3960_s17 + $0xd8] sm:$0xff] %v2469_v33  ;;  %v427_v46 = vmul.f32 0.5, %v4110_v36  ;;  %3182 = vtanh.f32 %v1709_v43  ;;  %v945_v19 = vmul.f32 %v689_v6, %v4168_v5  ;;  %v690_v22 = vmul.f32 %v4177_v40, %v4177_v40 }
  0x86   : > { %2726 = vst [vmem:[%s3960_s17 + $0xe0] sm:$0xff] %v2470_v41  ;;  %v3171_v47 = vpop.eup %3170  ;;  %v1710_v50 = vmul.f32 0.7978846, %v1454_v44  ;;  %v1455_v21 = vadd.f32 %v1199_v45, %v4154_v17  ;;  %v1200_v23 = vmul.f32 0.044715, %v944_v34  ;;  %v691_v51 = vmul.f32 %v4183_v14, %v4183_v14  ;;  %v4239_v45 = vld [vmem:[%s3837_s30 + $0x178] sm:$0xff] }
  0x87   : > { %v2215_v42 = vadd.f32 1.0, %v3171_v47  ;;  %v428_v56 = vmul.f32 0.5, %v4120_v31  ;;  %v1201_v58 = vmul.f32 0.044715, %v945_v19  ;;  %v946_v36 = vmul.f32 %v690_v22, %v4177_v40 }
  0x88   : > { %v3173_v49 = vpop.eup %3172  ;;  %3184 = vtanh.f32 %v1710_v50  ;;  %v1711_v62 = vmul.f32 0.7978846, %v1455_v21  ;;  %v1456_v63 = vadd.f32 %v1200_v23, %v4161_v27  ;;  %v947_v0 = vmul.f32 %v691_v51, %v4183_v14 }
  0x89   : > { %v3175_v1 = vpop.eup %3174  ;;  %v2471_v4 = vmul.f32 %v2215_v42, %v423_v13  ;;  %v2216_v8 = vadd.f32 1.0, %v3173_v49  ;;  %v1457_v60 = vadd.f32 %v1201_v58, %v4168_v5  ;;  %v1202_v31 = vmul.f32 0.044715, %v946_v36 }
  0x8a   : > { %v2217_v9 = vadd.f32 1.0, %v3175_v1  ;;  %3186 = vtanh.f32 %v1711_v62  ;;  %v1712_v12 = vmul.f32 0.7978846, %v1456_v63  ;;  %v1203_v15 = vmul.f32 0.044715, %v947_v0 }
  0x8b   : > { %v3177_v16 = vpop.eup %3176  ;;  %2727 = vst [vmem:[%s3960_s17 + $0xe8] sm:$0xff] %v2471_v4  ;;  %v2472_v18 = vmul.f32 %v2216_v8, %v424_v32  ;;  %v1713_v37 = vmul.f32 0.7978846, %v1457_v60  ;;  %v1458_v38 = vadd.f32 %v1202_v31, %v4177_v40  ;;  %v692_v7 = vmul.f32 %v4202_v25, %v4202_v25 }
  0x8c   : > { %v3179_v48 = vpop.eup %3178  ;;  %v2473_v52 = vmul.f32 %v2217_v9, %v425_v2  ;;  %v2218_v55 = vadd.f32 1.0, %v3177_v16  ;;  %3188 = vtanh.f32 %v1712_v12  ;;  %v1459_v13 = vadd.f32 %v1203_v15, %v4183_v14 }
  0x8d   : > { %2728 = vst [vmem:[%s3960_s17 + $0xf0] sm:$0xff] %v2472_v18  ;;  %v2219_v59 = vadd.f32 1.0, %v3179_v48  ;;  %3190 = vtanh.f32 %v1713_v37  ;;  %v1714_v26 = vmul.f32 0.7978846, %v1458_v38  ;;  %v948_v28 = vmul.f32 %v692_v7, %v4202_v25 }
  0x8e   : > { %v3181_v53 = vpop.eup %3180  ;;  %2729 = vst [vmem:[%s3960_s17 + $0xf8] sm:$0xff] %v2473_v52  ;;  %v2474_v61 = vmul.f32 %v2218_v55, %v426_v10  ;;  %v429_v30 = vmul.f32 0.5, %v4139_v54  ;;  %v1715_v57 = vmul.f32 0.7978846, %v1459_v13  ;;  %v693_v32 = vmul.f32 %v4210_v20, %v4210_v20 }
  0x8f   : > { %v2475_v33 = vmul.f32 %v2219_v59, %v427_v46  ;;  %v2220_v24 = vadd.f32 1.0, %v3181_v53  ;;  %3192 = vtanh.f32 %v1714_v26  ;;  %v1204_v35 = vmul.f32 0.044715, %v948_v28  ;;  %v4273_v53 = vld [vmem:[%s3837_s30 + $0x190] sm:$0xff] }
  0x90   : > { %2730 = vst [vmem:[%s3960_s17 + $0x100] sm:$0xff] %v2474_v61  ;;  %v430_v41 = vmul.f32 0.5, %v4147_v11  ;;  %3194 = vtanh.f32 %v1715_v57  ;;  %v949_v54 = vmul.f32 %v693_v32, %v4210_v20  ;;  %v694_v2 = vmul.f32 %v4216_v29, %v4216_v29 }
  0x91   : > { %2731 = vst [vmem:[%s3960_s17 + $0x108] sm:$0xff] %v2475_v33  ;;  %v2476_v43 = vmul.f32 %v2220_v24, %v428_v56  ;;  %v431_v6 = vmul.f32 0.5, %v4154_v17  ;;  %v1460_v10 = vadd.f32 %v1204_v35, %v4202_v25  ;;  %v695_v44 = vmul.f32 %v4223_v3, %v4223_v3  ;;  %v4253_v56 = vld [vmem:[%s3837_s30 + $0x180] sm:$0xff]  ;;  %v4279_v24 = vld [vmem:[%s3837_s30 + $0x198] sm:$0xff] }
  0x92   : > { %v3183_v34 = vpop.eup %3182  ;;  %v432_v11 = vmul.f32 0.5, %v4161_v27  ;;  %v1205_v46 = vmul.f32 0.044715, %v949_v54  ;;  %v950_v19 = vmul.f32 %v694_v2, %v4216_v29  ;;  %v696_v22 = vmul.f32 %v4226_v39, %v4226_v39 }
  0x93   : > { %2732 = vst [vmem:[%s3960_s17 + $0x110] sm:$0xff] %v2476_v43  ;;  %v2221_v47 = vadd.f32 1.0, %v3183_v34  ;;  %v433_v17 = vmul.f32 0.5, %v4168_v5  ;;  %v1716_v50 = vmul.f32 0.7978846, %v1460_v10  ;;  %v951_v21 = vmul.f32 %v695_v44, %v4223_v3  ;;  %v4286_v44 = vld [vmem:[%s3837_s30 + $0x1a0] sm:$0xff] }
  0x94   : > { %v1461_v23 = vadd.f32 %v1205_v46, %v4210_v20  ;;  %v1206_v51 = vmul.f32 0.044715, %v950_v19  ;;  %v952_v42 = vmul.f32 %v696_v22, %v4226_v39  ;;  %v697_v27 = vmul.f32 %v4239_v45, %v4239_v45  ;;  %v4293_v19 = vld [vmem:[%s3837_s30 + $0x1a8] sm:$0xff] }
  0x95   : > { %v3185_v58 = vpop.eup %3184  ;;  %v2477_v36 = vmul.f32 %v2221_v47, %v429_v30  ;;  %v434_v49 = vmul.f32 0.5, %v4177_v40  ;;  %3196 = vtanh.f32 %v1716_v50  ;;  %v1207_v5 = vmul.f32 0.044715, %v951_v21  ;;  %v4264_v40 = vld [vmem:[%s3837_s30 + $0x188] sm:$0xff] }
  0x96   : > { %v2222_v62 = vadd.f32 1.0, %v3185_v58  ;;  %v1717_v63 = vmul.f32 0.7978846, %v1461_v23  ;;  %v1462_v0 = vadd.f32 %v1206_v51, %v4216_v29  ;;  %v1208_v1 = vmul.f32 0.044715, %v952_v42  ;;  %v4304_v42 = vld [vmem:[%s3837_s30 + $0x1b0] sm:$0xff] }
  0x97   : > { %v3187_v4 = vpop.eup %3186  ;;  %2733 = vst [vmem:[%s3960_s17 + $0x118] sm:$0xff] %v2477_v36  ;;  %v435_v8 = vmul.f32 0.5, %v4183_v14  ;;  %v1463_v60 = vadd.f32 %v1207_v5, %v4223_v3  ;;  %v953_v31 = vmul.f32 %v697_v27, %v4239_v45  ;;  %v698_v9 = vmul.f32 %v4253_v56, %v4253_v56 }
  0x98   : > { %v2478_v12 = vmul.f32 %v2222_v62, %v430_v41  ;;  %v2223_v15 = vadd.f32 1.0, %v3187_v4  ;;  %3198 = vtanh.f32 %v1717_v63  ;;  %v1718_v16 = vmul.f32 0.7978846, %v1462_v0  ;;  %v4316_v4 = vld [vmem:[%s3837_s30 + $0x1b8] sm:$0xff] }
  0x99   : > { %v3189_v18 = vpop.eup %3188  ;;  %v1719_v37 = vmul.f32 0.7978846, %v1463_v60  ;;  %v1464_v38 = vadd.f32 %v1208_v1, %v4226_v39  ;;  %v1209_v14 = vmul.f32 0.044715, %v953_v31  ;;  %v954_v7 = vmul.f32 %v698_v9, %v4253_v56 }
  0x9a   : > { %v3191_v48 = vpop.eup %3190  ;;  %2734 = vst [vmem:[%s3960_s17 + $0x120] sm:$0xff] %v2478_v12  ;;  %v2479_v52 = vmul.f32 %v2223_v15, %v431_v6  ;;  %v2224_v55 = vadd.f32 1.0, %v3189_v18  ;;  %3200 = vtanh.f32 %v1718_v16  ;;  %v699_v13 = vmul.f32 %v4264_v40, %v4264_v40 }
  0x9b   : > { %v2225_v59 = vadd.f32 1.0, %v3191_v48  ;;  %3202 = vtanh.f32 %v1719_v37  ;;  %v1720_v26 = vmul.f32 0.7978846, %v1464_v38  ;;  %v1465_v28 = vadd.f32 %v1209_v14, %v4239_v45 }
  0x9c   : > { %v3193_v61 = vpop.eup %3192  ;;  %2735 = vst [vmem:[%s3960_s17 + $0x128] sm:$0xff] %v2479_v52  ;;  %v2480_v30 = vmul.f32 %v2224_v55, %v432_v11  ;;  %v436_v57 = vmul.f32 0.5, %v4202_v25  ;;  %v1210_v32 = vmul.f32 0.044715, %v954_v7  ;;  %v955_v33 = vmul.f32 %v699_v13, %v4264_v40 }
  0x9d   : > { %v3195_v35 = vpop.eup %3194  ;;  %v2481_v41 = vmul.f32 %v2225_v59, %v433_v17  ;;  %v2226_v54 = vadd.f32 1.0, %v3193_v61  ;;  %3204 = vtanh.f32 %v1720_v26  ;;  %v1721_v2 = vmul.f32 0.7978846, %v1465_v28 }
  0x9e   : > { %2736 = vst [vmem:[%s3960_s17 + $0x130] sm:$0xff] %v2480_v30  ;;  %v2227_v43 = vadd.f32 1.0, %v3195_v35  ;;  %v1466_v6 = vadd.f32 %v1210_v32, %v4253_v56  ;;  %v1211_v10 = vmul.f32 0.044715, %v955_v33  ;;  %v700_v25 = vmul.f32 %v4273_v53, %v4273_v53  ;;  %v4335_v35 = vld [vmem:[%s3837_s30 + $0x1c8] sm:$0xff] }
  0x9f   : > { %2737 = vst [vmem:[%s3960_s17 + $0x138] sm:$0xff] %v2481_v41  ;;  %v2482_v34 = vmul.f32 %v2226_v54, %v434_v49  ;;  %v437_v11 = vmul.f32 0.5, %v4210_v20  ;;  %3206 = vtanh.f32 %v1721_v2  ;;  %v701_v46 = vmul.f32 %v4279_v24, %v4279_v24 }
  0xa0   : > { %v2483_v22 = vmul.f32 %v2227_v43, %v435_v8  ;;  %v1722_v47 = vmul.f32 0.7978846, %v1466_v6  ;;  %v1467_v17 = vadd.f32 %v1211_v10, %v4264_v40  ;;  %v956_v50 = vmul.f32 %v700_v25, %v4273_v53  ;;  %v4339_v43 = vld [vmem:[%s3837_s30 + $0x1d0] sm:$0xff] }
  0xa1   : > { %2738 = vst [vmem:[%s3960_s17 + $0x140] sm:$0xff] %v2482_v34  ;;  %v438_v21 = vmul.f32 0.5, %v4216_v29  ;;  %v439_v23 = vmul.f32 0.5, %v4223_v3  ;;  %v957_v51 = vmul.f32 %v701_v46, %v4279_v24  ;;  %v702_v20 = vmul.f32 %v4286_v44, %v4286_v44 }
  0xa2   : > { %v3197_v27 = vpop.eup %3196  ;;  %2739 = vst [vmem:[%s3960_s17 + $0x148] sm:$0xff] %v2483_v22  ;;  %3208 = vtanh.f32 %v1722_v47  ;;  %v1723_v58 = vmul.f32 0.7978846, %v1467_v17  ;;  %v1212_v36 = vmul.f32 0.044715, %v956_v50  ;;  %v703_v49 = vmul.f32 %v4293_v19, %v4293_v19 }
  0xa3   : > { %v2228_v5 = vadd.f32 1.0, %v3197_v27  ;;  %v440_v29 = vmul.f32 0.5, %v4226_v39  ;;  %v1213_v3 = vmul.f32 0.044715, %v957_v51  ;;  %v958_v62 = vmul.f32 %v702_v20, %v4286_v44  ;;  %v4355_v51 = vld [vmem:[%s3837_s30 + $0x1e0] sm:$0xff] }
  0xa4   : > { %3210 = vtanh.f32 %v1723_v58  ;;  %v1468_v63 = vadd.f32 %v1212_v36, %v4273_v53  ;;  %v959_v0 = vmul.f32 %v703_v49, %v4293_v19  ;;  %v704_v1 = vmul.f32 %v4304_v42, %v4304_v42 }
  0xa5   : > { %v3199_v8 = vpop.eup %3198  ;;  %v2484_v60 = vmul.f32 %v2228_v5, %v436_v57  ;;  %v441_v31 = vmul.f32 0.5, %v4239_v45  ;;  %v1469_v39 = vadd.f32 %v1213_v3, %v4279_v24  ;;  %v1214_v9 = vmul.f32 0.044715, %v958_v62  ;;  %v4327_v45 = vld [vmem:[%s3837_s30 + $0x1c0] sm:$0xff] }
  0xa6   : > { %v2229_v12 = vadd.f32 1.0, %v3199_v8  ;;  %v1724_v15 = vmul.f32 0.7978846, %v1468_v63  ;;  %v1215_v16 = vmul.f32 0.044715, %v959_v0  ;;  %v960_v18 = vmul.f32 %v704_v1, %v4304_v42  ;;  %v4369_v1 = vld [vmem:[%s3837_s30 + $0x1e8] sm:$0xff] }
  0xa7   : > { %v3201_v37 = vpop.eup %3200  ;;  %2740 = vst [vmem:[%s3960_s17 + $0x150] sm:$0xff] %v2484_v60  ;;  %v442_v38 = vmul.f32 0.5, %v4253_v56  ;;  %v1725_v14 = vmul.f32 0.7978846, %v1469_v39  ;;  %v1470_v7 = vadd.f32 %v1214_v9, %v4286_v44  ;;  %v705_v48 = vmul.f32 %v4316_v4, %v4316_v4 }
  0xa8   : > { %v3203_v52 = vpop.eup %3202  ;;  %v2485_v55 = vmul.f32 %v2229_v12, %v437_v11  ;;  %v2230_v13 = vadd.f32 1.0, %v3201_v37  ;;  %3212 = vtanh.f32 %v1724_v15  ;;  %v1471_v59 = vadd.f32 %v1215_v16, %v4293_v19  ;;  %v4375_v15 = vld [vmem:[%s3837_s30 + $0x1f0] sm:$0xff] }
  0xa9   : > { %v2231_v26 = vadd.f32 1.0, %v3203_v52  ;;  %3214 = vtanh.f32 %v1725_v14  ;;  %v1726_v56 = vmul.f32 0.7978846, %v1470_v7  ;;  %v1216_v28 = vmul.f32 0.044715, %v960_v18 }
  0xaa   : > { %v3205_v61 = vpop.eup %3204  ;;  %2741 = vst [vmem:[%s3960_s17 + $0x158] sm:$0xff] %v2485_v55  ;;  %v2486_v30 = vmul.f32 %v2230_v13, %v438_v21  ;;  %v1727_v57 = vmul.f32 0.7978846, %v1471_v59  ;;  %v961_v32 = vmul.f32 %v705_v48, %v4316_v4  ;;  %v706_v33 = vmul.f32 %v4327_v45, %v4327_v45 }
  0xab   : > { %v2487_v41 = vmul.f32 %v2231_v26, %v439_v23  ;;  %v2232_v54 = vadd.f32 1.0, %v3205_v61  ;;  %3216 = vtanh.f32 %v1726_v56  ;;  %v1472_v2 = vadd.f32 %v1216_v28, %v4304_v42  ;;  %v4352_v23 = vld [vmem:[%s3837_s30 + $0x1d8] sm:$0xff] }
  0xac   : > { %v3207_v6 = vpop.eup %3206  ;;  %2742 = vst [vmem:[%s3960_s17 + $0x160] sm:$0xff] %v2486_v30  ;;  %v443_v10 = vmul.f32 0.5, %v4264_v40  ;;  %3218 = vtanh.f32 %v1727_v57  ;;  %v1217_v25 = vmul.f32 0.044715, %v961_v32  ;;  %v962_v34 = vmul.f32 %v706_v33, %v4327_v45 }
  0xad   : > { %2743 = vst [vmem:[%s3960_s17 + $0x168] sm:$0xff] %v2487_v41  ;;  %v2488_v11 = vmul.f32 %v2232_v54, %v440_v29  ;;  %v2233_v46 = vadd.f32 1.0, %v3207_v6  ;;  %v1728_v22 = vmul.f32 0.7978846, %v1472_v2  ;;  %v707_v47 = vmul.f32 %v4335_v35, %v4335_v35  ;;  %v4391_v41 = vld [vmem:[%s3837_s30 + $0x1f8] sm:$0xff] }
  0xae   : > { %v444_v17 = vmul.f32 0.5, %v4273_v53  ;;  %v1473_v50 = vadd.f32 %v1217_v25, %v4316_v4  ;;  %v1218_v21 = vmul.f32 0.044715, %v962_v34  ;;  %v708_v40 = vmul.f32 %v4339_v43, %v4339_v43 }
  0xaf   : > { %v3209_v20 = vpop.eup %3208  ;;  %2744 = vst [vmem:[%s3960_s17 + $0x170] sm:$0xff] %v2488_v11  ;;  %v2489_v27 = vmul.f32 %v2233_v46, %v441_v31  ;;  %v445_v58 = vmul.f32 0.5, %v4279_v24  ;;  %3220 = vtanh.f32 %v1728_v22  ;;  %v963_v53 = vmul.f32 %v707_v47, %v4335_v35  ;;  %v4396_v22 = vld [vmem:[%s3837_s30 + $0x200] sm:$0xff] }
  0xb0   : > { %v2234_v36 = vadd.f32 1.0, %v3209_v20  ;;  %v1729_v49 = vmul.f32 0.7978846, %v1473_v50  ;;  %v1474_v5 = vadd.f32 %v1218_v21, %v4327_v45  ;;  %v964_v29 = vmul.f32 %v708_v40, %v4339_v43  ;;  %v4403_v21 = vld [vmem:[%s3837_s30 + $0x208] sm:$0xff] }
  0xb1   : > { %v3211_v3 = vpop.eup %3210  ;;  %2745 = vst [vmem:[%s3960_s17 + $0x178] sm:$0xff] %v2489_v27  ;;  %v446_v62 = vmul.f32 0.5, %v4286_v44  ;;  %v1219_v63 = vmul.f32 0.044715, %v963_v53  ;;  %v709_v0 = vmul.f32 %v4352_v23, %v4352_v23  ;;  %v710_v24 = vmul.f32 %v4355_v51, %v4355_v51 }
  0xb2   : > { %v2490_v8 = vmul.f32 %v2234_v36, %v442_v38  ;;  %v2235_v60 = vadd.f32 1.0, %v3211_v3  ;;  %3222 = vtanh.f32 %v1729_v49  ;;  %v1730_v31 = vmul.f32 0.7978846, %v1474_v5  ;;  %v4412_v5 = vld [vmem:[%s3837_s30 + $0x210] sm:$0xff] }
  0xb3   : > { %v1475_v39 = vadd.f32 %v1219_v63, %v4335_v35  ;;  %v1220_v9 = vmul.f32 0.044715, %v964_v29  ;;  %v965_v12 = vmul.f32 %v709_v0, %v4352_v23  ;;  %v966_v44 = vmul.f32 %v710_v24, %v4355_v51  ;;  %v4419_v63 = vld [vmem:[%s3837_s30 + $0x218] sm:$0xff] }
  0xb4   : > { %2746 = vst [vmem:[%s3960_s17 + $0x180] sm:$0xff] %v2490_v8  ;;  %v2491_v16 = vmul.f32 %v2235_v60, %v443_v10  ;;  %v447_v18 = vmul.f32 0.5, %v4293_v19  ;;  %3224 = vtanh.f32 %v1730_v31  ;;  %v711_v37 = vmul.f32 %v4369_v1, %v4369_v1 }
  0xb5   : > { %v3213_v38 = vpop.eup %3212  ;;  %v1731_v14 = vmul.f32 0.7978846, %v1475_v39  ;;  %v1476_v7 = vadd.f32 %v1220_v9, %v4339_v43  ;;  %v1221_v48 = vmul.f32 0.044715, %v965_v12  ;;  %v1222_v52 = vmul.f32 0.044715, %v966_v44 }
  0xb6   : > { %v3215_v55 = vpop.eup %3214  ;;  %2747 = vst [vmem:[%s3960_s17 + $0x188] sm:$0xff] %v2491_v16  ;;  %v2236_v13 = vadd.f32 1.0, %v3213_v38  ;;  %v448_v59 = vmul.f32 0.5, %v4304_v42  ;;  %v967_v26 = vmul.f32 %v711_v37, %v4369_v1  ;;  %v712_v19 = vmul.f32 %v4375_v15, %v4375_v15 }
  0xb7   : > { %v2237_v56 = vadd.f32 1.0, %v3215_v55  ;;  %3226 = vtanh.f32 %v1731_v14  ;;  %v1732_v28 = vmul.f32 0.7978846, %v1476_v7  ;;  %v1477_v61 = vadd.f32 %v1221_v48, %v4352_v23 }
  0xb8   : > { %v3217_v30 = vpop.eup %3216  ;;  %v2492_v57 = vmul.f32 %v2236_v13, %v444_v17  ;;  %v1478_v32 = vadd.f32 %v1222_v52, %v4355_v51  ;;  %v1223_v33 = vmul.f32 0.044715, %v967_v26  ;;  %v968_v42 = vmul.f32 %v712_v19, %v4375_v15 }
  0xb9   : > { %v3219_v54 = vpop.eup %3218  ;;  %v2493_v2 = vmul.f32 %v2237_v56, %v445_v58  ;;  %v2238_v6 = vadd.f32 1.0, %v3217_v30  ;;  %3228 = vtanh.f32 %v1732_v28  ;;  %v1733_v10 = vmul.f32 0.7978846, %v1477_v61 }
  0xba   : > { %2748 = vst [vmem:[%s3960_s17 + $0x190] sm:$0xff] %v2492_v57  ;;  %v2239_v25 = vadd.f32 1.0, %v3219_v54  ;;  %v1734_v34 = vmul.f32 0.7978846, %v1478_v32  ;;  %v1479_v11 = vadd.f32 %v1223_v33, %v4369_v1  ;;  %v1224_v46 = vmul.f32 0.044715, %v968_v42 }
  0xbb   : > { %2749 = vst [vmem:[%s3960_s17 + $0x198] sm:$0xff] %v2493_v2  ;;  %v2494_v47 = vmul.f32 %v2238_v6, %v446_v62  ;;  %v449_v17 = vmul.f32 0.5, %v4316_v4  ;;  %3230 = vtanh.f32 %v1733_v10  ;;  %v713_v50 = vmul.f32 %v4391_v41, %v4391_v41 }
  0xbc   : > { %v3221_v40 = vpop.eup %3220  ;;  %v2495_v20 = vmul.f32 %v2239_v25, %v447_v18  ;;  %3232 = vtanh.f32 %v1734_v34  ;;  %v1735_v27 = vmul.f32 0.7978846, %v1479_v11  ;;  %v1480_v58 = vadd.f32 %v1224_v46, %v4375_v15  ;;  %v4432_v18 = vld [vmem:[%s3837_s30 + $0x220] sm:$0xff]  ;;  %v4453_v46 = vld [vmem:[%s3837_s30 + $0x230] sm:$0xff] }
  0xbd   : > { %2750 = vst [vmem:[%s3960_s17 + $0x1a0] sm:$0xff] %v2494_v47  ;;  %v2240_v53 = vadd.f32 1.0, %v3221_v40  ;;  %v450_v36 = vmul.f32 0.5, %v4327_v45  ;;  %v969_v49 = vmul.f32 %v713_v50, %v4391_v41  ;;  %v714_v4 = vmul.f32 %v4396_v22, %v4396_v22 }
  0xbe   : > { %2751 = vst [vmem:[%s3960_s17 + $0x1a8] sm:$0xff] %v2495_v20  ;;  %v451_v29 = vmul.f32 0.5, %v4335_v35  ;;  %3234 = vtanh.f32 %v1735_v27  ;;  %v1736_v3 = vmul.f32 0.7978846, %v1480_v58  ;;  %v715_v62 = vmul.f32 %v4403_v21, %v4403_v21 }
  0xbf   : > { %v3223_v45 = vpop.eup %3222  ;;  %v2496_v0 = vmul.f32 %v2240_v53, %v448_v59  ;;  %v452_v24 = vmul.f32 0.5, %v4339_v43  ;;  %v1225_v8 = vmul.f32 0.044715, %v969_v49  ;;  %v970_v60 = vmul.f32 %v714_v4, %v4396_v22  ;;  %v4463_v49 = vld [vmem:[%s3837_s30 + $0x240] sm:$0xff] }
  0xc0   : > { %v2241_v31 = vadd.f32 1.0, %v3223_v45  ;;  %3236 = vtanh.f32 %v1736_v3  ;;  %v971_v39 = vmul.f32 %v715_v62, %v4403_v21  ;;  %v716_v35 = vmul.f32 %v4412_v5, %v4412_v5 }
  0xc1   : > { %v3225_v9 = vpop.eup %3224  ;;  %2752 = vst [vmem:[%s3960_s17 + $0x1b0] sm:$0xff] %v2496_v0  ;;  %v453_v12 = vmul.f32 0.5, %v4352_v23  ;;  %v1481_v44 = vadd.f32 %v1225_v8, %v4391_v41  ;;  %v1226_v16 = vmul.f32 0.044715, %v970_v60  ;;  %v717_v43 = vmul.f32 %v4419_v63, %v4419_v63 }
  0xc2   : > { %v2497_v37 = vmul.f32 %v2241_v31, %v449_v17  ;;  %v2242_v38 = vadd.f32 1.0, %v3225_v9  ;;  %v1227_v14 = vmul.f32 0.044715, %v971_v39  ;;  %v972_v7 = vmul.f32 %v716_v35, %v4412_v5  ;;  %v4477_v35 = vld [vmem:[%s3837_s30 + $0x248] sm:$0xff] }
  0xc3   : > { %v454_v48 = vmul.f32 0.5, %v4355_v51  ;;  %v1737_v52 = vmul.f32 0.7978846, %v1481_v44  ;;  %v1482_v23 = vadd.f32 %v1226_v16, %v4396_v22  ;;  %v973_v55 = vmul.f32 %v717_v43, %v4419_v63  ;;  %v4443_v51 = vld [vmem:[%s3837_s30 + $0x228] sm:$0xff]  ;;  %v4482_v16 = vld [vmem:[%s3837_s30 + $0x250] sm:$0xff] }
  0xc4   : > { %v3227_v13 = vpop.eup %3226  ;;  %2753 = vst [vmem:[%s3960_s17 + $0x1b8] sm:$0xff] %v2497_v37  ;;  %v2498_v59 = vmul.f32 %v2242_v38, %v450_v36  ;;  %v1483_v26 = vadd.f32 %v1227_v14, %v4403_v21  ;;  %v1228_v19 = vmul.f32 0.044715, %v972_v7  ;;  %v718_v56 = vmul.f32 %v4432_v18, %v4432_v18  ;;  %v4460_v36 = vld [vmem:[%s3837_s30 + $0x238] sm:$0xff] }
  0xc5   : > { %v2243_v28 = vadd.f32 1.0, %v3227_v13  ;;  %3238 = vtanh.f32 %v1737_v52  ;;  %v1738_v61 = vmul.f32 0.7978846, %v1482_v23  ;;  %v1229_v30 = vmul.f32 0.044715, %v973_v55  ;;  %v4488_v14 = vld [vmem:[%s3837_s30 + $0x258] sm:$0xff] }
  0xc6   : > { %v3229_v57 = vpop.eup %3228  ;;  %2754 = vst [vmem:[%s3960_s17 + $0x1c0] sm:$0xff] %v2498_v59  ;;  %v455_v32 = vmul.f32 0.5, %v4369_v1  ;;  %v1739_v33 = vmul.f32 0.7978846, %v1483_v26  ;;  %v1484_v42 = vadd.f32 %v1228_v19, %v4412_v5  ;;  %v974_v54 = vmul.f32 %v718_v56, %v4432_v18 }
  0xc7   : > { %v2499_v2 = vmul.f32 %v2243_v28, %v451_v29  ;;  %v2244_v6 = vadd.f32 1.0, %v3229_v57  ;;  %3240 = vtanh.f32 %v1738_v61  ;;  %v1485_v10 = vadd.f32 %v1229_v30, %v4419_v63 }
  0xc8   : > { %v3231_v25 = vpop.eup %3230  ;;  %3242 = vtanh.f32 %v1739_v33  ;;  %v1740_v34 = vmul.f32 0.7978846, %v1484_v42  ;;  %v1230_v11 = vmul.f32 0.044715, %v974_v54  ;;  %v719_v1 = vmul.f32 %v4443_v51, %v4443_v51 }
  0xc9   : > { %v3233_v47 = vpop.eup %3232  ;;  %2755 = vst [vmem:[%s3960_s17 + $0x1c8] sm:$0xff] %v2499_v2  ;;  %v2500_v17 = vmul.f32 %v2244_v6, %v452_v24  ;;  %v2245_v50 = vadd.f32 1.0, %v3231_v25  ;;  %v456_v40 = vmul.f32 0.5, %v4375_v15  ;;  %v1741_v20 = vmul.f32 0.7978846, %v1485_v10  ;;  %v4508_v2 = vld [vmem:[%s3837_s30 + $0x260] sm:$0xff] }
  0xca   : > { %v2246_v27 = vadd.f32 1.0, %v3233_v47  ;;  %3244 = vtanh.f32 %v1740_v34  ;;  %v1486_v58 = vadd.f32 %v1230_v11, %v4432_v18  ;;  %v975_v53 = vmul.f32 %v719_v1, %v4443_v51 }
  0xcb   : > { %v3235_v4 = vpop.eup %3234  ;;  %2756 = vst [vmem:[%s3960_s17 + $0x1d0] sm:$0xff] %v2500_v17  ;;  %v2501_v29 = vmul.f32 %v2245_v50, %v453_v12  ;;  %v457_v3 = vmul.f32 0.5, %v4391_v41  ;;  %3246 = vtanh.f32 %v1741_v20  ;;  %v720_v15 = vmul.f32 %v4453_v46, %v4453_v46 }
  0xcc   : > { %v2502_v62 = vmul.f32 %v2246_v27, %v454_v48  ;;  %v2247_v45 = vadd.f32 1.0, %v3235_v4  ;;  %v1742_v0 = vmul.f32 0.7978846, %v1486_v58  ;;  %v1231_v24 = vmul.f32 0.044715, %v975_v53  ;;  %v4515_v27 = vld [vmem:[%s3837_s30 + $0x268] sm:$0xff] }
  0xcd   : > { %v3237_v8 = vpop.eup %3236  ;;  %2757 = vst [vmem:[%s3960_s17 + $0x1d8] sm:$0xff] %v2501_v29  ;;  %v458_v60 = vmul.f32 0.5, %v4396_v22  ;;  %v976_v31 = vmul.f32 %v720_v15, %v4453_v46  ;;  %v721_v41 = vmul.f32 %v4460_v36, %v4460_v36  ;;  %v722_v39 = vmul.f32 %v4463_v49, %v4463_v49 }
  0xce   : > { %2758 = vst [vmem:[%s3960_s17 + $0x1e0] sm:$0xff] %v2502_v62  ;;  %v2503_v9 = vmul.f32 %v2247_v45, %v455_v32  ;;  %v2248_v12 = vadd.f32 1.0, %v3237_v8  ;;  %3248 = vtanh.f32 %v1742_v0  ;;  %v1487_v44 = vadd.f32 %v1231_v24, %v4443_v51  ;;  %v4522_v0 = vld [vmem:[%s3837_s30 + $0x270] sm:$0xff] }
  0xcf   : > { %v459_v22 = vmul.f32 0.5, %v4403_v21  ;;  %v1232_v43 = vmul.f32 0.044715, %v976_v31  ;;  %v977_v37 = vmul.f32 %v721_v41, %v4460_v36  ;;  %v978_v38 = vmul.f32 %v722_v39, %v4463_v49  ;;  %v4529_v31 = vld [vmem:[%s3837_s30 + $0x278] sm:$0xff] }
  0xd0   : > { %2759 = vst [vmem:[%s3960_s17 + $0x1e8] sm:$0xff] %v2503_v9  ;;  %v2504_v7 = vmul.f32 %v2248_v12, %v456_v40  ;;  %v460_v48 = vmul.f32 0.5, %v4412_v5  ;;  %v1743_v52 = vmul.f32 0.7978846, %v1487_v44  ;;  %v723_v23 = vmul.f32 %v4477_v35, %v4477_v35 }
  0xd1   : > { %v1488_v55 = vadd.f32 %v1232_v43, %v4453_v46  ;;  %v1233_v13 = vmul.f32 0.044715, %v977_v37  ;;  %v1234_v59 = vmul.f32 0.044715, %v978_v38  ;;  %v724_v21 = vmul.f32 %v4482_v16, %v4482_v16  ;;  %v4537_v38 = vld [vmem:[%s3837_s30 + $0x280] sm:$0xff] }
  0xd2   : > { %v3239_v26 = vpop.eup %3238  ;;  %2760 = vst [vmem:[%s3960_s17 + $0x1f0] sm:$0xff] %v2504_v7  ;;  %v461_v19 = vmul.f32 0.5, %v4419_v63  ;;  %3250 = vtanh.f32 %v1743_v52  ;;  %v979_v56 = vmul.f32 %v723_v23, %v4477_v35  ;;  %v725_v5 = vmul.f32 %v4488_v14, %v4488_v14 }
  0xd3   : > { %v2249_v28 = vadd.f32 1.0, %v3239_v26  ;;  %v1744_v61 = vmul.f32 0.7978846, %v1488_v55  ;;  %v1489_v30 = vadd.f32 %v1233_v13, %v4460_v36  ;;  %v1490_v57 = vadd.f32 %v1234_v59, %v4463_v49  ;;  %v4546_v13 = vld [vmem:[%s3837_s30 + $0x288] sm:$0xff] }
  0xd4   : > { %v3241_v32 = vpop.eup %3240  ;;  %v462_v33 = vmul.f32 0.5, %v4432_v18  ;;  %v1235_v42 = vmul.f32 0.044715, %v979_v56  ;;  %v980_v54 = vmul.f32 %v724_v21, %v4482_v16  ;;  %v981_v63 = vmul.f32 %v725_v5, %v4488_v14 }
  0xd5   : > { %v3243_v6 = vpop.eup %3242  ;;  %v2505_v10 = vmul.f32 %v2249_v28, %v457_v3  ;;  %v2250_v25 = vadd.f32 1.0, %v3241_v32  ;;  %3252 = vtanh.f32 %v1744_v61  ;;  %v1745_v34 = vmul.f32 0.7978846, %v1489_v30  ;;  %v4559_v32 = vld [vmem:[%s3837_s30 + $0x290] sm:$0xff] }
  0xd6   : > { %v2251_v11 = vadd.f32 1.0, %v3243_v6  ;;  %v1746_v1 = vmul.f32 0.7978846, %v1490_v57  ;;  %v1491_v47 = vadd.f32 %v1235_v42, %v4477_v35  ;;  %v1236_v17 = vmul.f32 0.044715, %v980_v54 }
  0xd7   : > { %v3245_v18 = vpop.eup %3244  ;;  %2761 = vst [vmem:[%s3960_s17 + $0x1f8] sm:$0xff] %v2505_v10  ;;  %v2506_v50 = vmul.f32 %v2250_v25, %v458_v60  ;;  %3254 = vtanh.f32 %v1745_v34  ;;  %v1237_v40 = vmul.f32 0.044715, %v981_v63  ;;  %v726_v20 = vmul.f32 %v4508_v2, %v4508_v2 }
  0xd8   : > { %v3247_v58 = vpop.eup %3246  ;;  %v2507_v53 = vmul.f32 %v2251_v11, %v459_v22  ;;  %v2252_v4 = vadd.f32 1.0, %v3245_v18  ;;  %3256 = vtanh.f32 %v1746_v1  ;;  %v1747_v29 = vmul.f32 0.7978846, %v1491_v47 }
  0xd9   : > { %2762 = vst [vmem:[%s3960_s17 + $0x200] sm:$0xff] %v2506_v50  ;;  %v2253_v3 = vadd.f32 1.0, %v3247_v58  ;;  %v1492_v15 = vadd.f32 %v1236_v17, %v4482_v16  ;;  %v1493_v62 = vadd.f32 %v1237_v40, %v4488_v14  ;;  %v982_v45 = vmul.f32 %v726_v20, %v4508_v2  ;;  %v4570_v17 = vld [vmem:[%s3837_s30 + $0x298] sm:$0xff] }
  0xda   : > { %2763 = vst [vmem:[%s3960_s17 + $0x208] sm:$0xff] %v2507_v53  ;;  %v2508_v24 = vmul.f32 %v2252_v4, %v460_v48  ;;  %v463_v8 = vmul.f32 0.5, %v4443_v51  ;;  %3258 = vtanh.f32 %v1747_v29  ;;  %v727_v60 = vmul.f32 %v4515_v27, %v4515_v27  ;;  %v4575_v29 = vld [vmem:[%s3837_s30 + $0x2a0] sm:$0xff] }
  0xdb   : > { %v3249_v41 = vpop.eup %3248  ;;  %v2509_v39 = vmul.f32 %v2253_v3, %v461_v19  ;;  %v1748_v9 = vmul.f32 0.7978846, %v1492_v15  ;;  %v1749_v12 = vmul.f32 0.7978846, %v1493_v62  ;;  %v1238_v44 = vmul.f32 0.044715, %v982_v45 }
  0xdc   : > { %2764 = vst [vmem:[%s3960_s17 + $0x210] sm:$0xff] %v2508_v24  ;;  %v2254_v22 = vadd.f32 1.0, %v3249_v41  ;;  %v464_v43 = vmul.f32 0.5, %v4453_v46  ;;  %v983_v37 = vmul.f32 %v727_v60, %v4515_v27  ;;  %v728_v51 = vmul.f32 %v4522_v0, %v4522_v0 }
  0xdd   : > { %2765 = vst [vmem:[%s3960_s17 + $0x218] sm:$0xff] %v2509_v39  ;;  %v465_v7 = vmul.f32 0.5, %v4460_v36  ;;  %3260 = vtanh.f32 %v1748_v9  ;;  %v1494_v48 = vadd.f32 %v1238_v44, %v4508_v2  ;;  %v729_v52 = vmul.f32 %v4529_v31, %v4529_v31  ;;  %v4582_v39 = vld [vmem:[%s3837_s30 + $0x2a8] sm:$0xff] }
  0xde   : > { %v2510_v23 = vmul.f32 %v2254_v22, %v462_v33  ;;  %3262 = vtanh.f32 %v1749_v12  ;;  %v1239_v46 = vmul.f32 0.044715, %v983_v37  ;;  %v984_v55 = vmul.f32 %v728_v51, %v4522_v0 }
  0xdf   : > { %v3251_v59 = vpop.eup %3250  ;;  %v466_v21 = vmul.f32 0.5, %v4463_v49  ;;  %v1750_v26 = vmul.f32 0.7978846, %v1494_v48  ;;  %v985_v36 = vmul.f32 %v729_v52, %v4529_v31  ;;  %v730_v19 = vmul.f32 %v4537_v38, %v4537_v38 }
  0xe0   : > { %2766 = vst [vmem:[%s3960_s17 + $0x220] sm:$0xff] %v2510_v23  ;;  %v2255_v56 = vadd.f32 1.0, %v3251_v59  ;;  %v467_v5 = vmul.f32 0.5, %v4477_v35  ;;  %v1495_v28 = vadd.f32 %v1239_v46, %v4515_v27  ;;  %v1240_v61 = vmul.f32 0.044715, %v984_v55  ;;  %v4596_v55 = vld [vmem:[%s3837_s30 + $0x2b0] sm:$0xff] }
  0xe1   : > { %3264 = vtanh.f32 %v1750_v26  ;;  %v1241_v30 = vmul.f32 0.044715, %v985_v36  ;;  %v986_v57 = vmul.f32 %v730_v19, %v4537_v38  ;;  %v731_v49 = vmul.f32 %v4546_v13, %v4546_v13 }
  0xe2   : > { %v3253_v33 = vpop.eup %3252  ;;  %v2511_v42 = vmul.f32 %v2255_v56, %v463_v8  ;;  %v468_v54 = vmul.f32 0.5, %v4482_v16  ;;  %v1751_v63 = vmul.f32 0.7978846, %v1495_v28  ;;  %v1496_v35 = vadd.f32 %v1240_v61, %v4522_v0  ;;  %v4606_v28 = vld [vmem:[%s3837_s30 + $0x2c0] sm:$0xff] }
  0xe3   : > { %v2256_v6 = vadd.f32 1.0, %v3253_v33  ;;  %v1497_v10 = vadd.f32 %v1241_v30, %v4529_v31  ;;  %v1242_v25 = vmul.f32 0.044715, %v986_v57  ;;  %v987_v34 = vmul.f32 %v731_v49, %v4546_v13 }
  0xe4   : > { %v3255_v11 = vpop.eup %3254  ;;  %2767 = vst [vmem:[%s3960_s17 + $0x228] sm:$0xff] %v2511_v42  ;;  %v469_v1 = vmul.f32 0.5, %v4488_v14  ;;  %3266 = vtanh.f32 %v1751_v63  ;;  %v1752_v47 = vmul.f32 0.7978846, %v1496_v35  ;;  %v732_v16 = vmul.f32 %v4559_v32, %v4559_v32 }
  0xe5   : > { %v3257_v18 = vpop.eup %3256  ;;  %v2512_v50 = vmul.f32 %v2256_v6, %v464_v43  ;;  %v2257_v40 = vadd.f32 1.0, %v3255_v11  ;;  %v1753_v20 = vmul.f32 0.7978846, %v1497_v10  ;;  %v1498_v58 = vadd.f32 %v1242_v25, %v4537_v38  ;;  %v4621_v10 = vld [vmem:[%s3837_s30 + $0x2c8] sm:$0xff] }
  0xe6   : > { %v2258_v53 = vadd.f32 1.0, %v3257_v18  ;;  %3268 = vtanh.f32 %v1752_v47  ;;  %v1243_v4 = vmul.f32 0.044715, %v987_v34  ;;  %v988_v14 = vmul.f32 %v732_v16, %v4559_v32 }
  0xe7   : > { %v3259_v3 = vpop.eup %3258  ;;  %2768 = vst [vmem:[%s3960_s17 + $0x230] sm:$0xff] %v2512_v50  ;;  %v2513_v15 = vmul.f32 %v2257_v40, %v465_v7  ;;  %3270 = vtanh.f32 %v1753_v20  ;;  %v1754_v62 = vmul.f32 0.7978846, %v1498_v58  ;;  %v733_v45 = vmul.f32 %v4570_v17, %v4570_v17 }
  0xe8   : > { %v2514_v24 = vmul.f32 %v2258_v53, %v466_v21  ;;  %v2259_v8 = vadd.f32 1.0, %v3259_v3  ;;  %v1499_v60 = vadd.f32 %v1243_v4, %v4546_v13  ;;  %v1244_v41 = vmul.f32 0.044715, %v988_v14 }
  0xe9   : > { %2769 = vst [vmem:[%s3960_s17 + $0x238] sm:$0xff] %v2513_v15  ;;  %v470_v9 = vmul.f32 0.5, %v4508_v2  ;;  %3272 = vtanh.f32 %v1754_v62  ;;  %v989_v12 = vmul.f32 %v733_v45, %v4570_v17  ;;  %v734_v44 = vmul.f32 %v4575_v29, %v4575_v29 }
  0xea   : > { %v3261_v22 = vpop.eup %3260  ;;  %2770 = vst [vmem:[%s3960_s17 + $0x240] sm:$0xff] %v2514_v24  ;;  %v2515_v43 = vmul.f32 %v2259_v8, %v467_v5  ;;  %v471_v37 = vmul.f32 0.5, %v4515_v27  ;;  %v1755_v51 = vmul.f32 0.7978846, %v1499_v60  ;;  %v1500_v7 = vadd.f32 %v1244_v41, %v4559_v32  ;;  %v4603_v5 = vld [vmem:[%s3837_s30 + $0x2b8] sm:$0xff]  ;;  %v4633_v8 = vld [vmem:[%s3837_s30 + $0x2d0] sm:$0xff] }
  0xeb   : > { %v3263_v48 = vpop.eup %3262  ;;  %v2260_v52 = vadd.f32 1.0, %v3261_v22  ;;  %v1245_v2 = vmul.f32 0.044715, %v989_v12  ;;  %v990_v23 = vmul.f32 %v734_v44, %v4575_v29  ;;  %v735_v46 = vmul.f32 %v4582_v39, %v4582_v39  ;;  %v4639_v44 = vld [vmem:[%s3837_s30 + $0x2d8] sm:$0xff] }
  0xec   : > { %2771 = vst [vmem:[%s3960_s17 + $0x248] sm:$0xff] %v2515_v43  ;;  %v2261_v59 = vadd.f32 1.0, %v3263_v48  ;;  %v472_v27 = vmul.f32 0.5, %v4522_v0  ;;  %3274 = vtanh.f32 %v1755_v51  ;;  %v1756_v21 = vmul.f32 0.7978846, %v1500_v7 }
  0xed   : > { %v2516_v26 = vmul.f32 %v2260_v52, %v468_v54  ;;  %v1501_v36 = vadd.f32 %v1245_v2, %v4570_v17  ;;  %v1246_v19 = vmul.f32 0.044715, %v990_v23  ;;  %v991_v56 = vmul.f32 %v735_v46, %v4582_v39  ;;  %v4647_v52 = vld [vmem:[%s3837_s30 + $0x2e0] sm:$0xff] }
  0xee   : > { %v3265_v61 = vpop.eup %3264  ;;  %v2517_v30 = vmul.f32 %v2261_v59, %v469_v1  ;;  %v473_v57 = vmul.f32 0.5, %v4529_v31  ;;  %3276 = vtanh.f32 %v1756_v21  ;;  %v736_v0 = vmul.f32 %v4596_v55, %v4596_v55 }
  0xef   : > { %2772 = vst [vmem:[%s3960_s17 + $0x250] sm:$0xff] %v2516_v26  ;;  %v2262_v49 = vadd.f32 1.0, %v3265_v61  ;;  %v1757_v33 = vmul.f32 0.7978846, %v1501_v36  ;;  %v1502_v42 = vadd.f32 %v1246_v19, %v4575_v29  ;;  %v1247_v54 = vmul.f32 0.044715, %v991_v56 }
  0xf0   : > { %2773 = vst [vmem:[%s3960_s17 + $0x258] sm:$0xff] %v2517_v30  ;;  %v474_v63 = vmul.f32 0.5, %v4537_v38  ;;  %v992_v35 = vmul.f32 %v736_v0, %v4596_v55  ;;  %v737_v6 = vmul.f32 %v4603_v5, %v4603_v5  ;;  %v738_v31 = vmul.f32 %v4606_v28, %v4606_v28  ;;  %v4656_v36 = vld [vmem:[%s3837_s30 + $0x2e8] sm:$0xff] }
  0xf1   : > { %v3267_v25 = vpop.eup %3266  ;;  %v2518_v34 = vmul.f32 %v2262_v49, %v470_v9  ;;  %3278 = vtanh.f32 %v1757_v33  ;;  %v1758_v11 = vmul.f32 0.7978846, %v1502_v42  ;;  %v1503_v1 = vadd.f32 %v1247_v54, %v4582_v39 }
  0xf2   : > { %v2263_v47 = vadd.f32 1.0, %v3267_v25  ;;  %v1248_v16 = vmul.f32 0.044715, %v992_v35  ;;  %v993_v38 = vmul.f32 %v737_v6, %v4603_v5  ;;  %v994_v18 = vmul.f32 %v738_v31, %v4606_v28  ;;  %v4670_v35 = vld [vmem:[%s3837_s30 + $0x2f8] sm:$0xff] }
  0xf3   : > { %v3269_v50 = vpop.eup %3268  ;;  %2774 = vst [vmem:[%s3960_s17 + $0x260] sm:$0xff] %v2518_v34  ;;  %v475_v40 = vmul.f32 0.5, %v4546_v13  ;;  %3280 = vtanh.f32 %v1758_v11  ;;  %v1759_v20 = vmul.f32 0.7978846, %v1503_v1  ;;  %v739_v58 = vmul.f32 %v4621_v10, %v4621_v10 }
  0xf4   : > { %v3271_v53 = vpop.eup %3270  ;;  %v2519_v4 = vmul.f32 %v2263_v47, %v471_v37  ;;  %v2264_v14 = vadd.f32 1.0, %v3269_v50  ;;  %v1504_v3 = vadd.f32 %v1248_v16, %v4596_v55  ;;  %v1249_v15 = vmul.f32 0.044715, %v993_v38 }
  0xf5   : > { %v2265_v62 = vadd.f32 1.0, %v3271_v53  ;;  %3282 = vtanh.f32 %v1759_v20  ;;  %v1250_v45 = vmul.f32 0.044715, %v994_v18  ;;  %v995_v24 = vmul.f32 %v739_v58, %v4621_v10 }
  0xf6   : > { %v3273_v13 = vpop.eup %3272  ;;  %2775 = vst [vmem:[%s3960_s17 + $0x268] sm:$0xff] %v2519_v4  ;;  %v2520_v60 = vmul.f32 %v2264_v14, %v472_v27  ;;  %v476_v41 = vmul.f32 0.5, %v4559_v32  ;;  %v1760_v9 = vmul.f32 0.7978846, %v1504_v3  ;;  %v1505_v12 = vadd.f32 %v1249_v15, %v4603_v5 }
  0xf7   : > { %v2521_v22 = vmul.f32 %v2265_v62, %v473_v57  ;;  %v2266_v43 = vadd.f32 1.0, %v3273_v13  ;;  %v1506_v37 = vadd.f32 %v1250_v45, %v4606_v28  ;;  %v1251_v51 = vmul.f32 0.044715, %v995_v24  ;;  %v4663_v57 = vld [vmem:[%s3837_s30 + $0x2f0] sm:$0xff]  ;;  %v4687_v62 = vld [vmem:[%s3837_s30 + $0x300] sm:$0xff] }
  0xf8   : > { %2776 = vst [vmem:[%s3960_s17 + $0x270] sm:$0xff] %v2520_v60  ;;  %v477_v7 = vmul.f32 0.5, %v4570_v17  ;;  %3284 = vtanh.f32 %v1760_v9  ;;  %v1761_v48 = vmul.f32 0.7978846, %v1505_v12  ;;  %v740_v32 = vmul.f32 %v4633_v8, %v4633_v8 }
  0xf9   : > { %v3275_v2 = vpop.eup %3274  ;;  %2777 = vst [vmem:[%s3960_s17 + $0x278] sm:$0xff] %v2521_v22  ;;  %v2522_v23 = vmul.f32 %v2266_v43, %v474_v63  ;;  %v1762_v46 = vmul.f32 0.7978846, %v1506_v37  ;;  %v1507_v59 = vadd.f32 %v1251_v51, %v4621_v10  ;;  %v741_v27 = vmul.f32 %v4639_v44, %v4639_v44  ;;  %v4694_v22 = vld [vmem:[%s3837_s30 + $0x308] sm:$0xff]  ;;  %v4697_v43 = vld [vmem:[%s3837_s30 + $0x310] sm:$0xff] }
  0xfa   : > { %v2267_v21 = vadd.f32 1.0, %v3275_v2  ;;  %v478_v17 = vmul.f32 0.5, %v4575_v29  ;;  %3286 = vtanh.f32 %v1761_v48  ;;  %v996_v26 = vmul.f32 %v740_v32, %v4633_v8 }
  0xfb   : > { %v3277_v19 = vpop.eup %3276  ;;  %2778 = vst [vmem:[%s3960_s17 + $0x280] sm:$0xff] %v2522_v23  ;;  %3288 = vtanh.f32 %v1762_v46  ;;  %v1763_v56 = vmul.f32 0.7978846, %v1507_v59  ;;  %v997_v61 = vmul.f32 %v741_v27, %v4639_v44  ;;  %v742_v30 = vmul.f32 %v4647_v52, %v4647_v52 }
  0xfc   : > { %v2523_v0 = vmul.f32 %v2267_v21, %v475_v40  ;;  %v2268_v29 = vadd.f32 1.0, %v3277_v19  ;;  %v479_v49 = vmul.f32 0.5, %v4582_v39  ;;  %v1252_v33 = vmul.f32 0.044715, %v996_v26 }
  0xfd   : > { %3290 = vtanh.f32 %v1763_v56  ;;  %v1253_v42 = vmul.f32 0.044715, %v997_v61  ;;  %v998_v54 = vmul.f32 %v742_v30, %v4647_v52  ;;  %v743_v63 = vmul.f32 %v4656_v36, %v4656_v36 }
  0xfe   : > { %v3279_v6 = vpop.eup %3278  ;;  %2779 = vst [vmem:[%s3960_s17 + $0x288] sm:$0xff] %v2523_v0  ;;  %v2524_v31 = vmul.f32 %v2268_v29, %v476_v41  ;;  %v480_v25 = vmul.f32 0.5, %v4596_v55  ;;  %v1508_v34 = vadd.f32 %v1252_v33, %v4633_v8  ;;  %v744_v39 = vmul.f32 %v4663_v57, %v4663_v57  ;;  %v4713_v0 = vld [vmem:[%s3837_s30 + $0x318] sm:$0xff]  ;;  %v4716_v29 = vld [vmem:[%s3837_s30 + $0x320] sm:$0xff] }
  0xff   : > { %v2269_v11 = vadd.f32 1.0, %v3279_v6  ;;  %v1509_v1 = vadd.f32 %v1253_v42, %v4639_v44  ;;  %v1254_v47 = vmul.f32 0.044715, %v998_v54  ;;  %v999_v16 = vmul.f32 %v743_v63, %v4656_v36 }
 0x100   : > { %v3281_v38 = vpop.eup %3280  ;;  %2780 = vst [vmem:[%s3960_s17 + $0x290] sm:$0xff] %v2524_v31  ;;  %v481_v18 = vmul.f32 0.5, %v4603_v5  ;;  %v1764_v50 = vmul.f32 0.7978846, %v1508_v34  ;;  %v1000_v55 = vmul.f32 %v744_v39, %v4663_v57  ;;  %v745_v40 = vmul.f32 %v4670_v35, %v4670_v35  ;;  %v4723_v34 = vld [vmem:[%s3837_s30 + $0x328] sm:$0xff] }
 0x101   : > { %v2525_v20 = vmul.f32 %v2269_v11, %v477_v7  ;;  %v2270_v58 = vadd.f32 1.0, %v3281_v38  ;;  %v1765_v53 = vmul.f32 0.7978846, %v1509_v1  ;;  %v1510_v4 = vadd.f32 %v1254_v47, %v4647_v52  ;;  %v4732_v47 = vld [vmem:[%s3837_s30 + $0x330] sm:$0xff] }
 0x102   : > { %v3283_v14 = vpop.eup %3282  ;;  %3292 = vtanh.f32 %v1764_v50  ;;  %v1255_v3 = vmul.f32 0.044715, %v999_v16  ;;  %v1256_v15 = vmul.f32 0.044715, %v1000_v55  ;;  %v1001_v5 = vmul.f32 %v745_v40, %v4670_v35 }
 0x103   : > { %2781 = vst [vmem:[%s3960_s17 + $0x298] sm:$0xff] %v2525_v20  ;;  %v2526_v45 = vmul.f32 %v2270_v58, %v478_v17  ;;  %v2271_v24 = vadd.f32 1.0, %v3283_v14  ;;  %3294 = vtanh.f32 %v1765_v53  ;;  %v1766_v13 = vmul.f32 0.7978846, %v1510_v4 }
 0x104   : > { %v482_v60 = vmul.f32 0.5, %v4606_v28  ;;  %v1511_v41 = vadd.f32 %v1255_v3, %v4656_v36  ;;  %v1512_v9 = vadd.f32 %v1256_v15, %v4663_v57  ;;  %v1257_v12 = vmul.f32 0.044715, %v1001_v5 }
 0x105   : > { %v3285_v37 = vpop.eup %3284  ;;  %2782 = vst [vmem:[%s3960_s17 + $0x2a0] sm:$0xff] %v2526_v45  ;;  %v2527_v51 = vmul.f32 %v2271_v24, %v479_v49  ;;  %v483_v7 = vmul.f32 0.5, %v4621_v10  ;;  %3296 = vtanh.f32 %v1766_v13  ;;  %v746_v48 = vmul.f32 %v4687_v62, %v4687_v62 }
 0x106   : > { %v2272_v28 = vadd.f32 1.0, %v3285_v37  ;;  %v1767_v32 = vmul.f32 0.7978846, %v1511_v41  ;;  %v1768_v2 = vmul.f32 0.7978846, %v1512_v9  ;;  %v1513_v23 = vadd.f32 %v1257_v12, %v4670_v35  ;;  %v4749_v41 = vld [vmem:[%s3837_s30 + $0x338] sm:$0xff] }
 0x107   : > { %v3287_v46 = vpop.eup %3286  ;;  %2783 = vst [vmem:[%s3960_s17 + $0x2a8] sm:$0xff] %v2527_v51  ;;  %v484_v59 = vmul.f32 0.5, %v4633_v8  ;;  %v1002_v27 = vmul.f32 %v746_v48, %v4687_v62  ;;  %v747_v10 = vmul.f32 %v4694_v22, %v4694_v22  ;;  %v748_v21 = vmul.f32 %v4697_v43, %v4697_v43 }
 0x108   : > { %v3289_v17 = vpop.eup %3288  ;;  %v2528_v26 = vmul.f32 %v2272_v28, %v480_v25  ;;  %v2273_v19 = vadd.f32 1.0, %v3287_v46  ;;  %3298 = vtanh.f32 %v1767_v32  ;;  %v1769_v56 = vmul.f32 0.7978846, %v1513_v23 }
 0x109   : > { %v2274_v61 = vadd.f32 1.0, %v3289_v17  ;;  %3300 = vtanh.f32 %v1768_v2  ;;  %v1258_v30 = vmul.f32 0.044715, %v1002_v27  ;;  %v1003_v8 = vmul.f32 %v747_v10, %v4694_v22 }
 0x10a   : > { %v3291_v49 = vpop.eup %3290  ;;  %2784 = vst [vmem:[%s3960_s17 + $0x2b0] sm:$0xff] %v2528_v26  ;;  %v2529_v33 = vmul.f32 %v2273_v19, %v481_v18  ;;  %v485_v42 = vmul.f32 0.5, %v4639_v44  ;;  %3302 = vtanh.f32 %v1769_v56  ;;  %v1004_v54 = vmul.f32 %v748_v21, %v4697_v43 }
 0x10b   : > { %v2530_v63 = vmul.f32 %v2274_v61, %v482_v60  ;;  %v2275_v6 = vadd.f32 1.0, %v3291_v49  ;;  %v1514_v31 = vadd.f32 %v1258_v30, %v4687_v62  ;;  %v1259_v25 = vmul.f32 0.044715, %v1003_v8 }
 0x10c   : > { %2785 = vst [vmem:[%s3960_s17 + $0x2b8] sm:$0xff] %v2529_v33  ;;  %v486_v39 = vmul.f32 0.5, %v4647_v52  ;;  %v1260_v11 = vmul.f32 0.044715, %v1004_v54  ;;  %v749_v1 = vmul.f32 %v4713_v0, %v4713_v0  ;;  %v750_v44 = vmul.f32 %v4716_v29, %v4716_v29  ;;  %v4769_v33 = vld [vmem:[%s3837_s30 + $0x348] sm:$0xff] }
 0x10d   : > { %2786 = vst [vmem:[%s3960_s17 + $0x2c0] sm:$0xff] %v2530_v63  ;;  %v2531_v16 = vmul.f32 %v2275_v6, %v483_v7  ;;  %v487_v38 = vmul.f32 0.5, %v4656_v36  ;;  %v1770_v18 = vmul.f32 0.7978846, %v1514_v31  ;;  %v1515_v50 = vadd.f32 %v1259_v25, %v4694_v22  ;;  %v4772_v6 = vld [vmem:[%s3837_s30 + $0x350] sm:$0xff]  ;;  %v4775_v31 = vld [vmem:[%s3837_s30 + $0x358] sm:$0xff] }
 0x10e   : > { %v1516_v55 = vadd.f32 %v1260_v11, %v4697_v43  ;;  %v1005_v52 = vmul.f32 %v749_v1, %v4713_v0  ;;  %v1006_v40 = vmul.f32 %v750_v44, %v4716_v29  ;;  %v751_v20 = vmul.f32 %v4723_v34, %v4723_v34  ;;  %v4780_v1 = vld [vmem:[%s3837_s30 + $0x360] sm:$0xff] }
 0x10f   : > { %v3293_v58 = vpop.eup %3292  ;;  %2787 = vst [vmem:[%s3960_s17 + $0x2c8] sm:$0xff] %v2531_v16  ;;  %v488_v53 = vmul.f32 0.5, %v4663_v57  ;;  %3304 = vtanh.f32 %v1770_v18  ;;  %v1771_v4 = vmul.f32 0.7978846, %v1515_v50  ;;  %v752_v36 = vmul.f32 %v4732_v47, %v4732_v47 }
 0x110   : > { %v3295_v14 = vpop.eup %3294  ;;  %v2276_v3 = vadd.f32 1.0, %v3293_v58  ;;  %v1772_v15 = vmul.f32 0.7978846, %v1516_v55  ;;  %v1261_v5 = vmul.f32 0.044715, %v1005_v52  ;;  %v1007_v45 = vmul.f32 %v751_v20, %v4723_v34 }
 0x111   : > { %v2277_v24 = vadd.f32 1.0, %v3295_v14  ;;  %3306 = vtanh.f32 %v1771_v4  ;;  %v1262_v13 = vmul.f32 0.044715, %v1006_v40  ;;  %v1008_v60 = vmul.f32 %v752_v36, %v4732_v47 }
 0x112   : > { %v3297_v57 = vpop.eup %3296  ;;  %v2532_v9 = vmul.f32 %v2276_v3, %v484_v59  ;;  %3308 = vtanh.f32 %v1772_v15  ;;  %v1517_v12 = vadd.f32 %v1261_v5, %v4713_v0  ;;  %v1263_v37 = vmul.f32 0.044715, %v1007_v45  ;;  %v4759_v59 = vld [vmem:[%s3837_s30 + $0x340] sm:$0xff]  ;;  %v4804_v45 = vld [vmem:[%s3837_s30 + $0x368] sm:$0xff] }
 0x113   : > { %v2533_v51 = vmul.f32 %v2277_v24, %v485_v42  ;;  %v2278_v7 = vadd.f32 1.0, %v3297_v57  ;;  %v1518_v48 = vadd.f32 %v1262_v13, %v4716_v29  ;;  %v1264_v28 = vmul.f32 0.044715, %v1008_v60 }
 0x114   : > { %2788 = vst [vmem:[%s3960_s17 + $0x2d0] sm:$0xff] %v2532_v9  ;;  %v489_v32 = vmul.f32 0.5, %v4670_v35  ;;  %v1773_v2 = vmul.f32 0.7978846, %v1517_v12  ;;  %v1519_v23 = vadd.f32 %v1263_v37, %v4723_v34  ;;  %v753_v46 = vmul.f32 %v4749_v41, %v4749_v41 }
 0x115   : > { %v3299_v27 = vpop.eup %3298  ;;  %2789 = vst [vmem:[%s3960_s17 + $0x2d8] sm:$0xff] %v2533_v51  ;;  %v2534_v10 = vmul.f32 %v2278_v7, %v486_v39  ;;  %v490_v21 = vmul.f32 0.5, %v4687_v62  ;;  %v1774_v17 = vmul.f32 0.7978846, %v1518_v48  ;;  %v1520_v26 = vadd.f32 %v1264_v28, %v4732_v47  ;;  %v4808_v48 = vld [vmem:[%s3837_s30 + $0x370] sm:$0xff] }
 0x116   : > { %v3301_v19 = vpop.eup %3300  ;;  %v2279_v35 = vadd.f32 1.0, %v3299_v27  ;;  %3310 = vtanh.f32 %v1773_v2  ;;  %v1775_v56 = vmul.f32 0.7978846, %v1519_v23  ;;  %v1009_v61 = vmul.f32 %v753_v46, %v4749_v41 }
 0x117   : > { %v3303_v30 = vpop.eup %3302  ;;  %2790 = vst [vmem:[%s3960_s17 + $0x2e0] sm:$0xff] %v2534_v10  ;;  %v2280_v8 = vadd.f32 1.0, %v3301_v19  ;;  %3312 = vtanh.f32 %v1774_v17  ;;  %v1776_v49 = vmul.f32 0.7978846, %v1520_v26  ;;  %v754_v62 = vmul.f32 %v4759_v59, %v4759_v59 }
 0x118   : > { %v2535_v42 = vmul.f32 %v2279_v35, %v487_v38  ;;  %v2281_v54 = vadd.f32 1.0, %v3303_v30  ;;  %3314 = vtanh.f32 %v1775_v56  ;;  %v1265_v63 = vmul.f32 0.044715, %v1009_v61 }
 0x119   : > { %v2536_v25 = vmul.f32 %v2280_v8, %v488_v53  ;;  %v491_v39 = vmul.f32 0.5, %v4694_v22  ;;  %3316 = vtanh.f32 %v1776_v49  ;;  %v1010_v11 = vmul.f32 %v754_v62, %v4759_v59 }
 0x11a   : > { %2791 = vst [vmem:[%s3960_s17 + $0x2e8] sm:$0xff] %v2535_v42  ;;  %v2537_v44 = vmul.f32 %v2281_v54, %v489_v32  ;;  %v492_v16 = vmul.f32 0.5, %v4697_v43  ;;  %v1521_v38 = vadd.f32 %v1265_v63, %v4749_v41  ;;  %v755_v18 = vmul.f32 %v4769_v33, %v4769_v33  ;;  %v4824_v42 = vld [vmem:[%s3837_s30 + $0x378] sm:$0xff] }
 0x11b   : > { %2792 = vst [vmem:[%s3960_s17 + $0x2f0] sm:$0xff] %v2536_v25  ;;  %v493_v50 = vmul.f32 0.5, %v4713_v0  ;;  %v1266_v55 = vmul.f32 0.044715, %v1010_v11  ;;  %v756_v22 = vmul.f32 %v4772_v6, %v4772_v6  ;;  %v757_v52 = vmul.f32 %v4775_v31, %v4775_v31  ;;  %v4828_v11 = vld [vmem:[%s3837_s30 + $0x380] sm:$0xff] }
 0x11c   : > { %v3305_v40 = vpop.eup %3304  ;;  %2793 = vst [vmem:[%s3960_s17 + $0x2f8] sm:$0xff] %v2537_v44  ;;  %v494_v43 = vmul.f32 0.5, %v4716_v29  ;;  %v1777_v20 = vmul.f32 0.7978846, %v1521_v38  ;;  %v1011_v58 = vmul.f32 %v755_v18, %v4769_v33  ;;  %v758_v53 = vmul.f32 %v4780_v1, %v4780_v1  ;;  %v4832_v18 = vld [vmem:[%s3837_s30 + $0x388] sm:$0xff] }
 0x11d   : > { %v2282_v4 = vadd.f32 1.0, %v3305_v40  ;;  %v1522_v0 = vadd.f32 %v1266_v55, %v4759_v59  ;;  %v1012_v36 = vmul.f32 %v756_v22, %v4772_v6  ;;  %v1013_v14 = vmul.f32 %v757_v52, %v4775_v31  ;;  %v4839_v52 = vld [vmem:[%s3837_s30 + $0x390] sm:$0xff] }
 0x11e   : > { %v3307_v3 = vpop.eup %3306  ;;  %v495_v15 = vmul.f32 0.5, %v4723_v34  ;;  %3318 = vtanh.f32 %v1777_v20  ;;  %v1267_v29 = vmul.f32 0.044715, %v1011_v58  ;;  %v1014_v5 = vmul.f32 %v758_v53, %v4780_v1 }
 0x11f   : > { %v3309_v24 = vpop.eup %3308  ;;  %v2538_v13 = vmul.f32 %v2282_v4, %v490_v21  ;;  %v2283_v60 = vadd.f32 1.0, %v3307_v3  ;;  %v1778_v57 = vmul.f32 0.7978846, %v1522_v0  ;;  %v1268_v9 = vmul.f32 0.044715, %v1012_v36  ;;  %v4852_v36 = vld [vmem:[%s3837_s30 + $0x398] sm:$0xff] }
 0x120   : > { %v2284_v12 = vadd.f32 1.0, %v3309_v24  ;;  %v1523_v37 = vadd.f32 %v1267_v29, %v4769_v33  ;;  %v1269_v51 = vmul.f32 0.044715, %v1013_v14  ;;  %v1270_v7 = vmul.f32 0.044715, %v1014_v5 }
 0x121   : > { %2794 = vst [vmem:[%s3960_s17 + $0x300] sm:$0xff] %v2538_v13  ;;  %v2539_v34 = vmul.f32 %v2283_v60, %v491_v39  ;;  %3320 = vtanh.f32 %v1778_v57  ;;  %v1524_v28 = vadd.f32 %v1268_v9, %v4772_v6  ;;  %v759_v32 = vmul.f32 %v4804_v45, %v4804_v45  ;;  %v4865_v9 = vld [vmem:[%s3837_s30 + $0x3a0] sm:$0xff] }
 0x122   : > { %v2540_v2 = vmul.f32 %v2284_v12, %v492_v16  ;;  %v1779_v23 = vmul.f32 0.7978846, %v1523_v37  ;;  %v1525_v46 = vadd.f32 %v1269_v51, %v4775_v31  ;;  %v1526_v27 = vadd.f32 %v1270_v7, %v4780_v1 }
 0x123   : > { %v3311_v10 = vpop.eup %3310  ;;  %2795 = vst [vmem:[%s3960_s17 + $0x308] sm:$0xff] %v2539_v34  ;;  %v496_v21 = vmul.f32 0.5, %v4732_v47  ;;  %v1780_v17 = vmul.f32 0.7978846, %v1524_v28  ;;  %v1015_v26 = vmul.f32 %v759_v32, %v4804_v45  ;;  %v760_v19 = vmul.f32 %v4808_v48, %v4808_v48 }
 0x124   : > { %v3313_v35 = vpop.eup %3312  ;;  %2796 = vst [vmem:[%s3960_s17 + $0x310] sm:$0xff] %v2540_v2  ;;  %v2285_v56 = vadd.f32 1.0, %v3311_v10  ;;  %3322 = vtanh.f32 %v1779_v23  ;;  %v1781_v61 = vmul.f32 0.7978846, %v1525_v46  ;;  %v1782_v30 = vmul.f32 0.7978846, %v1526_v27 }
 0x125   : > { %v3315_v8 = vpop.eup %3314  ;;  %v2286_v49 = vadd.f32 1.0, %v3313_v35  ;;  %3324 = vtanh.f32 %v1780_v17  ;;  %v1271_v62 = vmul.f32 0.044715, %v1015_v26  ;;  %v1016_v47 = vmul.f32 %v760_v19, %v4808_v48 }
 0x126   : > { %v3317_v54 = vpop.eup %3316  ;;  %v2541_v63 = vmul.f32 %v2285_v56, %v493_v50  ;;  %v2287_v25 = vadd.f32 1.0, %v3315_v8  ;;  %v497_v39 = vmul.f32 0.5, %v4749_v41  ;;  %3326 = vtanh.f32 %v1781_v61 }
 0x127   : > { %v2542_v44 = vmul.f32 %v2286_v49, %v494_v43  ;;  %v2288_v16 = vadd.f32 1.0, %v3317_v54  ;;  %3328 = vtanh.f32 %v1782_v30  ;;  %v1527_v38 = vadd.f32 %v1271_v62, %v4804_v45 }
 0x128   : > { %2797 = vst [vmem:[%s3960_s17 + $0x318] sm:$0xff] %v2541_v63  ;;  %v2543_v55 = vmul.f32 %v2287_v25, %v495_v15  ;;  %v498_v50 = vmul.f32 0.5, %v4759_v59  ;;  %v1272_v22 = vmul.f32 0.044715, %v1016_v47  ;;  %v761_v41 = vmul.f32 %v4824_v42, %v4824_v42  ;;  %v4880_v47 = vld [vmem:[%s3837_s30 + $0x3a8] sm:$0xff] }
 0x129   : > { %2798 = vst [vmem:[%s3960_s17 + $0x320] sm:$0xff] %v2542_v44  ;;  %v2544_v40 = vmul.f32 %v2288_v16, %v496_v21  ;;  %v499_v43 = vmul.f32 0.5, %v4769_v33  ;;  %v1783_v20 = vmul.f32 0.7978846, %v1527_v38  ;;  %v762_v58 = vmul.f32 %v4828_v11, %v4828_v11  ;;  %v4883_v44 = vld [vmem:[%s3837_s30 + $0x3b0] sm:$0xff] }
 0x12a   : > { %2799 = vst [vmem:[%s3960_s17 + $0x328] sm:$0xff] %v2543_v55  ;;  %v500_v53 = vmul.f32 0.5, %v4772_v6  ;;  %v1528_v59 = vadd.f32 %v1272_v22, %v4808_v48  ;;  %v1017_v4 = vmul.f32 %v761_v41, %v4824_v42  ;;  %v763_v0 = vmul.f32 %v4832_v18, %v4832_v18 }
 0x12b   : > { %v3319_v14 = vpop.eup %3318  ;;  %2800 = vst [vmem:[%s3960_s17 + $0x330] sm:$0xff] %v2544_v40  ;;  %v501_v33 = vmul.f32 0.5, %v4775_v31  ;;  %3330 = vtanh.f32 %v1783_v20  ;;  %v1018_v3 = vmul.f32 %v762_v58, %v4828_v11  ;;  %v764_v6 = vmul.f32 %v4839_v52, %v4839_v52  ;;  %v4894_v20 = vld [vmem:[%s3837_s30 + $0x3c0] sm:$0xff] }
 0x12c   : > { %v2289_v15 = vadd.f32 1.0, %v3319_v14  ;;  %v1784_v29 = vmul.f32 0.7978846, %v1528_v59  ;;  %v1273_v5 = vmul.f32 0.044715, %v1017_v4  ;;  %v1019_v24 = vmul.f32 %v763_v0, %v4832_v18  ;;  %v4901_v4 = vld [vmem:[%s3837_s30 + $0x3c8] sm:$0xff] }
 0x12d   : > { %v502_v13 = vmul.f32 0.5, %v4780_v1  ;;  %v1274_v60 = vmul.f32 0.044715, %v1018_v3  ;;  %v1020_v57 = vmul.f32 %v764_v6, %v4839_v52  ;;  %v765_v31 = vmul.f32 %v4852_v36, %v4852_v36 }
 0x12e   : > { %v3321_v12 = vpop.eup %3320  ;;  %v2545_v37 = vmul.f32 %v2289_v15, %v497_v39  ;;  %3332 = vtanh.f32 %v1784_v29  ;;  %v1529_v51 = vadd.f32 %v1273_v5, %v4824_v42  ;;  %v1275_v7 = vmul.f32 0.044715, %v1019_v24 }
 0x12f   : > { %v2290_v34 = vadd.f32 1.0, %v3321_v12  ;;  %v1530_v28 = vadd.f32 %v1274_v60, %v4828_v11  ;;  %v1276_v32 = vmul.f32 0.044715, %v1020_v57  ;;  %v1021_v1 = vmul.f32 %v765_v31, %v4852_v36 }
 0x130   : > { %2801 = vst [vmem:[%s3960_s17 + $0x338] sm:$0xff] %v2545_v37  ;;  %v503_v2 = vmul.f32 0.5, %v4804_v45  ;;  %v1785_v23 = vmul.f32 0.7978846, %v1529_v51  ;;  %v1531_v46 = vadd.f32 %v1275_v7, %v4832_v18  ;;  %v766_v27 = vmul.f32 %v4865_v9, %v4865_v9 }
 0x131   : > { %v3323_v10 = vpop.eup %3322  ;;  %v2546_v21 = vmul.f32 %v2290_v34, %v498_v50  ;;  %v1786_v17 = vmul.f32 0.7978846, %v1530_v28  ;;  %v1532_v26 = vadd.f32 %v1276_v32, %v4839_v52  ;;  %v1277_v19 = vmul.f32 0.044715, %v1021_v1  ;;  %v4886_v50 = vld [vmem:[%s3837_s30 + $0x3b8] sm:$0xff] }
 0x132   : > { %v3325_v35 = vpop.eup %3324  ;;  %v2291_v56 = vadd.f32 1.0, %v3323_v10  ;;  %3334 = vtanh.f32 %v1785_v23  ;;  %v1787_v61 = vmul.f32 0.7978846, %v1531_v46  ;;  %v1022_v45 = vmul.f32 %v766_v27, %v4865_v9  ;;  %v4924_v28 = vld [vmem:[%s3837_s30 + $0x3d8] sm:$0xff] }
 0x133   : > { %v3327_v30 = vpop.eup %3326  ;;  %2802 = vst [vmem:[%s3960_s17 + $0x340] sm:$0xff] %v2546_v21  ;;  %v2292_v8 = vadd.f32 1.0, %v3325_v35  ;;  %3336 = vtanh.f32 %v1786_v17  ;;  %v1788_v49 = vmul.f32 0.7978846, %v1532_v26  ;;  %v1533_v62 = vadd.f32 %v1277_v19, %v4852_v36 }
 0x134   : > { %v3329_v54 = vpop.eup %3328  ;;  %v2547_v63 = vmul.f32 %v2291_v56, %v499_v43  ;;  %v2293_v25 = vadd.f32 1.0, %v3327_v30  ;;  %3338 = vtanh.f32 %v1787_v61  ;;  %v1278_v39 = vmul.f32 0.044715, %v1022_v45 }
 0x135   : > { %v2548_v16 = vmul.f32 %v2292_v8, %v500_v53  ;;  %v2294_v38 = vadd.f32 1.0, %v3329_v54  ;;  %3340 = vtanh.f32 %v1788_v49  ;;  %v1789_v55 = vmul.f32 0.7978846, %v1533_v62 }
 0x136   : > { %2803 = vst [vmem:[%s3960_s17 + $0x348] sm:$0xff] %v2547_v63  ;;  %v2549_v22 = vmul.f32 %v2293_v25, %v501_v33  ;;  %v504_v41 = vmul.f32 0.5, %v4808_v48  ;;  %v1534_v40 = vadd.f32 %v1278_v39, %v4865_v9  ;;  %v767_v43 = vmul.f32 %v4880_v47, %v4880_v47 }
 0x137   : > { %2804 = vst [vmem:[%s3960_s17 + $0x350] sm:$0xff] %v2548_v16  ;;  %v2550_v58 = vmul.f32 %v2294_v38, %v502_v13  ;;  %v505_v53 = vmul.f32 0.5, %v4824_v42  ;;  %3342 = vtanh.f32 %v1789_v55  ;;  %v768_v59 = vmul.f32 %v4883_v44, %v4883_v44  ;;  %v4917_v13 = vld [vmem:[%s3837_s30 + $0x3d0] sm:$0xff]  ;;  %v4939_v16 = vld [vmem:[%s3837_s30 + $0x3e0] sm:$0xff] }
 0x138   : > { %v3331_v48 = vpop.eup %3330  ;;  %2805 = vst [vmem:[%s3960_s17 + $0x358] sm:$0xff] %v2549_v22  ;;  %v506_v0 = vmul.f32 0.5, %v4828_v11  ;;  %v1790_v14 = vmul.f32 0.7978846, %v1534_v40  ;;  %v1023_v33 = vmul.f32 %v767_v43, %v4880_v47  ;;  %v769_v3 = vmul.f32 %v4886_v50, %v4886_v50 }
 0x139   : > { %2806 = vst [vmem:[%s3960_s17 + $0x360] sm:$0xff] %v2550_v58  ;;  %v2295_v6 = vadd.f32 1.0, %v3331_v48  ;;  %v507_v42 = vmul.f32 0.5, %v4832_v18  ;;  %v1024_v15 = vmul.f32 %v768_v59, %v4883_v44  ;;  %v770_v29 = vmul.f32 %v4894_v20, %v4894_v20  ;;  %v4949_v59 = vld [vmem:[%s3837_s30 + $0x3f0] sm:$0xff] }
 0x13a   : > { %3344 = vtanh.f32 %v1790_v14  ;;  %v1279_v5 = vmul.f32 0.044715, %v1023_v33  ;;  %v1025_v11 = vmul.f32 %v769_v3, %v4886_v50  ;;  %v771_v24 = vmul.f32 %v4901_v4, %v4901_v4 }
 0x13b   : > { %v3333_v60 = vpop.eup %3332  ;;  %v2551_v57 = vmul.f32 %v2295_v6, %v503_v2  ;;  %v508_v18 = vmul.f32 0.5, %v4839_v52  ;;  %v1280_v31 = vmul.f32 0.044715, %v1024_v15  ;;  %v1026_v12 = vmul.f32 %v770_v29, %v4894_v20  ;;  %v4960_v15 = vld [vmem:[%s3837_s30 + $0x3f8] sm:$0xff] }
 0x13c   : > { %v2296_v37 = vadd.f32 1.0, %v3333_v60  ;;  %v1535_v51 = vadd.f32 %v1279_v5, %v4880_v47  ;;  %v1281_v7 = vmul.f32 0.044715, %v1025_v11  ;;  %v1027_v34 = vmul.f32 %v771_v24, %v4901_v4 }
 0x13d   : > { %2807 = vst [vmem:[%s3960_s17 + $0x368] sm:$0xff] %v2551_v57  ;;  %v509_v32 = vmul.f32 0.5, %v4852_v36  ;;  %v1536_v1 = vadd.f32 %v1280_v31, %v4883_v44  ;;  %v1282_v2 = vmul.f32 0.044715, %v1026_v12  ;;  %v772_v52 = vmul.f32 %v4917_v13, %v4917_v13 }
 0x13e   : > { %v2552_v23 = vmul.f32 %v2296_v37, %v504_v41  ;;  %v1791_v46 = vmul.f32 0.7978846, %v1535_v51  ;;  %v1537_v27 = vadd.f32 %v1281_v7, %v4886_v50  ;;  %v1283_v10 = vmul.f32 0.044715, %v1027_v34  ;;  %v4943_v41 = vld [vmem:[%s3837_s30 + $0x3e8] sm:$0xff] }
 0x13f   : > { %v3335_v21 = vpop.eup %3334  ;;  %v1792_v17 = vmul.f32 0.7978846, %v1536_v1  ;;  %v1538_v26 = vadd.f32 %v1282_v2, %v4894_v20  ;;  %v1028_v19 = vmul.f32 %v772_v52, %v4917_v13  ;;  %v773_v36 = vmul.f32 %v4924_v28, %v4924_v28  ;;  %v4978_v7 = vld [vmem:[%s3837_s30 + $0x408] sm:$0xff] }
 0x140   : > { %v3337_v35 = vpop.eup %3336  ;;  %2808 = vst [vmem:[%s3960_s17 + $0x370] sm:$0xff] %v2552_v23  ;;  %v2297_v56 = vadd.f32 1.0, %v3335_v21  ;;  %3346 = vtanh.f32 %v1791_v46  ;;  %v1793_v61 = vmul.f32 0.7978846, %v1537_v27  ;;  %v1539_v45 = vadd.f32 %v1283_v10, %v4901_v4 }
 0x141   : > { %v3339_v30 = vpop.eup %3338  ;;  %v2298_v8 = vadd.f32 1.0, %v3337_v35  ;;  %3348 = vtanh.f32 %v1792_v17  ;;  %v1794_v49 = vmul.f32 0.7978846, %v1538_v26  ;;  %v1284_v62 = vmul.f32 0.044715, %v1028_v19 }
 0x142   : > { %v3341_v54 = vpop.eup %3340  ;;  %v2553_v63 = vmul.f32 %v2297_v56, %v505_v53  ;;  %v2299_v25 = vadd.f32 1.0, %v3339_v30  ;;  %3350 = vtanh.f32 %v1793_v61  ;;  %v1795_v39 = vmul.f32 0.7978846, %v1539_v45 }
 0x143   : > { %v2554_v38 = vmul.f32 %v2298_v8, %v506_v0  ;;  %v2300_v55 = vadd.f32 1.0, %v3341_v54  ;;  %3352 = vtanh.f32 %v1794_v49  ;;  %v1540_v22 = vadd.f32 %v1284_v62, %v4917_v13 }
 0x144   : > { %v3343_v40 = vpop.eup %3342  ;;  %2809 = vst [vmem:[%s3960_s17 + $0x378] sm:$0xff] %v2553_v63  ;;  %v2555_v43 = vmul.f32 %v2299_v25, %v507_v42  ;;  %v510_v58 = vmul.f32 0.5, %v4865_v9  ;;  %3354 = vtanh.f32 %v1795_v39  ;;  %v1029_v53 = vmul.f32 %v773_v36, %v4924_v28  ;;  %v4996_v39 = vld [vmem:[%s3837_s30 + $0x410] sm:$0xff] }
 0x145   : > { %2810 = vst [vmem:[%s3960_s17 + $0x380] sm:$0xff] %v2554_v38  ;;  %v2556_v48 = vmul.f32 %v2300_v55, %v508_v18  ;;  %v2301_v0 = vadd.f32 1.0, %v3343_v40  ;;  %v1796_v14 = vmul.f32 0.7978846, %v1540_v22  ;;  %v774_v33 = vmul.f32 %v4939_v16, %v4939_v16 }
 0x146   : > { %2811 = vst [vmem:[%s3960_s17 + $0x388] sm:$0xff] %v2555_v43  ;;  %v511_v3 = vmul.f32 0.5, %v4880_v47  ;;  %v512_v9 = vmul.f32 0.5, %v4883_v44  ;;  %v1285_v6 = vmul.f32 0.044715, %v1029_v53  ;;  %v775_v42 = vmul.f32 %v4943_v41, %v4943_v41  ;;  %v4967_v47 = vld [vmem:[%s3837_s30 + $0x400] sm:$0xff] }
 0x147   : > { %v3345_v29 = vpop.eup %3344  ;;  %2812 = vst [vmem:[%s3960_s17 + $0x390] sm:$0xff] %v2556_v48  ;;  %v2557_v5 = vmul.f32 %v2301_v0, %v509_v32  ;;  %3356 = vtanh.f32 %v1796_v14  ;;  %v1030_v11 = vmul.f32 %v774_v33, %v4939_v16  ;;  %v776_v24 = vmul.f32 %v4949_v59, %v4949_v59  ;;  %v4999_v43 = vld [vmem:[%s3837_s30 + $0x418] sm:$0xff]  ;;  %v5003_v14 = vld [vmem:[%s3837_s30 + $0x420] sm:$0xff] }
 0x148   : > { %v2302_v60 = vadd.f32 1.0, %v3345_v29  ;;  %v513_v44 = vmul.f32 0.5, %v4886_v50  ;;  %v1541_v57 = vadd.f32 %v1285_v6, %v4924_v28  ;;  %v1031_v18 = vmul.f32 %v775_v42, %v4943_v41  ;;  %v5010_v6 = vld [vmem:[%s3837_s30 + $0x428] sm:$0xff] }
 0x149   : > { %2813 = vst [vmem:[%s3960_s17 + $0x398] sm:$0xff] %v2557_v5  ;;  %v514_v31 = vmul.f32 0.5, %v4894_v20  ;;  %v1286_v12 = vmul.f32 0.044715, %v1030_v11  ;;  %v1032_v37 = vmul.f32 %v776_v24, %v4949_v59  ;;  %v777_v51 = vmul.f32 %v4960_v15, %v4960_v15 }
 0x14a   : > { %v2558_v34 = vmul.f32 %v2302_v60, %v510_v58  ;;  %v1797_v32 = vmul.f32 0.7978846, %v1541_v57  ;;  %v1287_v1 = vmul.f32 0.044715, %v1031_v18  ;;  %v778_v50 = vmul.f32 %v4967_v47, %v4967_v47  ;;  %v5022_v57 = vld [vmem:[%s3837_s30 + $0x430] sm:$0xff] }
 0x14b   : > { %v515_v2 = vmul.f32 0.5, %v4901_v4  ;;  %v1542_v52 = vadd.f32 %v1286_v12, %v4939_v16  ;;  %v1288_v23 = vmul.f32 0.044715, %v1032_v37  ;;  %v1033_v20 = vmul.f32 %v777_v51, %v4960_v15  ;;  %v5030_v51 = vld [vmem:[%s3837_s30 + $0x438] sm:$0xff] }
 0x14c   : > { %2814 = vst [vmem:[%s3960_s17 + $0x3a0] sm:$0xff] %v2558_v34  ;;  %3358 = vtanh.f32 %v1797_v32  ;;  %v1543_v46 = vadd.f32 %v1287_v1, %v4943_v41  ;;  %v1034_v27 = vmul.f32 %v778_v50, %v4967_v47  ;;  %v779_v10 = vmul.f32 %v4978_v7, %v4978_v7 }
 0x14d   : > { %v3347_v21 = vpop.eup %3346  ;;  %v516_v17 = vmul.f32 0.5, %v4917_v13  ;;  %v1798_v26 = vmul.f32 0.7978846, %v1542_v52  ;;  %v1544_v4 = vadd.f32 %v1288_v23, %v4949_v59  ;;  %v1289_v19 = vmul.f32 0.044715, %v1033_v20 }
 0x14e   : > { %v3349_v36 = vpop.eup %3348  ;;  %v2303_v35 = vadd.f32 1.0, %v3347_v21  ;;  %v1799_v56 = vmul.f32 0.7978846, %v1543_v46  ;;  %v1290_v61 = vmul.f32 0.044715, %v1034_v27  ;;  %v1035_v45 = vmul.f32 %v779_v10, %v4978_v7 }
 0x14f   : > { %v3351_v30 = vpop.eup %3350  ;;  %v2304_v8 = vadd.f32 1.0, %v3349_v36  ;;  %3360 = vtanh.f32 %v1798_v26  ;;  %v1800_v49 = vmul.f32 0.7978846, %v1544_v4  ;;  %v1545_v62 = vadd.f32 %v1289_v19, %v4960_v15 }
 0x150   : > { %v3353_v13 = vpop.eup %3352  ;;  %v2559_v54 = vmul.f32 %v2303_v35, %v511_v3  ;;  %v2305_v63 = vadd.f32 1.0, %v3351_v30  ;;  %3362 = vtanh.f32 %v1799_v56  ;;  %v1546_v25 = vadd.f32 %v1290_v61, %v4967_v47 }
 0x151   : > { %v3355_v38 = vpop.eup %3354  ;;  %v2560_v55 = vmul.f32 %v2304_v8, %v512_v9  ;;  %v2306_v22 = vadd.f32 1.0, %v3353_v13  ;;  %3364 = vtanh.f32 %v1800_v49  ;;  %v1801_v40 = vmul.f32 0.7978846, %v1545_v62  ;;  %v5049_v13 = vld [vmem:[%s3837_s30 + $0x440] sm:$0xff] }
 0x152   : > { %2815 = vst [vmem:[%s3960_s17 + $0x3a8] sm:$0xff] %v2559_v54  ;;  %v2561_v58 = vmul.f32 %v2305_v63, %v513_v44  ;;  %v2307_v53 = vadd.f32 1.0, %v3355_v38  ;;  %v1802_v48 = vmul.f32 0.7978846, %v1546_v25  ;;  %v1291_v0 = vmul.f32 0.044715, %v1035_v45 }
 0x153   : > { %2816 = vst [vmem:[%s3960_s17 + $0x3b0] sm:$0xff] %v2560_v55  ;;  %v2562_v33 = vmul.f32 %v2306_v22, %v514_v31  ;;  %v517_v3 = vmul.f32 0.5, %v4924_v28  ;;  %3366 = vtanh.f32 %v1801_v40  ;;  %v780_v9 = vmul.f32 %v4996_v39, %v4996_v39  ;;  %v5055_v40 = vld [vmem:[%s3837_s30 + $0x448] sm:$0xff] }
 0x154   : > { %v3357_v42 = vpop.eup %3356  ;;  %2817 = vst [vmem:[%s3960_s17 + $0x3b8] sm:$0xff] %v2561_v58  ;;  %v2563_v29 = vmul.f32 %v2307_v53, %v515_v2  ;;  %3368 = vtanh.f32 %v1802_v48  ;;  %v1547_v5 = vadd.f32 %v1291_v0, %v4978_v7  ;;  %v781_v11 = vmul.f32 %v4999_v43, %v4999_v43 }
 0x155   : > { %2818 = vst [vmem:[%s3960_s17 + $0x3c0] sm:$0xff] %v2562_v33  ;;  %v2308_v24 = vadd.f32 1.0, %v3357_v42  ;;  %v518_v28 = vmul.f32 0.5, %v4939_v16  ;;  %v1036_v60 = vmul.f32 %v780_v9, %v4996_v39  ;;  %v782_v44 = vmul.f32 %v5003_v14, %v5003_v14  ;;  %v5060_v33 = vld [vmem:[%s3837_s30 + $0x450] sm:$0xff] }
 0x156   : > { %2819 = vst [vmem:[%s3960_s17 + $0x3c8] sm:$0xff] %v2563_v29  ;;  %v519_v18 = vmul.f32 0.5, %v4943_v41  ;;  %v1803_v31 = vmul.f32 0.7978846, %v1547_v5  ;;  %v1037_v12 = vmul.f32 %v781_v11, %v4999_v43  ;;  %v783_v37 = vmul.f32 %v5010_v6, %v5010_v6 }
 0x157   : > { %v2564_v16 = vmul.f32 %v2308_v24, %v516_v17  ;;  %v520_v34 = vmul.f32 0.5, %v4949_v59  ;;  %v1292_v32 = vmul.f32 0.044715, %v1036_v60  ;;  %v1038_v1 = vmul.f32 %v782_v44, %v5003_v14  ;;  %v5069_v60 = vld [vmem:[%s3837_s30 + $0x458] sm:$0xff]  ;;  %v5072_v44 = vld [vmem:[%s3837_s30 + $0x460] sm:$0xff] }
 0x158   : > { %3370 = vtanh.f32 %v1803_v31  ;;  %v1293_v50 = vmul.f32 0.044715, %v1037_v12  ;;  %v1039_v2 = vmul.f32 %v783_v37, %v5010_v6  ;;  %v784_v41 = vmul.f32 %v5022_v57, %v5022_v57 }
 0x159   : > { %v3359_v52 = vpop.eup %3358  ;;  %2820 = vst [vmem:[%s3960_s17 + $0x3d0] sm:$0xff] %v2564_v16  ;;  %v521_v23 = vmul.f32 0.5, %v4960_v15  ;;  %v1548_v20 = vadd.f32 %v1292_v32, %v4996_v39  ;;  %v1294_v46 = vmul.f32 0.044715, %v1038_v1  ;;  %v785_v59 = vmul.f32 %v5030_v51, %v5030_v51  ;;  %v5081_v32 = vld [vmem:[%s3837_s30 + $0x468] sm:$0xff] }
 0x15a   : > { %v2309_v27 = vadd.f32 1.0, %v3359_v52  ;;  %v1549_v10 = vadd.f32 %v1293_v50, %v4999_v43  ;;  %v1295_v21 = vmul.f32 0.044715, %v1039_v2  ;;  %v1040_v17 = vmul.f32 %v784_v41, %v5022_v57 }
 0x15b   : > { %v522_v26 = vmul.f32 0.5, %v4967_v47  ;;  %v1804_v4 = vmul.f32 0.7978846, %v1548_v20  ;;  %v1550_v19 = vadd.f32 %v1294_v46, %v5003_v14  ;;  %v1041_v15 = vmul.f32 %v785_v59, %v5030_v51 }
 0x15c   : > { %v3361_v36 = vpop.eup %3360  ;;  %v2565_v35 = vmul.f32 %v2309_v27, %v517_v3  ;;  %v1805_v56 = vmul.f32 0.7978846, %v1549_v10  ;;  %v1551_v61 = vadd.f32 %v1295_v21, %v5010_v6  ;;  %v1296_v45 = vmul.f32 0.044715, %v1040_v17  ;;  %v5098_v10 = vld [vmem:[%s3837_s30 + $0x470] sm:$0xff] }
 0x15d   : > { %v3363_v30 = vpop.eup %3362  ;;  %v2310_v8 = vadd.f32 1.0, %v3361_v36  ;;  %3372 = vtanh.f32 %v1804_v4  ;;  %v1806_v49 = vmul.f32 0.7978846, %v1550_v19  ;;  %v1297_v62 = vmul.f32 0.044715, %v1041_v15 }
 0x15e   : > { %v3365_v47 = vpop.eup %3364  ;;  %2821 = vst [vmem:[%s3960_s17 + $0x3d8] sm:$0xff] %v2565_v35  ;;  %v2311_v54 = vadd.f32 1.0, %v3363_v30  ;;  %3374 = vtanh.f32 %v1805_v56  ;;  %v1807_v63 = vmul.f32 0.7978846, %v1551_v61  ;;  %v1552_v25 = vadd.f32 %v1296_v45, %v5022_v57 }
 0x15f   : > { %v2566_v38 = vmul.f32 %v2310_v8, %v518_v28  ;;  %v2312_v55 = vadd.f32 1.0, %v3365_v47  ;;  %3376 = vtanh.f32 %v1806_v49  ;;  %v1553_v22 = vadd.f32 %v1297_v62, %v5030_v51 }
 0x160   : > { %v3367_v58 = vpop.eup %3366  ;;  %v2567_v53 = vmul.f32 %v2311_v54, %v519_v18  ;;  %3378 = vtanh.f32 %v1807_v63  ;;  %v1808_v48 = vmul.f32 0.7978846, %v1552_v25  ;;  %v786_v0 = vmul.f32 %v5049_v13, %v5049_v13 }
 0x161   : > { %v3369_v3 = vpop.eup %3368  ;;  %2822 = vst [vmem:[%s3960_s17 + $0x3e0] sm:$0xff] %v2566_v38  ;;  %v2568_v9 = vmul.f32 %v2312_v55, %v520_v34  ;;  %v2313_v42 = vadd.f32 1.0, %v3367_v58  ;;  %v523_v29 = vmul.f32 0.5, %v4978_v7  ;;  %v1809_v5 = vmul.f32 0.7978846, %v1553_v22 }
 0x162   : > { %2823 = vst [vmem:[%s3960_s17 + $0x3e8] sm:$0xff] %v2567_v53  ;;  %v2314_v11 = vadd.f32 1.0, %v3369_v3  ;;  %3380 = vtanh.f32 %v1808_v48  ;;  %v1042_v24 = vmul.f32 %v786_v0, %v5049_v13  ;;  %v787_v28 = vmul.f32 %v5055_v40, %v5055_v40 }
 0x163   : > { %2824 = vst [vmem:[%s3960_s17 + $0x3f0] sm:$0xff] %v2568_v9  ;;  %v2569_v18 = vmul.f32 %v2313_v42, %v521_v23  ;;  %v524_v7 = vmul.f32 0.5, %v4996_v39  ;;  %3382 = vtanh.f32 %v1809_v5  ;;  %v788_v31 = vmul.f32 %v5060_v33, %v5060_v33 }
 0x164   : > { %v2570_v12 = vmul.f32 %v2314_v11, %v522_v26  ;;  %v525_v37 = vmul.f32 0.5, %v4999_v43  ;;  %v1298_v16 = vmul.f32 0.044715, %v1042_v24  ;;  %v1043_v34 = vmul.f32 %v787_v28, %v5055_v40  ;;  %v5119_v11 = vld [vmem:[%s3837_s30 + $0x480] sm:$0xff] }
 0x165   : > { %v3371_v1 = vpop.eup %3370  ;;  %2825 = vst [vmem:[%s3960_s17 + $0x3f8] sm:$0xff] %v2569_v18  ;;  %v526_v50 = vmul.f32 0.5, %v5003_v14  ;;  %v1044_v2 = vmul.f32 %v788_v31, %v5060_v33  ;;  %v789_v39 = vmul.f32 %v5069_v60, %v5069_v60  ;;  %v790_v41 = vmul.f32 %v5072_v44, %v5072_v44  ;;  %v5123_v31 = vld [vmem:[%s3837_s30 + $0x488] sm:$0xff] }
 0x166   : > { %2826 = vst [vmem:[%s3960_s17 + $0x400] sm:$0xff] %v2570_v12  ;;  %v2315_v43 = vadd.f32 1.0, %v3371_v1  ;;  %v527_v52 = vmul.f32 0.5, %v5010_v6  ;;  %v1554_v23 = vadd.f32 %v1298_v16, %v5049_v13  ;;  %v1299_v20 = vmul.f32 0.044715, %v1043_v34  ;;  %v5130_v1 = vld [vmem:[%s3837_s30 + $0x490] sm:$0xff] }
 0x167   : > { %v1300_v46 = vmul.f32 0.044715, %v1044_v2  ;;  %v1045_v59 = vmul.f32 %v789_v39, %v5069_v60  ;;  %v1046_v14 = vmul.f32 %v790_v41, %v5072_v44  ;;  %v791_v27 = vmul.f32 %v5081_v32, %v5081_v32  ;;  %v5137_v41 = vld [vmem:[%s3837_s30 + $0x498] sm:$0xff] }
 0x168   : > { %v2571_v21 = vmul.f32 %v2315_v43, %v523_v29  ;;  %v528_v17 = vmul.f32 0.5, %v5022_v57  ;;  %v1810_v26 = vmul.f32 0.7978846, %v1554_v23  ;;  %v1555_v6 = vadd.f32 %v1299_v20, %v5055_v40  ;;  %v5142_v20 = vld [vmem:[%s3837_s30 + $0x4a0] sm:$0xff] }
 0x169   : > { %v1556_v4 = vadd.f32 %v1300_v46, %v5060_v33  ;;  %v1301_v19 = vmul.f32 0.044715, %v1045_v59  ;;  %v1302_v15 = vmul.f32 0.044715, %v1046_v14  ;;  %v1047_v36 = vmul.f32 %v791_v27, %v5081_v32 }
 0x16a   : > { %v3373_v35 = vpop.eup %3372  ;;  %2827 = vst [vmem:[%s3960_s17 + $0x408] sm:$0xff] %v2571_v21  ;;  %v529_v56 = vmul.f32 0.5, %v5030_v51  ;;  %3384 = vtanh.f32 %v1810_v26  ;;  %v1811_v61 = vmul.f32 0.7978846, %v1555_v6  ;;  %v792_v45 = vmul.f32 %v5098_v10, %v5098_v10  ;;  %v5112_v51 = vld [vmem:[%s3837_s30 + $0x478] sm:$0xff] }
 0x16b   : > { %v3375_v57 = vpop.eup %3374  ;;  %v2316_v30 = vadd.f32 1.0, %v3373_v35  ;;  %v1812_v8 = vmul.f32 0.7978846, %v1556_v4  ;;  %v1557_v49 = vadd.f32 %v1301_v19, %v5069_v60  ;;  %v1558_v62 = vadd.f32 %v1302_v15, %v5072_v44  ;;  %v5160_v4 = vld [vmem:[%s3837_s30 + $0x4a8] sm:$0xff] }
 0x16c   : > { %v3377_v47 = vpop.eup %3376  ;;  %v2317_v54 = vadd.f32 1.0, %v3375_v57  ;;  %3386 = vtanh.f32 %v1811_v61  ;;  %v1303_v63 = vmul.f32 0.044715, %v1047_v36  ;;  %v1048_v25 = vmul.f32 %v792_v45, %v5098_v10 }
 0x16d   : > { %v3379_v38 = vpop.eup %3378  ;;  %v2572_v55 = vmul.f32 %v2316_v30, %v524_v7  ;;  %v2318_v22 = vadd.f32 1.0, %v3377_v47  ;;  %3388 = vtanh.f32 %v1812_v8  ;;  %v1813_v58 = vmul.f32 0.7978846, %v1557_v49 }
 0x16e   : > { %v2573_v53 = vmul.f32 %v2317_v54, %v525_v37  ;;  %v2319_v48 = vadd.f32 1.0, %v3379_v38  ;;  %v1814_v0 = vmul.f32 0.7978846, %v1558_v62  ;;  %v1559_v3 = vadd.f32 %v1303_v63, %v5081_v32 }
 0x16f   : > { %v3381_v9 = vpop.eup %3380  ;;  %2828 = vst [vmem:[%s3960_s17 + $0x410] sm:$0xff] %v2572_v55  ;;  %v2574_v42 = vmul.f32 %v2318_v22, %v526_v50  ;;  %3390 = vtanh.f32 %v1813_v58  ;;  %v1304_v29 = vmul.f32 0.044715, %v1048_v25  ;;  %v793_v5 = vmul.f32 %v5112_v51, %v5112_v51 }
 0x170   : > { %v3383_v24 = vpop.eup %3382  ;;  %2829 = vst [vmem:[%s3960_s17 + $0x418] sm:$0xff] %v2573_v53  ;;  %v2575_v28 = vmul.f32 %v2319_v48, %v527_v52  ;;  %v2320_v18 = vadd.f32 1.0, %v3381_v9  ;;  %3392 = vtanh.f32 %v1814_v0  ;;  %v1815_v7 = vmul.f32 0.7978846, %v1559_v3  ;;  %v5174_v9 = vld [vmem:[%s3837_s30 + $0x4b0] sm:$0xff] }
 0x171   : > { %2830 = vst [vmem:[%s3960_s17 + $0x420] sm:$0xff] %v2574_v42  ;;  %v2321_v12 = vadd.f32 1.0, %v3383_v24  ;;  %v530_v37 = vmul.f32 0.5, %v5049_v13  ;;  %v1560_v16 = vadd.f32 %v1304_v29, %v5098_v10  ;;  %v1049_v34 = vmul.f32 %v793_v5, %v5112_v51 }
 0x172   : > { %2831 = vst [vmem:[%s3960_s17 + $0x428] sm:$0xff] %v2575_v28  ;;  %v2576_v50 = vmul.f32 %v2320_v18, %v528_v17  ;;  %v531_v2 = vmul.f32 0.5, %v5055_v40  ;;  %3394 = vtanh.f32 %v1815_v7  ;;  %v794_v39 = vmul.f32 %v5119_v11, %v5119_v11 }
 0x173   : > { %v2577_v43 = vmul.f32 %v2321_v12, %v529_v56  ;;  %v1816_v52 = vmul.f32 0.7978846, %v1560_v16  ;;  %v1305_v13 = vmul.f32 0.044715, %v1049_v34  ;;  %v795_v23 = vmul.f32 %v5123_v31, %v5123_v31  ;;  %v5179_v12 = vld [vmem:[%s3837_s30 + $0x4b8] sm:$0xff] }
 0x174   : > { %2832 = vst [vmem:[%s3960_s17 + $0x430] sm:$0xff] %v2576_v50  ;;  %v532_v46 = vmul.f32 0.5, %v5060_v33  ;;  %v533_v40 = vmul.f32 0.5, %v5069_v60  ;;  %v1050_v59 = vmul.f32 %v794_v39, %v5119_v11  ;;  %v796_v14 = vmul.f32 %v5130_v1, %v5130_v1 }
 0x175   : > { %2833 = vst [vmem:[%s3960_s17 + $0x438] sm:$0xff] %v2577_v43  ;;  %3396 = vtanh.f32 %v1816_v52  ;;  %v1561_v27 = vadd.f32 %v1305_v13, %v5112_v51  ;;  %v1051_v21 = vmul.f32 %v795_v23, %v5123_v31  ;;  %v797_v17 = vmul.f32 %v5137_v41, %v5137_v41 }
 0x176   : > { %v534_v26 = vmul.f32 0.5, %v5072_v44  ;;  %v1306_v6 = vmul.f32 0.044715, %v1050_v59  ;;  %v1052_v33 = vmul.f32 %v796_v14, %v5130_v1  ;;  %v798_v60 = vmul.f32 %v5142_v20, %v5142_v20  ;;  %v5196_v59 = vld [vmem:[%s3837_s30 + $0x4c8] sm:$0xff] }
 0x177   : > { %v3385_v19 = vpop.eup %3384  ;;  %v535_v15 = vmul.f32 0.5, %v5081_v32  ;;  %v1817_v36 = vmul.f32 0.7978846, %v1561_v27  ;;  %v1307_v35 = vmul.f32 0.044715, %v1051_v21  ;;  %v1053_v56 = vmul.f32 %v797_v17, %v5137_v41 }
 0x178   : > { %v2322_v61 = vadd.f32 1.0, %v3385_v19  ;;  %v1562_v45 = vadd.f32 %v1306_v6, %v5119_v11  ;;  %v1308_v57 = vmul.f32 0.044715, %v1052_v33  ;;  %v1054_v44 = vmul.f32 %v798_v60, %v5142_v20  ;;  %v5207_v60 = vld [vmem:[%s3837_s30 + $0x4d8] sm:$0xff] }
 0x179   : > { %v3387_v30 = vpop.eup %3386  ;;  %3398 = vtanh.f32 %v1817_v36  ;;  %v1563_v8 = vadd.f32 %v1307_v35, %v5123_v31  ;;  %v1309_v49 = vmul.f32 0.044715, %v1053_v56  ;;  %v799_v62 = vmul.f32 %v5160_v4, %v5160_v4 }
 0x17a   : > { %v3389_v32 = vpop.eup %3388  ;;  %v2578_v47 = vmul.f32 %v2322_v61, %v530_v37  ;;  %v2323_v54 = vadd.f32 1.0, %v3387_v30  ;;  %v1818_v63 = vmul.f32 0.7978846, %v1562_v45  ;;  %v1564_v25 = vadd.f32 %v1308_v57, %v5130_v1 }
 0x17b   : > { %v2324_v38 = vadd.f32 1.0, %v3389_v32  ;;  %v1819_v55 = vmul.f32 0.7978846, %v1563_v8  ;;  %v1565_v22 = vadd.f32 %v1309_v49, %v5137_v41  ;;  %v1310_v58 = vmul.f32 0.044715, %v1054_v44 }
 0x17c   : > { %v3391_v53 = vpop.eup %3390  ;;  %2834 = vst [vmem:[%s3960_s17 + $0x440] sm:$0xff] %v2578_v47  ;;  %v2579_v48 = vmul.f32 %v2323_v54, %v531_v2  ;;  %3400 = vtanh.f32 %v1818_v63  ;;  %v1820_v0 = vmul.f32 0.7978846, %v1564_v25  ;;  %v1055_v3 = vmul.f32 %v799_v62, %v5160_v4  ;;  %v5186_v2 = vld [vmem:[%s3837_s30 + $0x4c0] sm:$0xff] }
 0x17d   : > { %v3393_v42 = vpop.eup %3392  ;;  %v2580_v29 = vmul.f32 %v2324_v38, %v532_v46  ;;  %v2325_v5 = vadd.f32 1.0, %v3391_v53  ;;  %3402 = vtanh.f32 %v1819_v55  ;;  %v1821_v24 = vmul.f32 0.7978846, %v1565_v22  ;;  %v5228_v25 = vld [vmem:[%s3837_s30 + $0x4e0] sm:$0xff] }
 0x17e   : > { %2835 = vst [vmem:[%s3960_s17 + $0x448] sm:$0xff] %v2579_v48  ;;  %v2326_v28 = vadd.f32 1.0, %v3393_v42  ;;  %3404 = vtanh.f32 %v1820_v0  ;;  %v1566_v18 = vadd.f32 %v1310_v58, %v5142_v20  ;;  %v1311_v7 = vmul.f32 0.044715, %v1055_v3 }
 0x17f   : > { %v3395_v37 = vpop.eup %3394  ;;  %2836 = vst [vmem:[%s3960_s17 + $0x450] sm:$0xff] %v2580_v29  ;;  %v2581_v16 = vmul.f32 %v2325_v5, %v533_v40  ;;  %v536_v34 = vmul.f32 0.5, %v5098_v10  ;;  %3406 = vtanh.f32 %v1821_v24  ;;  %v800_v50 = vmul.f32 %v5174_v9, %v5174_v9 }
 0x180   : > { %v2582_v39 = vmul.f32 %v2326_v28, %v534_v26  ;;  %v2327_v43 = vadd.f32 1.0, %v3395_v37  ;;  %v1822_v52 = vmul.f32 0.7978846, %v1566_v18  ;;  %v1567_v13 = vadd.f32 %v1311_v7, %v5160_v4 }
 0x181   : > { %2837 = vst [vmem:[%s3960_s17 + $0x458] sm:$0xff] %v2581_v16  ;;  %v537_v23 = vmul.f32 0.5, %v5112_v51  ;;  %v538_v46 = vmul.f32 0.5, %v5119_v11  ;;  %v1056_v10 = vmul.f32 %v800_v50, %v5174_v9  ;;  %v801_v40 = vmul.f32 %v5179_v12, %v5179_v12  ;;  %v5202_v51 = vld [vmem:[%s3837_s30 + $0x4d0] sm:$0xff]  ;;  %v5236_v16 = vld [vmem:[%s3837_s30 + $0x4e8] sm:$0xff] }
 0x182   : > { %v3397_v14 = vpop.eup %3396  ;;  %2838 = vst [vmem:[%s3960_s17 + $0x460] sm:$0xff] %v2582_v39  ;;  %v2583_v27 = vmul.f32 %v2327_v43, %v535_v15  ;;  %3408 = vtanh.f32 %v1822_v52  ;;  %v1823_v21 = vmul.f32 0.7978846, %v1567_v13  ;;  %v802_v17 = vmul.f32 %v5186_v2, %v5186_v2  ;;  %v5240_v52 = vld [vmem:[%s3837_s30 + $0x4f0] sm:$0xff] }
 0x183   : > { %v2328_v26 = vadd.f32 1.0, %v3397_v14  ;;  %v539_v11 = vmul.f32 0.5, %v5123_v31  ;;  %v1312_v6 = vmul.f32 0.044715, %v1056_v10  ;;  %v1057_v33 = vmul.f32 %v801_v40, %v5179_v12  ;;  %v5246_v10 = vld [vmem:[%s3837_s30 + $0x4f8] sm:$0xff] }
 0x184   : > { %2839 = vst [vmem:[%s3960_s17 + $0x468] sm:$0xff] %v2583_v27  ;;  %v540_v19 = vmul.f32 0.5, %v5130_v1  ;;  %3410 = vtanh.f32 %v1823_v21  ;;  %v1058_v15 = vmul.f32 %v802_v17, %v5186_v2  ;;  %v803_v36 = vmul.f32 %v5196_v59, %v5196_v59 }
 0x185   : > { %v2584_v35 = vmul.f32 %v2328_v26, %v536_v34  ;;  %v1568_v56 = vadd.f32 %v1312_v6, %v5174_v9  ;;  %v1313_v61 = vmul.f32 0.044715, %v1057_v33  ;;  %v804_v31 = vmul.f32 %v5202_v51, %v5202_v51  ;;  %v5256_v6 = vld [vmem:[%s3837_s30 + $0x500] sm:$0xff] }
 0x186   : > { %v3399_v45 = vpop.eup %3398  ;;  %v541_v57 = vmul.f32 0.5, %v5137_v41  ;;  %v1314_v44 = vmul.f32 0.044715, %v1058_v15  ;;  %v1059_v1 = vmul.f32 %v803_v36, %v5196_v59  ;;  %v805_v30 = vmul.f32 %v5207_v60, %v5207_v60 }
 0x187   : > { %2840 = vst [vmem:[%s3960_s17 + $0x470] sm:$0xff] %v2584_v35  ;;  %v2329_v8 = vadd.f32 1.0, %v3399_v45  ;;  %v1824_v49 = vmul.f32 0.7978846, %v1568_v56  ;;  %v1569_v62 = vadd.f32 %v1313_v61, %v5179_v12  ;;  %v1060_v32 = vmul.f32 %v804_v31, %v5202_v51  ;;  %v5266_v31 = vld [vmem:[%s3837_s30 + $0x508] sm:$0xff] }
 0x188   : > { %v542_v47 = vmul.f32 0.5, %v5142_v20  ;;  %v1570_v54 = vadd.f32 %v1314_v44, %v5186_v2  ;;  %v1315_v63 = vmul.f32 0.044715, %v1059_v1  ;;  %v1061_v41 = vmul.f32 %v805_v30, %v5207_v60  ;;  %v5273_v1 = vld [vmem:[%s3837_s30 + $0x510] sm:$0xff] }
 0x189   : > { %v3401_v38 = vpop.eup %3400  ;;  %v2585_v55 = vmul.f32 %v2329_v8, %v537_v23  ;;  %3412 = vtanh.f32 %v1824_v49  ;;  %v1825_v22 = vmul.f32 0.7978846, %v1569_v62  ;;  %v1316_v58 = vmul.f32 0.044715, %v1060_v32 }
 0x18a   : > { %v3403_v53 = vpop.eup %3402  ;;  %v2330_v48 = vadd.f32 1.0, %v3401_v38  ;;  %v1826_v0 = vmul.f32 0.7978846, %v1570_v54  ;;  %v1571_v3 = vadd.f32 %v1315_v63, %v5196_v59  ;;  %v1317_v20 = vmul.f32 0.044715, %v1061_v41 }
 0x18b   : > { %v3405_v42 = vpop.eup %3404  ;;  %2841 = vst [vmem:[%s3960_s17 + $0x478] sm:$0xff] %v2585_v55  ;;  %v2331_v29 = vadd.f32 1.0, %v3403_v53  ;;  %3414 = vtanh.f32 %v1825_v22  ;;  %v1572_v5 = vadd.f32 %v1316_v58, %v5202_v51  ;;  %v806_v24 = vmul.f32 %v5228_v25, %v5228_v25 }
 0x18c   : > { %v3407_v28 = vpop.eup %3406  ;;  %v2586_v18 = vmul.f32 %v2330_v48, %v538_v46  ;;  %v2332_v7 = vadd.f32 1.0, %v3405_v42  ;;  %3416 = vtanh.f32 %v1826_v0  ;;  %v1827_v37 = vmul.f32 0.7978846, %v1571_v3  ;;  %v5291_v42 = vld [vmem:[%s3837_s30 + $0x518] sm:$0xff] }
 0x18d   : > { %v2587_v34 = vmul.f32 %v2331_v29, %v539_v11  ;;  %v2333_v50 = vadd.f32 1.0, %v3407_v28  ;;  %v1828_v39 = vmul.f32 0.7978846, %v1572_v5  ;;  %v1573_v43 = vadd.f32 %v1317_v20, %v5207_v60 }
 0x18e   : > { %2842 = vst [vmem:[%s3960_s17 + $0x480] sm:$0xff] %v2586_v18  ;;  %v2588_v13 = vmul.f32 %v2332_v7, %v540_v19  ;;  %v543_v23 = vmul.f32 0.5, %v5160_v4  ;;  %3418 = vtanh.f32 %v1827_v37  ;;  %v1062_v46 = vmul.f32 %v806_v24, %v5228_v25 }
 0x18f   : > { %v3409_v40 = vpop.eup %3408  ;;  %2843 = vst [vmem:[%s3960_s17 + $0x488] sm:$0xff] %v2587_v34  ;;  %v2589_v14 = vmul.f32 %v2333_v50, %v541_v57  ;;  %3420 = vtanh.f32 %v1828_v39  ;;  %v1829_v27 = vmul.f32 0.7978846, %v1573_v43  ;;  %v807_v21 = vmul.f32 %v5236_v16, %v5236_v16  ;;  %v5298_v43 = vld [vmem:[%s3837_s30 + $0x520] sm:$0xff] }
 0x190   : > { %2844 = vst [vmem:[%s3960_s17 + $0x490] sm:$0xff] %v2588_v13  ;;  %v2334_v17 = vadd.f32 1.0, %v3409_v40  ;;  %v544_v26 = vmul.f32 0.5, %v5174_v9  ;;  %v1318_v4 = vmul.f32 0.044715, %v1062_v46  ;;  %v808_v11 = vmul.f32 %v5240_v52, %v5240_v52 }
 0x191   : > { %v3411_v33 = vpop.eup %3410  ;;  %2845 = vst [vmem:[%s3960_s17 + $0x498] sm:$0xff] %v2589_v14  ;;  %v545_v19 = vmul.f32 0.5, %v5179_v12  ;;  %3422 = vtanh.f32 %v1829_v27  ;;  %v1063_v15 = vmul.f32 %v807_v21, %v5236_v16  ;;  %v809_v36 = vmul.f32 %v5246_v10, %v5246_v10 }
 0x192   : > { %v2590_v35 = vmul.f32 %v2334_v17, %v542_v47  ;;  %v2335_v9 = vadd.f32 1.0, %v3411_v33  ;;  %v1574_v56 = vadd.f32 %v1318_v4, %v5228_v25  ;;  %v1064_v61 = vmul.f32 %v808_v11, %v5240_v52  ;;  %v5306_v4 = vld [vmem:[%s3837_s30 + $0x528] sm:$0xff] }
 0x193   : > { %v546_v45 = vmul.f32 0.5, %v5186_v2  ;;  %v1319_v57 = vmul.f32 0.044715, %v1063_v15  ;;  %v1065_v12 = vmul.f32 %v809_v36, %v5246_v10  ;;  %v810_v44 = vmul.f32 %v5256_v6, %v5256_v6 }
 0x194   : > { %2846 = vst [vmem:[%s3960_s17 + $0x4a0] sm:$0xff] %v2590_v35  ;;  %v2591_v30 = vmul.f32 %v2335_v9, %v543_v23  ;;  %v547_v8 = vmul.f32 0.5, %v5196_v59  ;;  %v1830_v49 = vmul.f32 0.7978846, %v1574_v56  ;;  %v1320_v62 = vmul.f32 0.044715, %v1064_v61 }
 0x195   : > { %v1575_v32 = vadd.f32 %v1319_v57, %v5236_v16  ;;  %v1321_v47 = vmul.f32 0.044715, %v1065_v12  ;;  %v1066_v54 = vmul.f32 %v810_v44, %v5256_v6  ;;  %v811_v2 = vmul.f32 %v5266_v31, %v5266_v31  ;;  %v5312_v56 = vld [vmem:[%s3837_s30 + $0x530] sm:$0xff]  ;;  %v5320_v12 = vld [vmem:[%s3837_s30 + $0x538] sm:$0xff]  ;;  %v5323_v44 = vld [vmem:[%s3837_s30 + $0x540] sm:$0xff] }
 0x196   : > { %v3413_v63 = vpop.eup %3412  ;;  %2847 = vst [vmem:[%s3960_s17 + $0x4a8] sm:$0xff] %v2591_v30  ;;  %v548_v41 = vmul.f32 0.5, %v5202_v51  ;;  %3424 = vtanh.f32 %v1830_v49  ;;  %v1576_v38 = vadd.f32 %v1320_v62, %v5240_v52  ;;  %v812_v59 = vmul.f32 %v5273_v1, %v5273_v1 }
 0x197   : > { %v2336_v55 = vadd.f32 1.0, %v3413_v63  ;;  %v1831_v22 = vmul.f32 0.7978846, %v1575_v32  ;;  %v1577_v58 = vadd.f32 %v1321_v47, %v5246_v10  ;;  %v1322_v53 = vmul.f32 0.044715, %v1066_v54 }
 0x198   : > { %v3415_v48 = vpop.eup %3414  ;;  %v549_v0 = vmul.f32 0.5, %v5207_v60  ;;  %v1832_v3 = vmul.f32 0.7978846, %v1576_v38  ;;  %v1067_v20 = vmul.f32 %v811_v2, %v5266_v31  ;;  %v1068_v51 = vmul.f32 %v812_v59, %v5273_v1 }
 0x199   : > { %v3417_v29 = vpop.eup %3416  ;;  %v2592_v5 = vmul.f32 %v2336_v55, %v544_v26  ;;  %v2337_v24 = vadd.f32 1.0, %v3415_v48  ;;  %3426 = vtanh.f32 %v1831_v22  ;;  %v1833_v28 = vmul.f32 0.7978846, %v1577_v58  ;;  %v5341_v22 = vld [vmem:[%s3837_s30 + $0x548] sm:$0xff] }
 0x19a   : > { %v2338_v18 = vadd.f32 1.0, %v3417_v29  ;;  %3428 = vtanh.f32 %v1832_v3  ;;  %v1578_v7 = vadd.f32 %v1322_v53, %v5256_v6  ;;  %v1323_v37 = vmul.f32 0.044715, %v1067_v20 }
 0x19b   : > { %v3419_v60 = vpop.eup %3418  ;;  %2848 = vst [vmem:[%s3960_s17 + $0x4b0] sm:$0xff] %v2592_v5  ;;  %v2593_v34 = vmul.f32 %v2337_v24, %v545_v19  ;;  %3430 = vtanh.f32 %v1833_v28  ;;  %v1324_v50 = vmul.f32 0.044715, %v1068_v51  ;;  %v813_v39 = vmul.f32 %v5291_v42, %v5291_v42 }
 0x19c   : > { %v3421_v13 = vpop.eup %3420  ;;  %v2594_v23 = vmul.f32 %v2338_v18, %v546_v45  ;;  %v2339_v46 = vadd.f32 1.0, %v3419_v60  ;;  %v1834_v40 = vmul.f32 0.7978846, %v1578_v7  ;;  %v1579_v14 = vadd.f32 %v1323_v37, %v5266_v31 }
 0x19d   : > { %2849 = vst [vmem:[%s3960_s17 + $0x4b8] sm:$0xff] %v2593_v34  ;;  %v2340_v27 = vadd.f32 1.0, %v3421_v13  ;;  %v550_v21 = vmul.f32 0.5, %v5228_v25  ;;  %v1580_v17 = vadd.f32 %v1324_v50, %v5273_v1  ;;  %v1069_v26 = vmul.f32 %v813_v39, %v5291_v42 }
 0x19e   : > { %v3423_v11 = vpop.eup %3422  ;;  %2850 = vst [vmem:[%s3960_s17 + $0x4c0] sm:$0xff] %v2594_v23  ;;  %v2595_v33 = vmul.f32 %v2339_v46, %v547_v8  ;;  %3432 = vtanh.f32 %v1834_v40  ;;  %v1835_v19 = vmul.f32 0.7978846, %v1579_v14  ;;  %v814_v15 = vmul.f32 %v5298_v43, %v5298_v43  ;;  %v5354_v23 = vld [vmem:[%s3837_s30 + $0x550] sm:$0xff] }
 0x19f   : > { %v2596_v36 = vmul.f32 %v2340_v27, %v548_v41  ;;  %v2341_v35 = vadd.f32 1.0, %v3423_v11  ;;  %v1836_v25 = vmul.f32 0.7978846, %v1580_v17  ;;  %v1325_v9 = vmul.f32 0.044715, %v1069_v26  ;;  %v5358_v27 = vld [vmem:[%s3837_s30 + $0x558] sm:$0xff] }
 0x1a0   : > { %2851 = vst [vmem:[%s3960_s17 + $0x4c8] sm:$0xff] %v2595_v33  ;;  %v551_v61 = vmul.f32 0.5, %v5236_v16  ;;  %3434 = vtanh.f32 %v1835_v19  ;;  %v1070_v45 = vmul.f32 %v814_v15, %v5298_v43  ;;  %v815_v57 = vmul.f32 %v5306_v4, %v5306_v4 }
 0x1a1   : > { %2852 = vst [vmem:[%s3960_s17 + $0x4d0] sm:$0xff] %v2596_v36  ;;  %v2597_v30 = vmul.f32 %v2341_v35, %v549_v0  ;;  %v552_v8 = vmul.f32 0.5, %v5240_v52  ;;  %3436 = vtanh.f32 %v1836_v25  ;;  %v1581_v49 = vadd.f32 %v1325_v9, %v5291_v42  ;;  %v5366_v35 = vld [vmem:[%s3837_s30 + $0x560] sm:$0xff] }
 0x1a2   : > { %v553_v16 = vmul.f32 0.5, %v5246_v10  ;;  %v1326_v62 = vmul.f32 0.044715, %v1070_v45  ;;  %v1071_v32 = vmul.f32 %v815_v57, %v5306_v4  ;;  %v816_v47 = vmul.f32 %v5312_v56, %v5312_v56  ;;  %v5374_v45 = vld [vmem:[%s3837_s30 + $0x568] sm:$0xff] }
 0x1a3   : > { %v3425_v54 = vpop.eup %3424  ;;  %2853 = vst [vmem:[%s3960_s17 + $0x4d8] sm:$0xff] %v2597_v30  ;;  %v554_v2 = vmul.f32 0.5, %v5256_v6  ;;  %v1837_v63 = vmul.f32 0.7978846, %v1581_v49  ;;  %v817_v52 = vmul.f32 %v5320_v12, %v5320_v12  ;;  %v818_v41 = vmul.f32 %v5323_v44, %v5323_v44 }
 0x1a4   : > { %v2342_v38 = vadd.f32 1.0, %v3425_v54  ;;  %v1582_v10 = vadd.f32 %v1326_v62, %v5298_v43  ;;  %v1327_v59 = vmul.f32 0.044715, %v1071_v32  ;;  %v1072_v55 = vmul.f32 %v816_v47, %v5312_v56  ;;  %v5382_v32 = vld [vmem:[%s3837_s30 + $0x570] sm:$0xff] }
 0x1a5   : > { %v555_v58 = vmul.f32 0.5, %v5266_v31  ;;  %3438 = vtanh.f32 %v1837_v63  ;;  %v1073_v6 = vmul.f32 %v817_v52, %v5320_v12  ;;  %v1074_v53 = vmul.f32 %v818_v41, %v5323_v44 }
 0x1a6   : > { %v3427_v48 = vpop.eup %3426  ;;  %v2598_v0 = vmul.f32 %v2342_v38, %v550_v21  ;;  %v1838_v3 = vmul.f32 0.7978846, %v1582_v10  ;;  %v1583_v20 = vadd.f32 %v1327_v59, %v5306_v4  ;;  %v1328_v51 = vmul.f32 0.044715, %v1072_v55  ;;  %v5390_v59 = vld [vmem:[%s3837_s30 + $0x578] sm:$0xff] }
 0x1a7   : > { %v3429_v29 = vpop.eup %3428  ;;  %v2343_v5 = vadd.f32 1.0, %v3427_v48  ;;  %v1329_v24 = vmul.f32 0.044715, %v1073_v6  ;;  %v1330_v28 = vmul.f32 0.044715, %v1074_v53  ;;  %v819_v18 = vmul.f32 %v5341_v22, %v5341_v22 }
 0x1a8   : > { %v3431_v31 = vpop.eup %3430  ;;  %2854 = vst [vmem:[%s3960_s17 + $0x4e0] sm:$0xff] %v2598_v0  ;;  %v2344_v7 = vadd.f32 1.0, %v3429_v29  ;;  %3440 = vtanh.f32 %v1838_v3  ;;  %v1839_v37 = vmul.f32 0.7978846, %v1583_v20  ;;  %v1584_v60 = vadd.f32 %v1328_v51, %v5312_v56 }
 0x1a9   : > { %v2599_v34 = vmul.f32 %v2343_v5, %v551_v61  ;;  %v2345_v50 = vadd.f32 1.0, %v3431_v31  ;;  %v1585_v39 = vadd.f32 %v1329_v24, %v5320_v12  ;;  %v1586_v13 = vadd.f32 %v1330_v28, %v5323_v44  ;;  %v5405_v5 = vld [vmem:[%s3837_s30 + $0x580] sm:$0xff] }
 0x1aa   : > { %v2600_v46 = vmul.f32 %v2344_v7, %v552_v8  ;;  %3442 = vtanh.f32 %v1839_v37  ;;  %v1840_v40 = vmul.f32 0.7978846, %v1584_v60  ;;  %v1075_v14 = vmul.f32 %v819_v18, %v5341_v22 }
 0x1ab   : > { %v3433_v21 = vpop.eup %3432  ;;  %2855 = vst [vmem:[%s3960_s17 + $0x4e8] sm:$0xff] %v2599_v34  ;;  %v2601_v17 = vmul.f32 %v2345_v50, %v553_v16  ;;  %v556_v26 = vmul.f32 0.5, %v5273_v1  ;;  %v1841_v11 = vmul.f32 0.7978846, %v1585_v39  ;;  %v1842_v33 = vmul.f32 0.7978846, %v1586_v13 }
 0x1ac   : > { %2856 = vst [vmem:[%s3960_s17 + $0x4f0] sm:$0xff] %v2600_v46  ;;  %v2346_v19 = vadd.f32 1.0, %v3433_v21  ;;  %3444 = vtanh.f32 %v1840_v40  ;;  %v1331_v15 = vmul.f32 0.044715, %v1075_v14  ;;  %v820_v36 = vmul.f32 %v5354_v23, %v5354_v23 }
 0x1ad   : > { %v3435_v25 = vpop.eup %3434  ;;  %2857 = vst [vmem:[%s3960_s17 + $0x4f8] sm:$0xff] %v2601_v17  ;;  %v557_v9 = vmul.f32 0.5, %v5291_v42  ;;  %v558_v61 = vmul.f32 0.5, %v5298_v43  ;;  %3446 = vtanh.f32 %v1841_v11  ;;  %v821_v1 = vmul.f32 %v5358_v27, %v5358_v27 }
 0x1ae   : > { %v3437_v57 = vpop.eup %3436  ;;  %v2602_v30 = vmul.f32 %v2346_v19, %v554_v2  ;;  %v2347_v8 = vadd.f32 1.0, %v3435_v25  ;;  %3448 = vtanh.f32 %v1842_v33  ;;  %v1587_v49 = vadd.f32 %v1331_v15, %v5341_v22  ;;  %v5417_v19 = vld [vmem:[%s3837_s30 + $0x588] sm:$0xff] }
 0x1af   : > { %v2348_v16 = vadd.f32 1.0, %v3437_v57  ;;  %v1076_v62 = vmul.f32 %v820_v36, %v5354_v23  ;;  %v1077_v42 = vmul.f32 %v821_v1, %v5358_v27  ;;  %v822_v43 = vmul.f32 %v5366_v35, %v5366_v35 }
 0x1b0   : > { %2858 = vst [vmem:[%s3960_s17 + $0x500] sm:$0xff] %v2602_v30  ;;  %v2603_v47 = vmul.f32 %v2347_v8, %v555_v58  ;;  %v559_v54 = vmul.f32 0.5, %v5306_v4  ;;  %v1843_v2 = vmul.f32 0.7978846, %v1587_v49  ;;  %v823_v63 = vmul.f32 %v5374_v45, %v5374_v45  ;;  %v5423_v8 = vld [vmem:[%s3837_s30 + $0x590] sm:$0xff] }
 0x1b1   : > { %v2604_v52 = vmul.f32 %v2348_v16, %v556_v26  ;;  %v1332_v41 = vmul.f32 0.044715, %v1076_v62  ;;  %v1333_v38 = vmul.f32 0.044715, %v1077_v42  ;;  %v1078_v10 = vmul.f32 %v822_v43, %v5366_v35  ;;  %v5430_v42 = vld [vmem:[%s3837_s30 + $0x598] sm:$0xff] }
 0x1b2   : > { %v3439_v55 = vpop.eup %3438  ;;  %2859 = vst [vmem:[%s3960_s17 + $0x508] sm:$0xff] %v2603_v47  ;;  %v560_v6 = vmul.f32 0.5, %v5312_v56  ;;  %3450 = vtanh.f32 %v1843_v2  ;;  %v1079_v58 = vmul.f32 %v823_v63, %v5374_v45  ;;  %v824_v4 = vmul.f32 %v5382_v32, %v5382_v32  ;;  %v5434_v2 = vld [vmem:[%s3837_s30 + $0x5a0] sm:$0xff] }
 0x1b3   : > { %2860 = vst [vmem:[%s3960_s17 + $0x510] sm:$0xff] %v2604_v52  ;;  %v2349_v53 = vadd.f32 1.0, %v3439_v55  ;;  %v1588_v48 = vadd.f32 %v1332_v41, %v5354_v23  ;;  %v1589_v0 = vadd.f32 %v1333_v38, %v5358_v27  ;;  %v1334_v3 = vmul.f32 0.044715, %v1078_v10  ;;  %v5442_v38 = vld [vmem:[%s3837_s30 + $0x5a8] sm:$0xff] }
 0x1b4   : > { %v561_v20 = vmul.f32 0.5, %v5320_v12  ;;  %v1335_v51 = vmul.f32 0.044715, %v1079_v58  ;;  %v1080_v29 = vmul.f32 %v824_v4, %v5382_v32  ;;  %v825_v56 = vmul.f32 %v5390_v59, %v5390_v59 }
 0x1b5   : > { %v3441_v24 = vpop.eup %3440  ;;  %v2605_v28 = vmul.f32 %v2349_v53, %v557_v9  ;;  %v1844_v18 = vmul.f32 0.7978846, %v1588_v48  ;;  %v1845_v31 = vmul.f32 0.7978846, %v1589_v0  ;;  %v1590_v7 = vadd.f32 %v1334_v3, %v5366_v35  ;;  %v5453_v0 = vld [vmem:[%s3837_s30 + $0x5b0] sm:$0xff] }
 0x1b6   : > { %v2350_v37 = vadd.f32 1.0, %v3441_v24  ;;  %v1591_v60 = vadd.f32 %v1335_v51, %v5374_v45  ;;  %v1336_v34 = vmul.f32 0.044715, %v1080_v29  ;;  %v1081_v12 = vmul.f32 %v825_v56, %v5390_v59 }
 0x1b7   : > { %v3443_v50 = vpop.eup %3442  ;;  %2861 = vst [vmem:[%s3960_s17 + $0x518] sm:$0xff] %v2605_v28  ;;  %v562_v39 = vmul.f32 0.5, %v5323_v44  ;;  %3452 = vtanh.f32 %v1844_v18  ;;  %v1846_v13 = vmul.f32 0.7978846, %v1590_v7  ;;  %v826_v46 = vmul.f32 %v5405_v5, %v5405_v5 }
 0x1b8   : > { %v2606_v40 = vmul.f32 %v2350_v37, %v558_v61  ;;  %v2351_v14 = vadd.f32 1.0, %v3443_v50  ;;  %3454 = vtanh.f32 %v1845_v31  ;;  %v1847_v21 = vmul.f32 0.7978846, %v1591_v60 }
 0x1b9   : > { %v3445_v17 = vpop.eup %3444  ;;  %3456 = vtanh.f32 %v1846_v13  ;;  %v1592_v26 = vadd.f32 %v1336_v34, %v5382_v32  ;;  %v1337_v11 = vmul.f32 0.044715, %v1081_v12  ;;  %v1082_v33 = vmul.f32 %v826_v46, %v5405_v5 }
 0x1ba   : > { %v3447_v44 = vpop.eup %3446  ;;  %2862 = vst [vmem:[%s3960_s17 + $0x520] sm:$0xff] %v2606_v40  ;;  %v2607_v15 = vmul.f32 %v2351_v14, %v559_v54  ;;  %v2352_v36 = vadd.f32 1.0, %v3445_v17  ;;  %v563_v25 = vmul.f32 0.5, %v5341_v22  ;;  %3458 = vtanh.f32 %v1847_v21 }
 0x1bb   : > { %v3449_v9 = vpop.eup %3448  ;;  %v2353_v61 = vadd.f32 1.0, %v3447_v44  ;;  %v1848_v1 = vmul.f32 0.7978846, %v1592_v26  ;;  %v1593_v57 = vadd.f32 %v1337_v11, %v5390_v59  ;;  %v1338_v30 = vmul.f32 0.044715, %v1082_v33 }
 0x1bc   : > { %2863 = vst [vmem:[%s3960_s17 + $0x528] sm:$0xff] %v2607_v15  ;;  %v2608_v49 = vmul.f32 %v2352_v36, %v560_v6  ;;  %v2354_v16 = vadd.f32 1.0, %v3449_v9  ;;  %v564_v62 = vmul.f32 0.5, %v5354_v23  ;;  %v827_v22 = vmul.f32 %v5417_v19, %v5417_v19  ;;  %v5473_v15 = vld [vmem:[%s3837_s30 + $0x5b8] sm:$0xff] }
 0x1bd   : > { %v2609_v43 = vmul.f32 %v2353_v61, %v561_v20  ;;  %3460 = vtanh.f32 %v1848_v1  ;;  %v1849_v47 = vmul.f32 0.7978846, %v1593_v57  ;;  %v1594_v54 = vadd.f32 %v1338_v30, %v5405_v5  ;;  %v5476_v61 = vld [vmem:[%s3837_s30 + $0x5c0] sm:$0xff] }
 0x1be   : > { %2864 = vst [vmem:[%s3960_s17 + $0x530] sm:$0xff] %v2608_v49  ;;  %v2610_v63 = vmul.f32 %v2354_v16, %v562_v39  ;;  %v565_v52 = vmul.f32 0.5, %v5358_v27  ;;  %v1083_v23 = vmul.f32 %v827_v22, %v5417_v19  ;;  %v828_v41 = vmul.f32 %v5423_v8, %v5423_v8  ;;  %v5480_v49 = vld [vmem:[%s3837_s30 + $0x5c8] sm:$0xff] }
 0x1bf   : > { %v3451_v10 = vpop.eup %3450  ;;  %2865 = vst [vmem:[%s3960_s17 + $0x538] sm:$0xff] %v2609_v43  ;;  %v566_v55 = vmul.f32 0.5, %v5366_v35  ;;  %3462 = vtanh.f32 %v1849_v47  ;;  %v1850_v6 = vmul.f32 0.7978846, %v1594_v54  ;;  %v829_v58 = vmul.f32 %v5430_v42, %v5430_v42 }
 0x1c0   : > { %2866 = vst [vmem:[%s3960_s17 + $0x540] sm:$0xff] %v2610_v63  ;;  %v2355_v4 = vadd.f32 1.0, %v3451_v10  ;;  %v1339_v53 = vmul.f32 0.044715, %v1083_v23  ;;  %v1084_v27 = vmul.f32 %v828_v41, %v5423_v8  ;;  %v830_v48 = vmul.f32 %v5434_v2, %v5434_v2 }
 0x1c1   : > { %v567_v3 = vmul.f32 0.5, %v5374_v45  ;;  %3464 = vtanh.f32 %v1850_v6  ;;  %v1085_v35 = vmul.f32 %v829_v58, %v5430_v42  ;;  %v831_v20 = vmul.f32 %v5442_v38, %v5442_v38 }
 0x1c2   : > { %v2611_v51 = vmul.f32 %v2355_v4, %v563_v25  ;;  %v1595_v29 = vadd.f32 %v1339_v53, %v5417_v19  ;;  %v1340_v56 = vmul.f32 0.044715, %v1084_v27  ;;  %v1086_v24 = vmul.f32 %v830_v48, %v5434_v2  ;;  %v5501_v27 = vld [vmem:[%s3837_s30 + $0x5d8] sm:$0xff] }
 0x1c3   : > { %v568_v28 = vmul.f32 0.5, %v5382_v32  ;;  %v1341_v18 = vmul.f32 0.044715, %v1085_v35  ;;  %v1087_v31 = vmul.f32 %v831_v20, %v5442_v38  ;;  %v832_v45 = vmul.f32 %v5453_v0, %v5453_v0  ;;  %v5508_v20 = vld [vmem:[%s3837_s30 + $0x5e0] sm:$0xff] }
 0x1c4   : > { %v3453_v7 = vpop.eup %3452  ;;  %2867 = vst [vmem:[%s3960_s17 + $0x548] sm:$0xff] %v2611_v51  ;;  %v569_v37 = vmul.f32 0.5, %v5390_v59  ;;  %v1851_v60 = vmul.f32 0.7978846, %v1595_v29  ;;  %v1596_v34 = vadd.f32 %v1340_v56, %v5423_v8  ;;  %v1342_v12 = vmul.f32 0.044715, %v1086_v24 }
 0x1c5   : > { %v3455_v50 = vpop.eup %3454  ;;  %v2356_v39 = vadd.f32 1.0, %v3453_v7  ;;  %v1597_v13 = vadd.f32 %v1341_v18, %v5430_v42  ;;  %v1343_v32 = vmul.f32 0.044715, %v1087_v31  ;;  %v1088_v46 = vmul.f32 %v832_v45, %v5453_v0  ;;  %v5516_v31 = vld [vmem:[%s3837_s30 + $0x5e8] sm:$0xff] }
 0x1c6   : > { %v3457_v40 = vpop.eup %3456  ;;  %v2357_v14 = vadd.f32 1.0, %v3455_v50  ;;  %3466 = vtanh.f32 %v1851_v60  ;;  %v1852_v21 = vmul.f32 0.7978846, %v1596_v34  ;;  %v1598_v59 = vadd.f32 %v1342_v12, %v5434_v2 }
 0x1c7   : > { %v3459_v17 = vpop.eup %3458  ;;  %v2612_v26 = vmul.f32 %v2356_v39, %v564_v62  ;;  %v2358_v11 = vadd.f32 1.0, %v3457_v40  ;;  %v1853_v33 = vmul.f32 0.7978846, %v1597_v13  ;;  %v1599_v44 = vadd.f32 %v1343_v32, %v5442_v38 }
 0x1c8   : > { %v2613_v36 = vmul.f32 %v2357_v14, %v565_v52  ;;  %v2359_v25 = vadd.f32 1.0, %v3459_v17  ;;  %3468 = vtanh.f32 %v1852_v21  ;;  %v1854_v9 = vmul.f32 0.7978846, %v1598_v59  ;;  %v5491_v52 = vld [vmem:[%s3837_s30 + $0x5d0] sm:$0xff] }
 0x1c9   : > { %2868 = vst [vmem:[%s3960_s17 + $0x550] sm:$0xff] %v2612_v26  ;;  %v2614_v1 = vmul.f32 %v2358_v11, %v566_v55  ;;  %3470 = vtanh.f32 %v1853_v33  ;;  %v1855_v57 = vmul.f32 0.7978846, %v1599_v44  ;;  %v1344_v30 = vmul.f32 0.044715, %v1088_v46 }
 0x1ca   : > { %v3461_v16 = vpop.eup %3460  ;;  %2869 = vst [vmem:[%s3960_s17 + $0x558] sm:$0xff] %v2613_v36  ;;  %v2615_v62 = vmul.f32 %v2359_v25, %v567_v3  ;;  %v570_v22 = vmul.f32 0.5, %v5405_v5  ;;  %3472 = vtanh.f32 %v1854_v9  ;;  %v833_v43 = vmul.f32 %v5473_v15, %v5473_v15 }
 0x1cb   : > { %2870 = vst [vmem:[%s3960_s17 + $0x560] sm:$0xff] %v2614_v1  ;;  %v2360_v47 = vadd.f32 1.0, %v3461_v16  ;;  %3474 = vtanh.f32 %v1855_v57  ;;  %v1600_v54 = vadd.f32 %v1344_v30, %v5453_v0  ;;  %v834_v63 = vmul.f32 %v5476_v61, %v5476_v61 }
 0x1cc   : > { %v3463_v23 = vpop.eup %3462  ;;  %2871 = vst [vmem:[%s3960_s17 + $0x568] sm:$0xff] %v2615_v62  ;;  %v571_v5 = vmul.f32 0.5, %v5417_v19  ;;  %v572_v41 = vmul.f32 0.5, %v5423_v8  ;;  %v1089_v10 = vmul.f32 %v833_v43, %v5473_v15  ;;  %v835_v55 = vmul.f32 %v5480_v49, %v5480_v49  ;;  %v5535_v62 = vld [vmem:[%s3837_s30 + $0x5f0] sm:$0xff] }
 0x1cd   : > { %v2616_v6 = vmul.f32 %v2360_v47, %v568_v28  ;;  %v2361_v58 = vadd.f32 1.0, %v3463_v23  ;;  %v1856_v4 = vmul.f32 0.7978846, %v1600_v54  ;;  %v1090_v53 = vmul.f32 %v834_v63, %v5476_v61  ;;  %v5540_v63 = vld [vmem:[%s3837_s30 + $0x5f8] sm:$0xff] }
 0x1ce   : > { %v3465_v48 = vpop.eup %3464  ;;  %v573_v3 = vmul.f32 0.5, %v5430_v42  ;;  %v1345_v19 = vmul.f32 0.044715, %v1089_v10  ;;  %v1091_v8 = vmul.f32 %v835_v55, %v5480_v49  ;;  %v836_v35 = vmul.f32 %v5491_v52, %v5491_v52 }
 0x1cf   : > { %2872 = vst [vmem:[%s3960_s17 + $0x570] sm:$0xff] %v2616_v6  ;;  %v2617_v51 = vmul.f32 %v2361_v58, %v569_v37  ;;  %v2362_v29 = vadd.f32 1.0, %v3465_v48  ;;  %3476 = vtanh.f32 %v1856_v4  ;;  %v1346_v56 = vmul.f32 0.044715, %v1090_v53  ;;  %v5543_v6 = vld [vmem:[%s3837_s30 + $0x600] sm:$0xff]  ;;  %v5551_v53 = vld [vmem:[%s3837_s30 + $0x608] sm:$0xff] }
 0x1d0   : > { %v1601_v24 = vadd.f32 %v1345_v19, %v5473_v15  ;;  %v1347_v28 = vmul.f32 0.044715, %v1091_v8  ;;  %v1092_v18 = vmul.f32 %v836_v35, %v5491_v52  ;;  %v837_v42 = vmul.f32 %v5501_v27, %v5501_v27 }
 0x1d1   : > { %2873 = vst [vmem:[%s3960_s17 + $0x578] sm:$0xff] %v2617_v51  ;;  %v2618_v45 = vmul.f32 %v2362_v29, %v570_v22  ;;  %v574_v7 = vmul.f32 0.5, %v5434_v2  ;;  %v1602_v37 = vadd.f32 %v1346_v56, %v5476_v61  ;;  %v838_v60 = vmul.f32 %v5508_v20, %v5508_v20  ;;  %v5562_v29 = vld [vmem:[%s3837_s30 + $0x610] sm:$0xff] }
 0x1d2   : > { %v1857_v34 = vmul.f32 0.7978846, %v1601_v24  ;;  %v1603_v12 = vadd.f32 %v1347_v28, %v5480_v49  ;;  %v1348_v50 = vmul.f32 0.044715, %v1092_v18  ;;  %v1093_v39 = vmul.f32 %v837_v42, %v5501_v27  ;;  %v5570_v18 = vld [vmem:[%s3837_s30 + $0x618] sm:$0xff] }
 0x1d3   : > { %v3467_v13 = vpop.eup %3466  ;;  %2874 = vst [vmem:[%s3960_s17 + $0x580] sm:$0xff] %v2618_v45  ;;  %v575_v32 = vmul.f32 0.5, %v5442_v38  ;;  %v1858_v46 = vmul.f32 0.7978846, %v1602_v37  ;;  %v1094_v40 = vmul.f32 %v838_v60, %v5508_v20  ;;  %v839_v2 = vmul.f32 %v5516_v31, %v5516_v31 }
 0x1d4   : > { %v2363_v14 = vadd.f32 1.0, %v3467_v13  ;;  %3478 = vtanh.f32 %v1857_v34  ;;  %v1859_v21 = vmul.f32 0.7978846, %v1603_v12  ;;  %v1604_v59 = vadd.f32 %v1348_v50, %v5491_v52 }
 0x1d5   : > { %v3469_v17 = vpop.eup %3468  ;;  %3480 = vtanh.f32 %v1858_v46  ;;  %v1349_v26 = vmul.f32 0.044715, %v1093_v39  ;;  %v1350_v11 = vmul.f32 0.044715, %v1094_v40  ;;  %v1095_v33 = vmul.f32 %v839_v2, %v5516_v31 }
 0x1d6   : > { %v3471_v38 = vpop.eup %3470  ;;  %v2619_v44 = vmul.f32 %v2363_v14, %v571_v5  ;;  %v2364_v36 = vadd.f32 1.0, %v3469_v17  ;;  %3482 = vtanh.f32 %v1859_v21  ;;  %v1860_v25 = vmul.f32 0.7978846, %v1604_v59 }
 0x1d7   : > { %v3473_v9 = vpop.eup %3472  ;;  %v2365_v1 = vadd.f32 1.0, %v3471_v38  ;;  %v1605_v57 = vadd.f32 %v1349_v26, %v5501_v27  ;;  %v1606_v30 = vadd.f32 %v1350_v11, %v5508_v20  ;;  %v1351_v16 = vmul.f32 0.044715, %v1095_v33 }
 0x1d8   : > { %v3475_v22 = vpop.eup %3474  ;;  %2875 = vst [vmem:[%s3960_s17 + $0x588] sm:$0xff] %v2619_v44  ;;  %v2620_v43 = vmul.f32 %v2364_v36, %v572_v41  ;;  %v2366_v47 = vadd.f32 1.0, %v3473_v9  ;;  %v576_v54 = vmul.f32 0.5, %v5453_v0  ;;  %3484 = vtanh.f32 %v1860_v25  ;;  %v5589_v9 = vld [vmem:[%s3837_s30 + $0x620] sm:$0xff] }
 0x1d9   : > { %v2621_v23 = vmul.f32 %v2365_v1, %v573_v3  ;;  %v2367_v5 = vadd.f32 1.0, %v3475_v22  ;;  %v1861_v10 = vmul.f32 0.7978846, %v1605_v57  ;;  %v1862_v55 = vmul.f32 0.7978846, %v1606_v30  ;;  %v5593_v22 = vld [vmem:[%s3837_s30 + $0x628] sm:$0xff] }
 0x1da   : > { %2876 = vst [vmem:[%s3960_s17 + $0x590] sm:$0xff] %v2620_v43  ;;  %v2622_v58 = vmul.f32 %v2366_v47, %v574_v7  ;;  %v577_v4 = vmul.f32 0.5, %v5473_v15  ;;  %v1607_v41 = vadd.f32 %v1351_v16, %v5516_v31  ;;  %v840_v0 = vmul.f32 %v5535_v62, %v5535_v62 }
 0x1db   : > { %2877 = vst [vmem:[%s3960_s17 + $0x598] sm:$0xff] %v2621_v23  ;;  %v2623_v48 = vmul.f32 %v2367_v5, %v575_v32  ;;  %v578_v3 = vmul.f32 0.5, %v5476_v61  ;;  %3486 = vtanh.f32 %v1861_v10  ;;  %v841_v19 = vmul.f32 %v5540_v63, %v5540_v63  ;;  %v5597_v23 = vld [vmem:[%s3837_s30 + $0x630] sm:$0xff] }
 0x1dc   : > { %v3477_v8 = vpop.eup %3476  ;;  %2878 = vst [vmem:[%s3960_s17 + $0x5a0] sm:$0xff] %v2622_v58  ;;  %3488 = vtanh.f32 %v1862_v55  ;;  %v1863_v15 = vmul.f32 0.7978846, %v1607_v41  ;;  %v1096_v35 = vmul.f32 %v840_v0, %v5535_v62  ;;  %v842_v51 = vmul.f32 %v5543_v6, %v5543_v6 }
 0x1dd   : > { %2879 = vst [vmem:[%s3960_s17 + $0x5a8] sm:$0xff] %v2623_v48  ;;  %v2368_v56 = vadd.f32 1.0, %v3477_v8  ;;  %v579_v24 = vmul.f32 0.5, %v5480_v49  ;;  %v1097_v61 = vmul.f32 %v841_v19, %v5540_v63  ;;  %v843_v28 = vmul.f32 %v5551_v53, %v5551_v53 }
 0x1de   : > { %v580_v42 = vmul.f32 0.5, %v5491_v52  ;;  %3490 = vtanh.f32 %v1863_v15  ;;  %v1352_v45 = vmul.f32 0.044715, %v1096_v35  ;;  %v1098_v7 = vmul.f32 %v842_v51, %v5543_v6 }
 0x1df   : > { %v2624_v37 = vmul.f32 %v2368_v56, %v576_v54  ;;  %v1353_v60 = vmul.f32 0.044715, %v1097_v61  ;;  %v1099_v34 = vmul.f32 %v843_v28, %v5551_v53  ;;  %v844_v49 = vmul.f32 %v5562_v29, %v5562_v29 }
 0x1e0   : > { %v581_v12 = vmul.f32 0.5, %v5501_v27  ;;  %v1608_v50 = vadd.f32 %v1352_v45, %v5535_v62  ;;  %v1354_v39 = vmul.f32 0.044715, %v1098_v7  ;;  %v845_v13 = vmul.f32 %v5570_v18, %v5570_v18  ;;  %v5621_v7 = vld [vmem:[%s3837_s30 + $0x640] sm:$0xff] }
 0x1e1   : > { %v3479_v52 = vpop.eup %3478  ;;  %2880 = vst [vmem:[%s3960_s17 + $0x5b0] sm:$0xff] %v2624_v37  ;;  %v582_v32 = vmul.f32 0.5, %v5508_v20  ;;  %v1609_v46 = vadd.f32 %v1353_v60, %v5540_v63  ;;  %v1355_v40 = vmul.f32 0.044715, %v1099_v34  ;;  %v1100_v2 = vmul.f32 %v844_v49, %v5562_v29 }
 0x1e2   : > { %v3481_v14 = vpop.eup %3480  ;;  %v2369_v21 = vadd.f32 1.0, %v3479_v52  ;;  %v1864_v59 = vmul.f32 0.7978846, %v1608_v50  ;;  %v1610_v27 = vadd.f32 %v1354_v39, %v5543_v6  ;;  %v1101_v17 = vmul.f32 %v845_v13, %v5570_v18  ;;  %v5631_v13 = vld [vmem:[%s3837_s30 + $0x650] sm:$0xff] }
 0x1e3   : > { %v3483_v26 = vpop.eup %3482  ;;  %v2370_v11 = vadd.f32 1.0, %v3481_v14  ;;  %v1865_v33 = vmul.f32 0.7978846, %v1609_v46  ;;  %v1611_v20 = vadd.f32 %v1355_v40, %v5551_v53  ;;  %v1356_v38 = vmul.f32 0.044715, %v1100_v2 }
 0x1e4   : > { %v2625_v44 = vmul.f32 %v2369_v21, %v577_v4  ;;  %v2371_v36 = vadd.f32 1.0, %v3483_v26  ;;  %3492 = vtanh.f32 %v1864_v59  ;;  %v1866_v25 = vmul.f32 0.7978846, %v1610_v27 }
 0x1e5   : > { %v3485_v1 = vpop.eup %3484  ;;  %v2626_v57 = vmul.f32 %v2370_v11, %v578_v3  ;;  %3494 = vtanh.f32 %v1865_v33  ;;  %v1867_v30 = vmul.f32 0.7978846, %v1611_v20  ;;  %v1612_v16 = vadd.f32 %v1356_v38, %v5562_v29  ;;  %v5609_v3 = vld [vmem:[%s3837_s30 + $0x638] sm:$0xff] }
 0x1e6   : > { %2881 = vst [vmem:[%s3960_s17 + $0x5b8] sm:$0xff] %v2625_v44  ;;  %v2627_v43 = vmul.f32 %v2371_v36, %v579_v24  ;;  %v2372_v47 = vadd.f32 1.0, %v3485_v1  ;;  %3496 = vtanh.f32 %v1866_v25  ;;  %v1357_v54 = vmul.f32 0.044715, %v1101_v17 }
 0x1e7   : > { %2882 = vst [vmem:[%s3960_s17 + $0x5c0] sm:$0xff] %v2626_v57  ;;  %v583_v5 = vmul.f32 0.5, %v5516_v31  ;;  %3498 = vtanh.f32 %v1867_v30  ;;  %v1868_v10 = vmul.f32 0.7978846, %v1612_v16  ;;  %v846_v55 = vmul.f32 %v5589_v9, %v5589_v9 }
 0x1e8   : > { %v3487_v58 = vpop.eup %3486  ;;  %2883 = vst [vmem:[%s3960_s17 + $0x5c8] sm:$0xff] %v2627_v43  ;;  %v2628_v4 = vmul.f32 %v2372_v47, %v580_v42  ;;  %v584_v41 = vmul.f32 0.5, %v5535_v62  ;;  %v1613_v0 = vadd.f32 %v1357_v54, %v5570_v18  ;;  %v847_v48 = vmul.f32 %v5593_v22, %v5593_v22 }
 0x1e9   : > { %v3489_v31 = vpop.eup %3488  ;;  %v2373_v19 = vadd.f32 1.0, %v3487_v58  ;;  %3500 = vtanh.f32 %v1868_v10  ;;  %v1102_v8 = vmul.f32 %v846_v55, %v5589_v9  ;;  %v848_v15 = vmul.f32 %v5597_v23, %v5597_v23  ;;  %v5651_v10 = vld [vmem:[%s3837_s30 + $0x658] sm:$0xff] }
 0x1ea   : > { %2884 = vst [vmem:[%s3960_s17 + $0x5d0] sm:$0xff] %v2628_v4  ;;  %v2374_v62 = vadd.f32 1.0, %v3489_v31  ;;  %v585_v35 = vmul.f32 0.5, %v5540_v63  ;;  %v1869_v51 = vmul.f32 0.7978846, %v1613_v0  ;;  %v1103_v56 = vmul.f32 %v847_v48, %v5593_v22  ;;  %v5624_v63 = vld [vmem:[%s3837_s30 + $0x648] sm:$0xff] }
 0x1eb   : > { %v3491_v24 = vpop.eup %3490  ;;  %v2629_v61 = vmul.f32 %v2373_v19, %v581_v12  ;;  %v1358_v28 = vmul.f32 0.044715, %v1102_v8  ;;  %v1104_v42 = vmul.f32 %v848_v15, %v5597_v23  ;;  %v849_v45 = vmul.f32 %v5609_v3, %v5609_v3  ;;  %v5655_v0 = vld [vmem:[%s3837_s30 + $0x660] sm:$0xff] }
 0x1ec   : > { %v2630_v37 = vmul.f32 %v2374_v62, %v582_v32  ;;  %v2375_v60 = vadd.f32 1.0, %v3491_v24  ;;  %3502 = vtanh.f32 %v1869_v51  ;;  %v1359_v34 = vmul.f32 0.044715, %v1103_v56  ;;  %v5664_v56 = vld [vmem:[%s3837_s30 + $0x668] sm:$0xff] }
 0x1ed   : > { %2885 = vst [vmem:[%s3960_s17 + $0x5d8] sm:$0xff] %v2629_v61  ;;  %v586_v49 = vmul.f32 0.5, %v5543_v6  ;;  %v1614_v12 = vadd.f32 %v1358_v28, %v5589_v9  ;;  %v1360_v50 = vmul.f32 0.044715, %v1104_v42  ;;  %v1105_v39 = vmul.f32 %v849_v45, %v5609_v3  ;;  %v5671_v28 = vld [vmem:[%s3837_s30 + $0x670] sm:$0xff] }
 0x1ee   : > { %2886 = vst [vmem:[%s3960_s17 + $0x5e0] sm:$0xff] %v2630_v37  ;;  %v2631_v52 = vmul.f32 %v2375_v60, %v583_v5  ;;  %v587_v32 = vmul.f32 0.5, %v5551_v53  ;;  %v1615_v46 = vadd.f32 %v1359_v34, %v5593_v22  ;;  %v850_v40 = vmul.f32 %v5621_v7, %v5621_v7  ;;  %v5677_v34 = vld [vmem:[%s3837_s30 + $0x678] sm:$0xff] }
 0x1ef   : > { %v1870_v2 = vmul.f32 0.7978846, %v1614_v12  ;;  %v1616_v14 = vadd.f32 %v1360_v50, %v5597_v23  ;;  %v1361_v6 = vmul.f32 0.044715, %v1105_v39  ;;  %v851_v21 = vmul.f32 %v5624_v63, %v5624_v63  ;;  %v5683_v50 = vld [vmem:[%s3837_s30 + $0x680] sm:$0xff] }
 0x1f0   : > { %2887 = vst [vmem:[%s3960_s17 + $0x5e8] sm:$0xff] %v2631_v52  ;;  %v588_v59 = vmul.f32 0.5, %v5562_v29  ;;  %v1871_v27 = vmul.f32 0.7978846, %v1615_v46  ;;  %v1106_v17 = vmul.f32 %v850_v40, %v5621_v7  ;;  %v852_v53 = vmul.f32 %v5631_v13, %v5631_v13 }
 0x1f1   : > { %v3493_v26 = vpop.eup %3492  ;;  %3504 = vtanh.f32 %v1870_v2  ;;  %v1872_v11 = vmul.f32 0.7978846, %v1616_v14  ;;  %v1617_v33 = vadd.f32 %v1361_v6, %v5609_v3  ;;  %v1107_v20 = vmul.f32 %v851_v21, %v5624_v63 }
 0x1f2   : > { %v3495_v38 = vpop.eup %3494  ;;  %v2376_v44 = vadd.f32 1.0, %v3493_v26  ;;  %3506 = vtanh.f32 %v1871_v27  ;;  %v1362_v36 = vmul.f32 0.044715, %v1106_v17  ;;  %v1108_v29 = vmul.f32 %v852_v53, %v5631_v13 }
 0x1f3   : > { %v3497_v25 = vpop.eup %3496  ;;  %v2377_v1 = vadd.f32 1.0, %v3495_v38  ;;  %3508 = vtanh.f32 %v1872_v11  ;;  %v1873_v57 = vmul.f32 0.7978846, %v1617_v33  ;;  %v1363_v30 = vmul.f32 0.044715, %v1107_v20 }
 0x1f4   : > { %v3499_v16 = vpop.eup %3498  ;;  %v2632_v43 = vmul.f32 %v2376_v44, %v584_v41  ;;  %v2378_v47 = vadd.f32 1.0, %v3497_v25  ;;  %v1618_v54 = vadd.f32 %v1362_v36, %v5621_v7  ;;  %v1364_v5 = vmul.f32 0.044715, %v1108_v29 }
 0x1f5   : > { %v2633_v55 = vmul.f32 %v2377_v1, %v585_v35  ;;  %v2379_v58 = vadd.f32 1.0, %v3499_v16  ;;  %3510 = vtanh.f32 %v1873_v57  ;;  %v1619_v4 = vadd.f32 %v1363_v30, %v5624_v63  ;;  %v5706_v16 = vld [vmem:[%s3837_s30 + $0x688] sm:$0xff] }
 0x1f6   : > { %v3501_v48 = vpop.eup %3500  ;;  %2888 = vst [vmem:[%s3960_s17 + $0x5f0] sm:$0xff] %v2632_v43  ;;  %v2634_v41 = vmul.f32 %v2378_v47, %v586_v49  ;;  %v589_v31 = vmul.f32 0.5, %v5570_v18  ;;  %v1874_v19 = vmul.f32 0.7978846, %v1618_v54  ;;  %v1620_v8 = vadd.f32 %v1364_v5, %v5631_v13 }
 0x1f7   : > { %2889 = vst [vmem:[%s3960_s17 + $0x5f8] sm:$0xff] %v2633_v55  ;;  %v2635_v15 = vmul.f32 %v2379_v58, %v587_v32  ;;  %v2380_v62 = vadd.f32 1.0, %v3501_v48  ;;  %v1875_v35 = vmul.f32 0.7978846, %v1619_v4  ;;  %v853_v51 = vmul.f32 %v5651_v10, %v5651_v10  ;;  %v5710_v55 = vld [vmem:[%s3837_s30 + $0x690] sm:$0xff] }
 0x1f8   : > { %2890 = vst [vmem:[%s3960_s17 + $0x600] sm:$0xff] %v2634_v41  ;;  %v590_v24 = vmul.f32 0.5, %v5589_v9  ;;  %3512 = vtanh.f32 %v1874_v19  ;;  %v1876_v18 = vmul.f32 0.7978846, %v1620_v8  ;;  %v854_v61 = vmul.f32 %v5655_v0, %v5655_v0 }
 0x1f9   : > { %v3503_v42 = vpop.eup %3502  ;;  %2891 = vst [vmem:[%s3960_s17 + $0x608] sm:$0xff] %v2635_v15  ;;  %v2636_v45 = vmul.f32 %v2380_v62, %v588_v59  ;;  %v591_v37 = vmul.f32 0.5, %v5593_v22  ;;  %3514 = vtanh.f32 %v1875_v35  ;;  %v1109_v60 = vmul.f32 %v853_v51, %v5651_v10  ;;  %v5718_v15 = vld [vmem:[%s3837_s30 + $0x698] sm:$0xff] }
 0x1fa   : > { %v2381_v9 = vadd.f32 1.0, %v3503_v42  ;;  %3516 = vtanh.f32 %v1876_v18  ;;  %v1110_v49 = vmul.f32 %v854_v61, %v5655_v0  ;;  %v855_v12 = vmul.f32 %v5664_v56, %v5664_v56 }
 0x1fb   : > { %2892 = vst [vmem:[%s3960_s17 + $0x610] sm:$0xff] %v2636_v45  ;;  %v592_v39 = vmul.f32 0.5, %v5597_v23  ;;  %v593_v22 = vmul.f32 0.5, %v5609_v3  ;;  %v1365_v52 = vmul.f32 0.044715, %v1109_v60  ;;  %v856_v32 = vmul.f32 %v5671_v28, %v5671_v28 }
 0x1fc   : > { %v2637_v46 = vmul.f32 %v2381_v9, %v589_v31  ;;  %v1366_v40 = vmul.f32 0.044715, %v1110_v49  ;;  %v1111_v2 = vmul.f32 %v855_v12, %v5664_v56  ;;  %v857_v14 = vmul.f32 %v5677_v34, %v5677_v34  ;;  %v5731_v12 = vld [vmem:[%s3837_s30 + $0x6a0] sm:$0xff] }
 0x1fd   : > { %v594_v6 = vmul.f32 0.5, %v5621_v7  ;;  %v1621_v21 = vadd.f32 %v1365_v52, %v5651_v10  ;;  %v1112_v59 = vmul.f32 %v856_v32, %v5671_v28  ;;  %v858_v23 = vmul.f32 %v5683_v50, %v5683_v50  ;;  %v5735_v32 = vld [vmem:[%s3837_s30 + $0x6a8] sm:$0xff] }
 0x1fe   : > { %v3505_v3 = vpop.eup %3504  ;;  %2893 = vst [vmem:[%s3960_s17 + $0x618] sm:$0xff] %v2637_v46  ;;  %v595_v27 = vmul.f32 0.5, %v5624_v63  ;;  %v1622_v17 = vadd.f32 %v1366_v40, %v5655_v0  ;;  %v1367_v53 = vmul.f32 0.044715, %v1111_v2  ;;  %v1113_v26 = vmul.f32 %v857_v14, %v5677_v34  ;;  %v5739_v14 = vld [vmem:[%s3837_s30 + $0x6b0] sm:$0xff] }
 0x1ff   : > { %v3507_v11 = vpop.eup %3506  ;;  %v2382_v33 = vadd.f32 1.0, %v3505_v3  ;;  %v1877_v7 = vmul.f32 0.7978846, %v1621_v21  ;;  %v1368_v20 = vmul.f32 0.044715, %v1112_v59  ;;  %v1114_v38 = vmul.f32 %v858_v23, %v5683_v50  ;;  %v5747_v23 = vld [vmem:[%s3837_s30 + $0x6b8] sm:$0xff] }
 0x200   : > { %v3509_v44 = vpop.eup %3508  ;;  %v2383_v36 = vadd.f32 1.0, %v3507_v11  ;;  %v1878_v29 = vmul.f32 0.7978846, %v1622_v17  ;;  %v1623_v25 = vadd.f32 %v1367_v53, %v5664_v56  ;;  %v1369_v63 = vmul.f32 0.044715, %v1113_v26 }
 0x201   : > { %v2638_v1 = vmul.f32 %v2382_v33, %v590_v24  ;;  %v2384_v57 = vadd.f32 1.0, %v3509_v44  ;;  %3518 = vtanh.f32 %v1877_v7  ;;  %v1624_v30 = vadd.f32 %v1368_v20, %v5671_v28 }
 0x202   : > { %v3511_v43 = vpop.eup %3510  ;;  %v2639_v47 = vmul.f32 %v2383_v36, %v591_v37  ;;  %3520 = vtanh.f32 %v1878_v29  ;;  %v1879_v54 = vmul.f32 0.7978846, %v1623_v25  ;;  %v1625_v5 = vadd.f32 %v1369_v63, %v5677_v34  ;;  %v5766_v25 = vld [vmem:[%s3837_s30 + $0x6c0] sm:$0xff] }
 0x203   : > { %2894 = vst [vmem:[%s3960_s17 + $0x620] sm:$0xff] %v2638_v1  ;;  %v2640_v58 = vmul.f32 %v2384_v57, %v592_v39  ;;  %v2385_v4 = vadd.f32 1.0, %v3511_v43  ;;  %v1880_v48 = vmul.f32 0.7978846, %v1624_v30  ;;  %v1370_v41 = vmul.f32 0.044715, %v1114_v38 }
 0x204   : > { %2895 = vst [vmem:[%s3960_s17 + $0x628] sm:$0xff] %v2639_v47  ;;  %v596_v31 = vmul.f32 0.5, %v5631_v13  ;;  %3522 = vtanh.f32 %v1879_v54  ;;  %v1881_v19 = vmul.f32 0.7978846, %v1625_v5  ;;  %v859_v8 = vmul.f32 %v5706_v16, %v5706_v16 }
 0x205   : > { %v3513_v62 = vpop.eup %3512  ;;  %2896 = vst [vmem:[%s3960_s17 + $0x630] sm:$0xff] %v2640_v58  ;;  %v2641_v35 = vmul.f32 %v2385_v4, %v593_v22  ;;  %3524 = vtanh.f32 %v1880_v48  ;;  %v1626_v51 = vadd.f32 %v1370_v41, %v5683_v50  ;;  %v860_v24 = vmul.f32 %v5710_v55, %v5710_v55 }
 0x206   : > { %v3515_v18 = vpop.eup %3514  ;;  %v2386_v13 = vadd.f32 1.0, %v3513_v62  ;;  %v597_v61 = vmul.f32 0.5, %v5651_v10  ;;  %3526 = vtanh.f32 %v1881_v19  ;;  %v1115_v42 = vmul.f32 %v859_v8, %v5706_v16 }
 0x207   : > { %v3517_v45 = vpop.eup %3516  ;;  %2897 = vst [vmem:[%s3960_s17 + $0x638] sm:$0xff] %v2641_v35  ;;  %v2387_v37 = vadd.f32 1.0, %v3515_v18  ;;  %v1882_v60 = vmul.f32 0.7978846, %v1626_v51  ;;  %v1116_v9 = vmul.f32 %v860_v24, %v5710_v55  ;;  %v861_v49 = vmul.f32 %v5718_v15, %v5718_v15 }
 0x208   : > { %v2642_v39 = vmul.f32 %v2386_v13, %v594_v6  ;;  %v2388_v10 = vadd.f32 1.0, %v3517_v45  ;;  %v598_v22 = vmul.f32 0.5, %v5655_v0  ;;  %v1371_v52 = vmul.f32 0.044715, %v1115_v42 }
 0x209   : > { %v2643_v46 = vmul.f32 %v2387_v37, %v595_v27  ;;  %3528 = vtanh.f32 %v1882_v60  ;;  %v1372_v40 = vmul.f32 0.044715, %v1116_v9  ;;  %v1117_v2 = vmul.f32 %v861_v49, %v5718_v15 }
 0x20a   : > { %2898 = vst [vmem:[%s3960_s17 + $0x640] sm:$0xff] %v2642_v39  ;;  %v2644_v21 = vmul.f32 %v2388_v10, %v596_v31  ;;  %v599_v59 = vmul.f32 0.5, %v5664_v56  ;;  %v1627_v6 = vadd.f32 %v1371_v52, %v5706_v16  ;;  %v862_v0 = vmul.f32 %v5731_v12, %v5731_v12  ;;  %v5782_v39 = vld [vmem:[%s3837_s30 + $0x6d0] sm:$0xff]  ;;  %v5785_v10 = vld [vmem:[%s3837_s30 + $0x6d8] sm:$0xff] }
 0x20b   : > { %2899 = vst [vmem:[%s3960_s17 + $0x648] sm:$0xff] %v2643_v46  ;;  %v600_v3 = vmul.f32 0.5, %v5671_v28  ;;  %v1628_v27 = vadd.f32 %v1372_v40, %v5710_v55  ;;  %v1373_v17 = vmul.f32 0.044715, %v1117_v2  ;;  %v863_v53 = vmul.f32 %v5735_v32, %v5735_v32 }
 0x20c   : > { %2900 = vst [vmem:[%s3960_s17 + $0x650] sm:$0xff] %v2644_v21  ;;  %v601_v56 = vmul.f32 0.5, %v5677_v34  ;;  %v1883_v26 = vmul.f32 0.7978846, %v1627_v6  ;;  %v1118_v11 = vmul.f32 %v862_v0, %v5731_v12  ;;  %v864_v33 = vmul.f32 %v5739_v14, %v5739_v14  ;;  %v5794_v6 = vld [vmem:[%s3837_s30 + $0x6e0] sm:$0xff] }
 0x20d   : > { %v1884_v7 = vmul.f32 0.7978846, %v1628_v27  ;;  %v1629_v20 = vadd.f32 %v1373_v17, %v5718_v15  ;;  %v1119_v28 = vmul.f32 %v863_v53, %v5735_v32  ;;  %v865_v38 = vmul.f32 %v5747_v23, %v5747_v23  ;;  %v5804_v53 = vld [vmem:[%s3837_s30 + $0x6e8] sm:$0xff] }
 0x20e   : > { %v3519_v44 = vpop.eup %3518  ;;  %v602_v36 = vmul.f32 0.5, %v5683_v50  ;;  %3530 = vtanh.f32 %v1883_v26  ;;  %v1374_v29 = vmul.f32 0.044715, %v1118_v11  ;;  %v1120_v34 = vmul.f32 %v864_v33, %v5739_v14 }
 0x20f   : > { %v3521_v63 = vpop.eup %3520  ;;  %v2389_v1 = vadd.f32 1.0, %v3519_v44  ;;  %3532 = vtanh.f32 %v1884_v7  ;;  %v1885_v57 = vmul.f32 0.7978846, %v1629_v20  ;;  %v1375_v30 = vmul.f32 0.044715, %v1119_v28  ;;  %v5812_v20 = vld [vmem:[%s3837_s30 + $0x6f0] sm:$0xff] }
 0x210   : > { %v2390_v43 = vadd.f32 1.0, %v3521_v63  ;;  %v1630_v47 = vadd.f32 %v1374_v29, %v5731_v12  ;;  %v1376_v54 = vmul.f32 0.044715, %v1120_v34  ;;  %v1121_v5 = vmul.f32 %v865_v38, %v5747_v23 }
 0x211   : > { %v3523_v58 = vpop.eup %3522  ;;  %v2645_v50 = vmul.f32 %v2389_v1, %v597_v61  ;;  %3534 = vtanh.f32 %v1885_v57  ;;  %v1631_v4 = vadd.f32 %v1375_v30, %v5735_v32  ;;  %v866_v48 = vmul.f32 %v5766_v25, %v5766_v25  ;;  %v5777_v61 = vld [vmem:[%s3837_s30 + $0x6c8] sm:$0xff] }
 0x212   : > { %v3525_v41 = vpop.eup %3524  ;;  %v2646_v31 = vmul.f32 %v2390_v43, %v598_v22  ;;  %v2391_v19 = vadd.f32 1.0, %v3523_v58  ;;  %v1886_v8 = vmul.f32 0.7978846, %v1630_v47  ;;  %v1632_v62 = vadd.f32 %v1376_v54, %v5739_v14 }
 0x213   : > { %v3527_v35 = vpop.eup %3526  ;;  %2901 = vst [vmem:[%s3960_s17 + $0x658] sm:$0xff] %v2645_v50  ;;  %v2392_v51 = vadd.f32 1.0, %v3525_v41  ;;  %v1887_v24 = vmul.f32 0.7978846, %v1631_v4  ;;  %v1377_v18 = vmul.f32 0.044715, %v1121_v5  ;;  %v1122_v13 = vmul.f32 %v866_v48, %v5766_v25 }
 0x214   : > { %2902 = vst [vmem:[%s3960_s17 + $0x660] sm:$0xff] %v2646_v31  ;;  %v2647_v42 = vmul.f32 %v2391_v19, %v599_v59  ;;  %v2393_v45 = vadd.f32 1.0, %v3527_v35  ;;  %3536 = vtanh.f32 %v1886_v8  ;;  %v1888_v37 = vmul.f32 0.7978846, %v1632_v62  ;;  %v5827_v31 = vld [vmem:[%s3837_s30 + $0x6f8] sm:$0xff] }
 0x215   : > { %v2648_v60 = vmul.f32 %v2392_v51, %v600_v3  ;;  %3538 = vtanh.f32 %v1887_v24  ;;  %v1633_v9 = vadd.f32 %v1377_v18, %v5747_v23  ;;  %v1378_v49 = vmul.f32 0.044715, %v1122_v13 }
 0x216   : > { %v3529_v22 = vpop.eup %3528  ;;  %2903 = vst [vmem:[%s3960_s17 + $0x668] sm:$0xff] %v2647_v42  ;;  %v2649_v52 = vmul.f32 %v2393_v45, %v601_v56  ;;  %3540 = vtanh.f32 %v1888_v37  ;;  %v867_v46 = vmul.f32 %v5777_v61, %v5777_v61  ;;  %v603_v2 = vmul.f32 0.5, %v5706_v16 }
 0x217   : > { %2904 = vst [vmem:[%s3960_s17 + $0x670] sm:$0xff] %v2648_v60  ;;  %v2394_v40 = vadd.f32 1.0, %v3529_v22  ;;  %v1889_v21 = vmul.f32 0.7978846, %v1633_v9  ;;  %v1634_v59 = vadd.f32 %v1378_v49, %v5766_v25  ;;  %v604_v0 = vmul.f32 0.5, %v5710_v55  ;;  %v5838_v9 = vld [vmem:[%s3837_s30 + $0x700] sm:$0xff] }
 0x218   : > { %2905 = vst [vmem:[%s3960_s17 + $0x678] sm:$0xff] %v2649_v52  ;;  %v1123_v3 = vmul.f32 %v867_v46, %v5777_v61  ;;  %v868_v27 = vmul.f32 %v5782_v39, %v5782_v39  ;;  %v869_v17 = vmul.f32 %v5785_v10, %v5785_v10  ;;  %v605_v56 = vmul.f32 0.5, %v5718_v15 }
 0x219   : > { %v2650_v16 = vmul.f32 %v2394_v40, %v602_v36  ;;  %3542 = vtanh.f32 %v1889_v21  ;;  %v1890_v26 = vmul.f32 0.7978846, %v1634_v59  ;;  %v870_v7 = vmul.f32 %v5794_v6, %v5794_v6  ;;  %v5844_v59 = vld [vmem:[%s3837_s30 + $0x708] sm:$0xff] }
 0x21a   : > { %v1379_v11 = vmul.f32 0.044715, %v1123_v3  ;;  %v1124_v33 = vmul.f32 %v868_v27, %v5782_v39  ;;  %v1125_v55 = vmul.f32 %v869_v17, %v5785_v10  ;;  %v606_v38 = vmul.f32 0.5, %v5731_v12  ;;  %v5850_v17 = vld [vmem:[%s3837_s30 + $0x710] sm:$0xff] }
 0x21b   : > { %v3531_v28 = vpop.eup %3530  ;;  %2906 = vst [vmem:[%s3960_s17 + $0x680] sm:$0xff] %v2650_v16  ;;  %v607_v44 = vmul.f32 0.5, %v5735_v32  ;;  %3544 = vtanh.f32 %v1890_v26  ;;  %v871_v15 = vmul.f32 %v5804_v53, %v5804_v53  ;;  %v1126_v30 = vmul.f32 %v870_v7, %v5794_v6 }
 0x21c   : > { %v3533_v36 = vpop.eup %3532  ;;  %v2395_v29 = vadd.f32 1.0, %v3531_v28  ;;  %v1635_v34 = vadd.f32 %v1379_v11, %v5777_v61  ;;  %v1380_v63 = vmul.f32 0.044715, %v1124_v33  ;;  %v1381_v1 = vmul.f32 0.044715, %v1125_v55  ;;  %v5859_v28 = vld [vmem:[%s3837_s30 + $0x718] sm:$0xff] }
 0x21d   : > { %v2396_v57 = vadd.f32 1.0, %v3533_v36  ;;  %v1127_v43 = vmul.f32 %v871_v15, %v5804_v53  ;;  %v872_v12 = vmul.f32 %v5812_v20, %v5812_v20  ;;  %v1382_v48 = vmul.f32 0.044715, %v1126_v30 }
 0x21e   : > { %v3535_v32 = vpop.eup %3534  ;;  %v2651_v47 = vmul.f32 %v2395_v29, %v603_v2  ;;  %v1891_v54 = vmul.f32 0.7978846, %v1635_v34  ;;  %v1636_v5 = vadd.f32 %v1380_v63, %v5782_v39  ;;  %v1637_v58 = vadd.f32 %v1381_v1, %v5785_v10  ;;  %v5868_v1 = vld [vmem:[%s3837_s30 + $0x720] sm:$0xff] }
 0x21f   : > { %v2652_v50 = vmul.f32 %v2396_v57, %v604_v0  ;;  %v2397_v4 = vadd.f32 1.0, %v3535_v32  ;;  %v1383_v41 = vmul.f32 0.044715, %v1127_v43  ;;  %v1128_v62 = vmul.f32 %v872_v12, %v5812_v20  ;;  %v5875_v12 = vld [vmem:[%s3837_s30 + $0x728] sm:$0xff] }
 0x220   : > { %2907 = vst [vmem:[%s3960_s17 + $0x688] sm:$0xff] %v2651_v47  ;;  %3546 = vtanh.f32 %v1891_v54  ;;  %v1892_v19 = vmul.f32 0.7978846, %v1636_v5  ;;  %v1893_v8 = vmul.f32 0.7978846, %v1637_v58  ;;  %v608_v24 = vmul.f32 0.5, %v5739_v14 }
 0x221   : > { %v3537_v35 = vpop.eup %3536  ;;  %2908 = vst [vmem:[%s3960_s17 + $0x690] sm:$0xff] %v2652_v50  ;;  %v2653_v51 = vmul.f32 %v2397_v4, %v605_v56  ;;  %v1638_v18 = vadd.f32 %v1382_v48, %v5794_v6  ;;  %v1639_v13 = vadd.f32 %v1383_v41, %v5804_v53  ;;  %v1384_v37 = vmul.f32 0.044715, %v1128_v62 }
 0x222   : > { %v3539_v42 = vpop.eup %3538  ;;  %v2398_v45 = vadd.f32 1.0, %v3537_v35  ;;  %3548 = vtanh.f32 %v1892_v19  ;;  %v873_v60 = vmul.f32 %v5827_v31, %v5827_v31  ;;  %v609_v3 = vmul.f32 0.5, %v5747_v23 }
 0x223   : > { %v3541_v49 = vpop.eup %3540  ;;  %2909 = vst [vmem:[%s3960_s17 + $0x698] sm:$0xff] %v2653_v51  ;;  %v2399_v22 = vadd.f32 1.0, %v3539_v42  ;;  %3550 = vtanh.f32 %v1893_v8  ;;  %v1894_v14 = vmul.f32 0.7978846, %v1638_v18  ;;  %v1895_v52 = vmul.f32 0.7978846, %v1639_v13 }
 0x224   : > { %v2654_v46 = vmul.f32 %v2398_v45, %v606_v38  ;;  %v2400_v40 = vadd.f32 1.0, %v3541_v49  ;;  %v1640_v2 = vadd.f32 %v1384_v37, %v5812_v20  ;;  %v1129_v21 = vmul.f32 %v873_v60, %v5827_v31  ;;  %v5893_v42 = vld [vmem:[%s3837_s30 + $0x730] sm:$0xff] }
 0x225   : > { %v2655_v0 = vmul.f32 %v2399_v22, %v607_v44  ;;  %3552 = vtanh.f32 %v1894_v14  ;;  %v874_v27 = vmul.f32 %v5838_v9, %v5838_v9  ;;  %v610_v55 = vmul.f32 0.5, %v5766_v25 }
 0x226   : > { %v3543_v16 = vpop.eup %3542  ;;  %2910 = vst [vmem:[%s3960_s17 + $0x6a0] sm:$0xff] %v2654_v46  ;;  %v2656_v56 = vmul.f32 %v2400_v40, %v608_v24  ;;  %3554 = vtanh.f32 %v1895_v52  ;;  %v1896_v26 = vmul.f32 0.7978846, %v1640_v2  ;;  %v1385_v11 = vmul.f32 0.044715, %v1129_v21 }
 0x227   : > { %2911 = vst [vmem:[%s3960_s17 + $0x6a8] sm:$0xff] %v2655_v0  ;;  %v2401_v33 = vadd.f32 1.0, %v3543_v16  ;;  %v1130_v23 = vmul.f32 %v874_v27, %v5838_v9  ;;  %v875_v7 = vmul.f32 %v5844_v59, %v5844_v59  ;;  %v611_v44 = vmul.f32 0.5, %v5777_v61  ;;  %v5900_v0 = vld [vmem:[%s3837_s30 + $0x738] sm:$0xff] }
 0x228   : > { %v3545_v38 = vpop.eup %3544  ;;  %2912 = vst [vmem:[%s3960_s17 + $0x6b0] sm:$0xff] %v2656_v56  ;;  %3556 = vtanh.f32 %v1896_v26  ;;  %v1641_v15 = vadd.f32 %v1385_v11, %v5827_v31  ;;  %v876_v36 = vmul.f32 %v5850_v17, %v5850_v17  ;;  %v612_v57 = vmul.f32 0.5, %v5782_v39 }
 0x229   : > { %v2657_v25 = vmul.f32 %v2401_v33, %v609_v3  ;;  %v2402_v29 = vadd.f32 1.0, %v3545_v38  ;;  %v1386_v34 = vmul.f32 0.044715, %v1130_v23  ;;  %v1131_v63 = vmul.f32 %v875_v7, %v5844_v59  ;;  %v5908_v23 = vld [vmem:[%s3837_s30 + $0x740] sm:$0xff] }
 0x22a   : > { %v1897_v30 = vmul.f32 0.7978846, %v1641_v15  ;;  %v1132_v43 = vmul.f32 %v876_v36, %v5850_v17  ;;  %v877_v61 = vmul.f32 %v5859_v28, %v5859_v28  ;;  %v613_v47 = vmul.f32 0.5, %v5785_v10 }
 0x22b   : > { %2913 = vst [vmem:[%s3960_s17 + $0x6b8] sm:$0xff] %v2657_v25  ;;  %v2658_v32 = vmul.f32 %v2402_v29, %v610_v55  ;;  %v1642_v54 = vadd.f32 %v1386_v34, %v5838_v9  ;;  %v1387_v5 = vmul.f32 0.044715, %v1131_v63  ;;  %v878_v39 = vmul.f32 %v5868_v1, %v5868_v1  ;;  %v5914_v25 = vld [vmem:[%s3837_s30 + $0x748] sm:$0xff] }
 0x22c   : > { %3558 = vtanh.f32 %v1897_v30  ;;  %v1388_v58 = vmul.f32 0.044715, %v1132_v43  ;;  %v1133_v50 = vmul.f32 %v877_v61, %v5859_v28  ;;  %v614_v48 = vmul.f32 0.5, %v5794_v6 }
 0x22d   : > { %v3547_v4 = vpop.eup %3546  ;;  %2914 = vst [vmem:[%s3960_s17 + $0x6c0] sm:$0xff] %v2658_v32  ;;  %v1898_v41 = vmul.f32 0.7978846, %v1642_v54  ;;  %v1643_v19 = vadd.f32 %v1387_v5, %v5844_v59  ;;  %v879_v10 = vmul.f32 %v5875_v12, %v5875_v12  ;;  %v1134_v51 = vmul.f32 %v878_v39, %v5868_v1  ;;  %v5930_v54 = vld [vmem:[%s3837_s30 + $0x758] sm:$0xff] }
 0x22e   : > { %v2403_v8 = vadd.f32 1.0, %v3547_v4  ;;  %v1644_v62 = vadd.f32 %v1388_v58, %v5850_v17  ;;  %v1389_v35 = vmul.f32 0.044715, %v1133_v50  ;;  %v615_v18 = vmul.f32 0.5, %v5804_v53 }
 0x22f   : > { %v3549_v24 = vpop.eup %3548  ;;  %3560 = vtanh.f32 %v1898_v41  ;;  %v1899_v13 = vmul.f32 0.7978846, %v1643_v19  ;;  %v1135_v6 = vmul.f32 %v879_v10, %v5875_v12  ;;  %v1390_v52 = vmul.f32 0.044715, %v1134_v51 }
 0x230   : > { %v3551_v45 = vpop.eup %3550  ;;  %v2659_v37 = vmul.f32 %v2403_v8, %v611_v44  ;;  %v2404_v60 = vadd.f32 1.0, %v3549_v24  ;;  %v1900_v49 = vmul.f32 0.7978846, %v1644_v62  ;;  %v1645_v22 = vadd.f32 %v1389_v35, %v5859_v28  ;;  %v5944_v35 = vld [vmem:[%s3837_s30 + $0x760] sm:$0xff] }
 0x231   : > { %v2405_v14 = vadd.f32 1.0, %v3551_v45  ;;  %3562 = vtanh.f32 %v1899_v13  ;;  %v1391_v46 = vmul.f32 0.044715, %v1135_v6  ;;  %v880_v21 = vmul.f32 %v5893_v42, %v5893_v42 }
 0x232   : > { %v3553_v40 = vpop.eup %3552  ;;  %2915 = vst [vmem:[%s3960_s17 + $0x6c8] sm:$0xff] %v2659_v37  ;;  %v2660_v53 = vmul.f32 %v2404_v60, %v612_v57  ;;  %3564 = vtanh.f32 %v1900_v49  ;;  %v1901_v2 = vmul.f32 0.7978846, %v1645_v22  ;;  %v1646_v56 = vadd.f32 %v1390_v52, %v5868_v1  ;;  %v5918_v57 = vld [vmem:[%s3837_s30 + $0x750] sm:$0xff] }
 0x233   : > { %v3555_v3 = vpop.eup %3554  ;;  %v2661_v27 = vmul.f32 %v2405_v14, %v613_v47  ;;  %v2406_v16 = vadd.f32 1.0, %v3553_v40  ;;  %v1647_v26 = vadd.f32 %v1391_v46, %v5875_v12  ;;  %v616_v33 = vmul.f32 0.5, %v5812_v20 }
 0x234   : > { %2916 = vst [vmem:[%s3960_s17 + $0x6d0] sm:$0xff] %v2660_v53  ;;  %v2407_v11 = vadd.f32 1.0, %v3555_v3  ;;  %3566 = vtanh.f32 %v1901_v2  ;;  %v1136_v55 = vmul.f32 %v880_v21, %v5893_v42  ;;  %v1902_v44 = vmul.f32 0.7978846, %v1646_v56 }
 0x235   : > { %v3557_v7 = vpop.eup %3556  ;;  %2917 = vst [vmem:[%s3960_s17 + $0x6d8] sm:$0xff] %v2661_v27  ;;  %v2662_v38 = vmul.f32 %v2406_v16, %v614_v48  ;;  %v1903_v15 = vmul.f32 0.7978846, %v1647_v26  ;;  %v881_v36 = vmul.f32 %v5900_v0, %v5900_v0  ;;  %v617_v34 = vmul.f32 0.5, %v5827_v31 }
 0x236   : > { %v2663_v29 = vmul.f32 %v2407_v11, %v615_v18  ;;  %v2408_v20 = vadd.f32 1.0, %v3557_v7  ;;  %v1392_v63 = vmul.f32 0.044715, %v1136_v55  ;;  %v618_v30 = vmul.f32 0.5, %v5838_v9 }
 0x237   : > { %2918 = vst [vmem:[%s3960_s17 + $0x6e0] sm:$0xff] %v2662_v38  ;;  %3568 = vtanh.f32 %v1902_v44  ;;  %v1137_v43 = vmul.f32 %v881_v36, %v5900_v0  ;;  %v882_v61 = vmul.f32 %v5908_v23, %v5908_v23  ;;  %v883_v31 = vmul.f32 %v5914_v25, %v5914_v25 }
 0x238   : > { %2919 = vst [vmem:[%s3960_s17 + $0x6e8] sm:$0xff] %v2663_v29  ;;  %v2664_v32 = vmul.f32 %v2408_v20, %v616_v33  ;;  %3570 = vtanh.f32 %v1903_v15  ;;  %v1648_v47 = vadd.f32 %v1392_v63, %v5893_v42  ;;  %v619_v9 = vmul.f32 0.5, %v5844_v59  ;;  %v5963_v33 = vld [vmem:[%s3837_s30 + $0x770] sm:$0xff]  ;;  %v5970_v20 = vld [vmem:[%s3837_s30 + $0x778] sm:$0xff] }
 0x239   : > { %v3559_v5 = vpop.eup %3558  ;;  %v1393_v58 = vmul.f32 0.044715, %v1137_v43  ;;  %v1138_v50 = vmul.f32 %v882_v61, %v5908_v23  ;;  %v884_v39 = vmul.f32 %v5918_v57, %v5918_v57  ;;  %v620_v48 = vmul.f32 0.5, %v5850_v17 }
 0x23a   : > { %2920 = vst [vmem:[%s3960_s17 + $0x6f0] sm:$0xff] %v2664_v32  ;;  %v2409_v4 = vadd.f32 1.0, %v3559_v5  ;;  %v1904_v41 = vmul.f32 0.7978846, %v1648_v47  ;;  %v1139_v19 = vmul.f32 %v883_v31, %v5914_v25  ;;  %v885_v59 = vmul.f32 %v5930_v54, %v5930_v54  ;;  %v5978_v5 = vld [vmem:[%s3837_s30 + $0x780] sm:$0xff] }
 0x23b   : > { %v1649_v10 = vadd.f32 %v1393_v58, %v5900_v0  ;;  %v1394_v8 = vmul.f32 0.044715, %v1138_v50  ;;  %v1140_v62 = vmul.f32 %v884_v39, %v5918_v57  ;;  %v621_v18 = vmul.f32 0.5, %v5859_v28  ;;  %v5955_v28 = vld [vmem:[%s3837_s30 + $0x768] sm:$0xff] }
 0x23c   : > { %v3561_v51 = vpop.eup %3560  ;;  %v2665_v24 = vmul.f32 %v2409_v4, %v617_v34  ;;  %3572 = vtanh.f32 %v1904_v41  ;;  %v1395_v17 = vmul.f32 0.044715, %v1139_v19  ;;  %v622_v49 = vmul.f32 0.5, %v5868_v1  ;;  %v5986_v39 = vld [vmem:[%s3837_s30 + $0x788] sm:$0xff] }
 0x23d   : > { %v2410_v13 = vadd.f32 1.0, %v3561_v51  ;;  %v1905_v6 = vmul.f32 0.7978846, %v1649_v10  ;;  %v1650_v45 = vadd.f32 %v1394_v8, %v5908_v23  ;;  %v1396_v37 = vmul.f32 0.044715, %v1140_v62  ;;  %v5993_v62 = vld [vmem:[%s3837_s30 + $0x790] sm:$0xff] }
 0x23e   : > { %v3563_v60 = vpop.eup %3562  ;;  %2921 = vst [vmem:[%s3960_s17 + $0x6f8] sm:$0xff] %v2665_v24  ;;  %v1651_v22 = vadd.f32 %v1395_v17, %v5914_v25  ;;  %v1141_v14 = vmul.f32 %v885_v59, %v5930_v54  ;;  %v886_v52 = vmul.f32 %v5944_v35, %v5944_v35  ;;  %v887_v11 = vmul.f32 %v5955_v28, %v5955_v28 }
 0x23f   : > { %v3565_v46 = vpop.eup %3564  ;;  %v2666_v40 = vmul.f32 %v2410_v13, %v618_v30  ;;  %v2411_v53 = vadd.f32 1.0, %v3563_v60  ;;  %3574 = vtanh.f32 %v1905_v6  ;;  %v1906_v2 = vmul.f32 0.7978846, %v1650_v45 }
 0x240   : > { %v2412_v21 = vadd.f32 1.0, %v3565_v46  ;;  %v1907_v3 = vmul.f32 0.7978846, %v1651_v22  ;;  %v1652_v1 = vadd.f32 %v1396_v37, %v5918_v57  ;;  %v1397_v27 = vmul.f32 0.044715, %v1141_v14 }
 0x241   : > { %v3567_v16 = vpop.eup %3566  ;;  %2922 = vst [vmem:[%s3960_s17 + $0x700] sm:$0xff] %v2666_v40  ;;  %v2667_v56 = vmul.f32 %v2411_v53, %v619_v9  ;;  %3576 = vtanh.f32 %v1906_v2  ;;  %v1142_v26 = vmul.f32 %v886_v52, %v5944_v35  ;;  %v623_v44 = vmul.f32 0.5, %v5875_v12 }
 0x242   : > { %v2668_v55 = vmul.f32 %v2412_v21, %v620_v48  ;;  %v2413_v7 = vadd.f32 1.0, %v3567_v16  ;;  %3578 = vtanh.f32 %v1907_v3  ;;  %v1908_v38 = vmul.f32 0.7978846, %v1652_v1 }
 0x243   : > { %2923 = vst [vmem:[%s3960_s17 + $0x708] sm:$0xff] %v2667_v56  ;;  %v1653_v15 = vadd.f32 %v1397_v27, %v5930_v54  ;;  %v1398_v36 = vmul.f32 0.044715, %v1142_v26  ;;  %v1143_v29 = vmul.f32 %v887_v11, %v5955_v28  ;;  %v624_v30 = vmul.f32 0.5, %v5893_v42 }
 0x244   : > { %v3569_v34 = vpop.eup %3568  ;;  %2924 = vst [vmem:[%s3960_s17 + $0x710] sm:$0xff] %v2668_v55  ;;  %v2669_v63 = vmul.f32 %v2413_v7, %v621_v18  ;;  %3580 = vtanh.f32 %v1908_v38  ;;  %v888_v43 = vmul.f32 %v5963_v33, %v5963_v33  ;;  %v625_v58 = vmul.f32 0.5, %v5900_v0 }
 0x245   : > { %v3571_v12 = vpop.eup %3570  ;;  %v2414_v61 = vadd.f32 1.0, %v3569_v34  ;;  %v1909_v32 = vmul.f32 0.7978846, %v1653_v15  ;;  %v1654_v47 = vadd.f32 %v1398_v36, %v5944_v35  ;;  %v1399_v31 = vmul.f32 0.044715, %v1143_v29  ;;  %v6019_v15 = vld [vmem:[%s3837_s30 + $0x7a0] sm:$0xff] }
 0x246   : > { %2925 = vst [vmem:[%s3960_s17 + $0x718] sm:$0xff] %v2669_v63  ;;  %v2415_v9 = vadd.f32 1.0, %v3571_v12  ;;  %v1144_v42 = vmul.f32 %v888_v43, %v5963_v33  ;;  %v889_v50 = vmul.f32 %v5970_v20, %v5970_v20  ;;  %v890_v0 = vmul.f32 %v5978_v5, %v5978_v5  ;;  %v6025_v43 = vld [vmem:[%s3837_s30 + $0x7a8] sm:$0xff] }
 0x247   : > { %v2670_v4 = vmul.f32 %v2414_v61, %v622_v49  ;;  %3582 = vtanh.f32 %v1909_v32  ;;  %v1910_v48 = vmul.f32 0.7978846, %v1654_v47  ;;  %v1655_v41 = vadd.f32 %v1399_v31, %v5955_v28  ;;  %v6007_v49 = vld [vmem:[%s3837_s30 + $0x798] sm:$0xff]  ;;  %v6028_v47 = vld [vmem:[%s3837_s30 + $0x7b0] sm:$0xff] }
 0x248   : > { %v2671_v19 = vmul.f32 %v2415_v9, %v623_v44  ;;  %v1400_v10 = vmul.f32 0.044715, %v1144_v42  ;;  %v1145_v8 = vmul.f32 %v889_v50, %v5970_v20  ;;  %v626_v51 = vmul.f32 0.5, %v5908_v23 }
 0x249   : > { %v3573_v59 = vpop.eup %3572  ;;  %2926 = vst [vmem:[%s3960_s17 + $0x720] sm:$0xff] %v2670_v4  ;;  %3584 = vtanh.f32 %v1910_v48  ;;  %v1911_v24 = vmul.f32 0.7978846, %v1655_v41  ;;  %v891_v18 = vmul.f32 %v5986_v39, %v5986_v39  ;;  %v1146_v45 = vmul.f32 %v890_v0, %v5978_v5 }
 0x24a   : > { %2927 = vst [vmem:[%s3960_s17 + $0x728] sm:$0xff] %v2671_v19  ;;  %v2416_v17 = vadd.f32 1.0, %v3573_v59  ;;  %v1656_v13 = vadd.f32 %v1400_v10, %v5963_v33  ;;  %v1401_v6 = vmul.f32 0.044715, %v1145_v8  ;;  %v627_v37 = vmul.f32 0.5, %v5914_v25 }
 0x24b   : > { %3586 = vtanh.f32 %v1911_v24  ;;  %v1147_v60 = vmul.f32 %v891_v18, %v5986_v39  ;;  %v892_v23 = vmul.f32 %v5993_v62, %v5993_v62  ;;  %v1402_v40 = vmul.f32 0.044715, %v1146_v45 }
 0x24c   : > { %v3575_v22 = vpop.eup %3574  ;;  %v2672_v14 = vmul.f32 %v2416_v17, %v624_v30  ;;  %v1912_v52 = vmul.f32 0.7978846, %v1656_v13  ;;  %v1657_v46 = vadd.f32 %v1401_v6, %v5970_v20  ;;  %v628_v2 = vmul.f32 0.5, %v5918_v57  ;;  %v6052_v6 = vld [vmem:[%s3837_s30 + $0x7c0] sm:$0xff] }
 0x24d   : > { %v2417_v53 = vadd.f32 1.0, %v3575_v22  ;;  %v1403_v21 = vmul.f32 0.044715, %v1147_v60  ;;  %v1148_v25 = vmul.f32 %v892_v23, %v5993_v62  ;;  %v1658_v27 = vadd.f32 %v1402_v40, %v5978_v5  ;;  %v6057_v23 = vld [vmem:[%s3837_s30 + $0x7c8] sm:$0xff] }
 0x24e   : > { %v3577_v3 = vpop.eup %3576  ;;  %2928 = vst [vmem:[%s3960_s17 + $0x730] sm:$0xff] %v2672_v14  ;;  %3588 = vtanh.f32 %v1912_v52  ;;  %v1913_v1 = vmul.f32 0.7978846, %v1657_v46  ;;  %v893_v16 = vmul.f32 %v6007_v49, %v6007_v49  ;;  %v629_v34 = vmul.f32 0.5, %v5930_v54 }
 0x24f   : > { %v3579_v56 = vpop.eup %3578  ;;  %v2673_v26 = vmul.f32 %v2417_v53, %v625_v58  ;;  %v2418_v11 = vadd.f32 1.0, %v3577_v3  ;;  %v1659_v57 = vadd.f32 %v1403_v21, %v5986_v39  ;;  %v1404_v55 = vmul.f32 0.044715, %v1148_v25  ;;  %v6035_v58 = vld [vmem:[%s3837_s30 + $0x7b8] sm:$0xff] }
 0x250   : > { %v2419_v7 = vadd.f32 1.0, %v3579_v56  ;;  %3590 = vtanh.f32 %v1913_v1  ;;  %v1914_v38 = vmul.f32 0.7978846, %v1658_v27  ;;  %v1149_v44 = vmul.f32 %v893_v16, %v6007_v49 }
 0x251   : > { %v3581_v36 = vpop.eup %3580  ;;  %2929 = vst [vmem:[%s3960_s17 + $0x738] sm:$0xff] %v2673_v26  ;;  %v2674_v29 = vmul.f32 %v2418_v11, %v626_v51  ;;  %v1915_v63 = vmul.f32 0.7978846, %v1659_v57  ;;  %v1660_v30 = vadd.f32 %v1404_v55, %v5993_v62  ;;  %v630_v31 = vmul.f32 0.5, %v5944_v35  ;;  %v6072_v11 = vld [vmem:[%s3837_s30 + $0x7d0] sm:$0xff] }
 0x252   : > { %v2675_v12 = vmul.f32 %v2419_v7, %v627_v37  ;;  %v2420_v61 = vadd.f32 1.0, %v3581_v36  ;;  %3592 = vtanh.f32 %v1914_v38  ;;  %v1405_v32 = vmul.f32 0.044715, %v1149_v44 }
 0x253   : > { %2930 = vst [vmem:[%s3960_s17 + $0x740] sm:$0xff] %v2674_v29  ;;  %3594 = vtanh.f32 %v1915_v63  ;;  %v1916_v9 = vmul.f32 0.7978846, %v1660_v30  ;;  %v894_v54 = vmul.f32 %v6019_v15, %v6019_v15  ;;  %v631_v4 = vmul.f32 0.5, %v5955_v28 }
 0x254   : > { %v3583_v42 = vpop.eup %3582  ;;  %2931 = vst [vmem:[%s3960_s17 + $0x748] sm:$0xff] %v2675_v12  ;;  %v2676_v50 = vmul.f32 %v2420_v61, %v628_v2  ;;  %v1661_v48 = vadd.f32 %v1405_v32, %v6007_v49  ;;  %v895_v41 = vmul.f32 %v6025_v43, %v6025_v43  ;;  %v896_v10 = vmul.f32 %v6028_v47, %v6028_v47  ;;  %v6080_v61 = vld [vmem:[%s3837_s30 + $0x7d8] sm:$0xff] }
 0x255   : > { %v2421_v35 = vadd.f32 1.0, %v3583_v42  ;;  %3596 = vtanh.f32 %v1916_v9  ;;  %v1150_v19 = vmul.f32 %v894_v54, %v6019_v15  ;;  %v632_v0 = vmul.f32 0.5, %v5963_v33 }
 0x256   : > { %v3585_v8 = vpop.eup %3584  ;;  %2932 = vst [vmem:[%s3960_s17 + $0x750] sm:$0xff] %v2676_v50  ;;  %v1917_v28 = vmul.f32 0.7978846, %v1661_v48  ;;  %v1151_v59 = vmul.f32 %v895_v41, %v6025_v43  ;;  %v897_v51 = vmul.f32 %v6035_v58, %v6035_v58  ;;  %v1152_v13 = vmul.f32 %v896_v10, %v6028_v47  ;;  %v6096_v10 = vld [vmem:[%s3837_s30 + $0x7e8] sm:$0xff] }
 0x257   : > { %v2677_v24 = vmul.f32 %v2421_v35, %v629_v34  ;;  %v2422_v18 = vadd.f32 1.0, %v3585_v8  ;;  %v1406_v17 = vmul.f32 0.044715, %v1150_v19  ;;  %v633_v37 = vmul.f32 0.5, %v5970_v20 }
 0x258   : > { %v3587_v45 = vpop.eup %3586  ;;  %3598 = vtanh.f32 %v1917_v28  ;;  %v1407_v60 = vmul.f32 0.044715, %v1151_v59  ;;  %v1153_v33 = vmul.f32 %v897_v51, %v6035_v58  ;;  %v1408_v46 = vmul.f32 0.044715, %v1152_v13  ;;  %v6103_v13 = vld [vmem:[%s3837_s30 + $0x7f0] sm:$0xff] }
 0x259   : > { %2933 = vst [vmem:[%s3960_s17 + $0x758] sm:$0xff] %v2677_v24  ;;  %v2678_v22 = vmul.f32 %v2422_v18, %v630_v31  ;;  %v2423_v14 = vadd.f32 1.0, %v3587_v45  ;;  %v1662_v52 = vadd.f32 %v1406_v17, %v6019_v15  ;;  %v634_v40 = vmul.f32 0.5, %v5978_v5 }
 0x25a   : > { %v1663_v53 = vadd.f32 %v1407_v60, %v6025_v43  ;;  %v1409_v2 = vmul.f32 0.044715, %v1153_v33  ;;  %v898_v20 = vmul.f32 %v6052_v6, %v6052_v6  ;;  %v1664_v1 = vadd.f32 %v1408_v46, %v6028_v47  ;;  %v6109_v33 = vld [vmem:[%s3837_s30 + $0x7f8] sm:$0xff] }
 0x25b   : > { %v3589_v21 = vpop.eup %3588  ;;  %2934 = vst [vmem:[%s3960_s17 + $0x760] sm:$0xff] %v2678_v22  ;;  %v2679_v25 = vmul.f32 %v2423_v14, %v631_v4  ;;  %v1918_v3 = vmul.f32 0.7978846, %v1662_v52  ;;  %v899_v27 = vmul.f32 %v6057_v23, %v6057_v23  ;;  %v635_v55 = vmul.f32 0.5, %v5986_v39  ;;  %v6083_v39 = vld [vmem:[%s3837_s30 + $0x7e0] sm:$0xff] }
 0x25c   : > { %v2424_v16 = vadd.f32 1.0, %v3589_v21  ;;  %v1919_v56 = vmul.f32 0.7978846, %v1663_v53  ;;  %v1665_v5 = vadd.f32 %v1409_v2, %v6035_v58  ;;  %v1154_v26 = vmul.f32 %v898_v20, %v6052_v6 }
 0x25d   : > { %v3591_v57 = vpop.eup %3590  ;;  %2935 = vst [vmem:[%s3960_s17 + $0x768] sm:$0xff] %v2679_v25  ;;  %3600 = vtanh.f32 %v1918_v3  ;;  %v1920_v7 = vmul.f32 0.7978846, %v1664_v1  ;;  %v1155_v38 = vmul.f32 %v899_v27, %v6057_v23  ;;  %v900_v12 = vmul.f32 %v6072_v11, %v6072_v11 }
 0x25e   : > { %v2680_v44 = vmul.f32 %v2424_v16, %v632_v0  ;;  %v2425_v36 = vadd.f32 1.0, %v3591_v57  ;;  %3602 = vtanh.f32 %v1919_v56  ;;  %v1921_v29 = vmul.f32 0.7978846, %v1665_v5 }
 0x25f   : > { %v3593_v34 = vpop.eup %3592  ;;  %3604 = vtanh.f32 %v1920_v7  ;;  %v1410_v63 = vmul.f32 0.044715, %v1154_v26  ;;  %v1411_v30 = vmul.f32 0.044715, %v1155_v38  ;;  %v636_v54 = vmul.f32 0.5, %v5993_v62 }
 0x260   : > { %v3595_v32 = vpop.eup %3594  ;;  %2936 = vst [vmem:[%s3960_s17 + $0x770] sm:$0xff] %v2680_v44  ;;  %v2681_v31 = vmul.f32 %v2425_v36, %v633_v37  ;;  %v2426_v9 = vadd.f32 1.0, %v3593_v34  ;;  %3606 = vtanh.f32 %v1921_v29  ;;  %v1156_v48 = vmul.f32 %v900_v12, %v6072_v11 }
 0x261   : > { %v2427_v42 = vadd.f32 1.0, %v3595_v32  ;;  %v1666_v50 = vadd.f32 %v1410_v63, %v6052_v6  ;;  %v1667_v4 = vadd.f32 %v1411_v30, %v6057_v23  ;;  %v901_v19 = vmul.f32 %v6080_v61, %v6080_v61 }
 0x262   : > { %v3597_v41 = vpop.eup %3596  ;;  %2937 = vst [vmem:[%s3960_s17 + $0x778] sm:$0xff] %v2681_v31  ;;  %v2682_v35 = vmul.f32 %v2426_v9, %v634_v40  ;;  %v902_v62 = vmul.f32 %v6083_v39, %v6083_v39  ;;  %v637_v51 = vmul.f32 0.5, %v6007_v49  ;;  %v1412_v24 = vmul.f32 0.044715, %v1156_v48 }
 0x263   : > { %v2683_v8 = vmul.f32 %v2427_v42, %v635_v55  ;;  %v2428_v0 = vadd.f32 1.0, %v3597_v41  ;;  %v1922_v28 = vmul.f32 0.7978846, %v1666_v50  ;;  %v1923_v59 = vmul.f32 0.7978846, %v1667_v4 }
 0x264   : > { %2938 = vst [vmem:[%s3960_s17 + $0x780] sm:$0xff] %v2682_v35  ;;  %v1157_v18 = vmul.f32 %v901_v19, %v6080_v61  ;;  %v1158_v17 = vmul.f32 %v902_v62, %v6083_v39  ;;  %v903_v60 = vmul.f32 %v6096_v10, %v6096_v10  ;;  %v1668_v49 = vadd.f32 %v1412_v24, %v6072_v11 }
 0x265   : > { %v3599_v45 = vpop.eup %3598  ;;  %2939 = vst [vmem:[%s3960_s17 + $0x788] sm:$0xff] %v2683_v8  ;;  %v2684_v37 = vmul.f32 %v2428_v0, %v636_v54  ;;  %3608 = vtanh.f32 %v1922_v28  ;;  %v638_v52 = vmul.f32 0.5, %v6019_v15  ;;  %v904_v53 = vmul.f32 %v6103_v13, %v6103_v13 }
 0x266   : > { %v2429_v22 = vadd.f32 1.0, %v3599_v45  ;;  %3610 = vtanh.f32 %v1923_v59  ;;  %v1413_v14 = vmul.f32 0.044715, %v1157_v18  ;;  %v1414_v46 = vmul.f32 0.044715, %v1158_v17 }
 0x267   : > { %2940 = vst [vmem:[%s3960_s17 + $0x790] sm:$0xff] %v2684_v37  ;;  %v1159_v40 = vmul.f32 %v903_v60, %v6096_v10  ;;  %v1924_v20 = vmul.f32 0.7978846, %v1668_v49  ;;  %v905_v25 = vmul.f32 %v6109_v33, %v6109_v33  ;;  %v639_v3 = vmul.f32 0.5, %v6025_v43 }
 0x268   : > { %v2685_v2 = vmul.f32 %v2429_v22, %v637_v51  ;;  %v1669_v21 = vadd.f32 %v1413_v14, %v6080_v61  ;;  %v1670_v1 = vadd.f32 %v1414_v46, %v6083_v39  ;;  %v1160_v15 = vmul.f32 %v904_v53, %v6103_v13 }
 0x269   : > { %v1415_v27 = vmul.f32 0.044715, %v1159_v40  ;;  %v640_v56 = vmul.f32 0.5, %v6028_v47  ;;  %3612 = vtanh.f32 %v1924_v20  ;;  %v1161_v26 = vmul.f32 %v905_v25, %v6109_v33 }
 0x26a   : > { %v3601_v16 = vpop.eup %3600  ;;  %2941 = vst [vmem:[%s3960_s17 + $0x798] sm:$0xff] %v2685_v2  ;;  %v1925_v5 = vmul.f32 0.7978846, %v1669_v21  ;;  %v1926_v7 = vmul.f32 0.7978846, %v1670_v1  ;;  %v641_v29 = vmul.f32 0.5, %v6035_v58 }
 0x26b   : > { %v3603_v57 = vpop.eup %3602  ;;  %v2430_v55 = vadd.f32 1.0, %v3601_v16  ;;  %v1671_v38 = vadd.f32 %v1415_v27, %v6096_v10  ;;  %v1416_v43 = vmul.f32 0.044715, %v1160_v15  ;;  %v1417_v34 = vmul.f32 0.044715, %v1161_v26 }
 0x26c   : > { %v3605_v44 = vpop.eup %3604  ;;  %v2431_v36 = vadd.f32 1.0, %v3603_v57  ;;  %3614 = vtanh.f32 %v1925_v5  ;;  %v642_v48 = vmul.f32 0.5, %v6052_v6  ;;  %v643_v35 = vmul.f32 0.5, %v6057_v23 }
 0x26d   : > { %v3607_v63 = vpop.eup %3606  ;;  %v2686_v47 = vmul.f32 %v2430_v55, %v638_v52  ;;  %v2432_v30 = vadd.f32 1.0, %v3605_v44  ;;  %3616 = vtanh.f32 %v1926_v7  ;;  %v1927_v12 = vmul.f32 0.7978846, %v1671_v38 }
 0x26e   : > { %v2687_v32 = vmul.f32 %v2431_v36, %v639_v3  ;;  %v2433_v31 = vadd.f32 1.0, %v3607_v63  ;;  %v1672_v9 = vadd.f32 %v1416_v43, %v6103_v13  ;;  %v1673_v54 = vadd.f32 %v1417_v34, %v6109_v33 }
 0x26f   : > { %2942 = vst [vmem:[%s3960_s17 + $0x7a0] sm:$0xff] %v2686_v47  ;;  %v2688_v42 = vmul.f32 %v2432_v30, %v640_v56  ;;  %3618 = vtanh.f32 %v1927_v12  ;;  %v644_v59 = vmul.f32 0.5, %v6072_v11  ;;  %v645_v6 = vmul.f32 0.5, %v6080_v61 }
 0x270   : > { %2943 = vst [vmem:[%s3960_s17 + $0x7a8] sm:$0xff] %v2687_v32  ;;  %v2689_v58 = vmul.f32 %v2433_v31, %v641_v29  ;;  %v1928_v50 = vmul.f32 0.7978846, %v1672_v9  ;;  %v1929_v4 = vmul.f32 0.7978846, %v1673_v54  ;;  %v646_v23 = vmul.f32 0.5, %v6083_v39 }
 0x271   : > { %2944 = vst [vmem:[%s3960_s17 + $0x7b0] sm:$0xff] %v2688_v42  ;;  %v647_v22 = vmul.f32 0.5, %v6096_v10  ;;  %v648_v61 = vmul.f32 0.5, %v6103_v13  ;;  %v649_v40 = vmul.f32 0.5, %v6109_v33 }
 0x272   : > { %v3609_v41 = vpop.eup %3608  ;;  %2945 = vst [vmem:[%s3960_s17 + $0x7b8] sm:$0xff] %v2689_v58  ;;  %3620 = vtanh.f32 %v1928_v50 }
 0x273   : > { %v3611_v19 = vpop.eup %3610  ;;  %v2434_v62 = vadd.f32 1.0, %v3609_v41  ;;  %3622 = vtanh.f32 %v1929_v4 }
 0x274   : > { %v2435_v8 = vadd.f32 1.0, %v3611_v19 }
 0x275   : > { %v2690_v0 = vmul.f32 %v2434_v62, %v642_v48 }
 0x276   : > { %v2691_v28 = vmul.f32 %v2435_v8, %v643_v35  ;;  %v3613_v51 = vpop.eup %3612 }
 0x277   : > { %2946 = vst [vmem:[%s3960_s17 + $0x7c0] sm:$0xff] %v2690_v0  ;;  %v2436_v24 = vadd.f32 1.0, %v3613_v51 }
 0x278   : > { %2947 = vst [vmem:[%s3960_s17 + $0x7c8] sm:$0xff] %v2691_v28 }
 0x279   : > { %v3615_v18 = vpop.eup %3614  ;;  %v2692_v45 = vmul.f32 %v2436_v24, %v644_v59 }
 0x27a   : > { %v3617_v17 = vpop.eup %3616  ;;  %v2437_v37 = vadd.f32 1.0, %v3615_v18 }
 0x27b   : > { %v2438_v60 = vadd.f32 1.0, %v3617_v17  ;;  %2948 = vst [vmem:[%s3960_s17 + $0x7d0] sm:$0xff] %v2692_v45 }
 0x27c   : > { %v3619_v11 = vpop.eup %3618  ;;  %v2693_v49 = vmul.f32 %v2437_v37, %v645_v6 }
 0x27d   : > { %v2694_v14 = vmul.f32 %v2438_v60, %v646_v23  ;;  %v2439_v52 = vadd.f32 1.0, %v3619_v11 }
 0x27e   : > { %2949 = vst [vmem:[%s3960_s17 + $0x7d8] sm:$0xff] %v2693_v49 }
 0x27f   : > { %v3621_v39 = vpop.eup %3620  ;;  %2950 = vst [vmem:[%s3960_s17 + $0x7e0] sm:$0xff] %v2694_v14  ;;  %v2695_v46 = vmul.f32 %v2439_v52, %v647_v22 }
 0x280   : > { %v3623_v10 = vpop.eup %3622  ;;  %v2440_v53 = vadd.f32 1.0, %v3621_v39 }
 0x281   : > { %2951 = vst [vmem:[%s3960_s17 + $0x7e8] sm:$0xff] %v2695_v46  ;;  %v2441_v2 = vadd.f32 1.0, %v3623_v10 }
 0x282   : > { %v2696_v20 = vmul.f32 %v2440_v53, %v648_v61 }
 0x283   : > { %v2697_v13 = vmul.f32 %v2441_v2, %v649_v40 }
 0x284   : > { %2952 = vst [vmem:[%s3960_s17 + $0x7f0] sm:$0xff] %v2696_v20 }
 0x285   : > { %2953 = vst [vmem:[%s3960_s17 + $0x7f8] sm:$0xff] %v2697_v13 }
 0x286   : > { %3665 = shalt.err (!%p3662_p10)
}
 0x287   : > { %s3666_s13 = scalar_lea.hbm %s6153_s2, 32768  ;;  %s3670_s20 = scalar_lea.hbm %s6201_s1, 65536 }
 0x288   : > { %p3667_p0 = scmp.ne.s32.totalorder %s6153_s2, %s3666_s13  ;;  %p3671_p1 = scmp.lt.s32.totalorder %s6153_s2, %s6201_s1 }
 0x289   : > { %p3672_p3 = scmp.lt.s32.totalorder %s3670_s20, %s3666_s13 }
 0x28a   : > { %p3668_p2 = pnand %p3667_p0, %p6210_p12 }
 0x28b   : > { %p3673_p6 = por %p3672_p3, %p3671_p1 }
 0x28c   : > { %p3669_p9 = pneg %p3668_p2 }
 0x28e   : > { %p3674_p11 = pnand %p3673_p6, %p3669_p9 }
 0x290   : > { %3677 = shalt.err (!%p3674_p11)
}
 0x291   : > { %s3722_s24 = smov 512   ;;  %s3723_s26 = smov 32  }
 0x292   : > { %3064 = dma.vmem_to_hbm [thread:$0]  (%p6210_p12), %s6155_s27, 32768, %s6153_s2, %s2955_s10, %s3722_s24, %s3722_s24, %s3723_s26  }
 0x293 PF: > { %s2984_s30 = sand.u32 1, %s3704_s6   ;;  %p6211_p13 = scmp.ne.s32.totalorder %s6207_s19, 0 }
 0x294   : > { %p6212_p4 = scmp.ge.s32.totalorder %s3716_s9, 2  ;;  %s2985_s17 = scalar_lea.sflag [#allocation4], %s2984_s30 }
 0x296   : > { %p3071_p5 = pnand %p6212_p4, %p6211_p13 }
 0x298   : > { %p3072_p7 = pneg %p3071_p5 }
 0x29a   : > { %3699 = dma.done.wait (%p3072_p7), %s2985_s17, 32768  }
 0x29b   : > { %3701 = vsyncadd (%p3072_p7), %s2985_s17, 4294934528  ;;  %p14_p8 = scmp.ge.s32.totalorder %s3759_s12, 4   ;;  %s6213_s6 = smov %s3708_s7 }
 0x29c   : > { %s6214_s7 = smov %s3712_s8  ;;  %s6215_s8 = smov %s3771_s15 }
 0x29d   : > { %s6216_s9 = smov %s3759_s12  ;;  %16 = sbr.rel (!%p14_p8) target bundleno = 5 (0x5), region = 69 }
 0x2a2   :  { %2990 = vsyncpa [#allocation3], 1 }
 0x2a3   :  { %2992 = vsyncpa [#allocation3 + $0x1], 1 }
 0x2a4   :  { %2993 = vsyncpa [#allocation4], 1 }
 0x2a5   :  { %2995 = vsyncpa [#allocation4 + $0x1], 1 }

</bundles_post_ra>
